<compile_context>
chip_gen: v7x
topology: tpu7x:2x2x1
jax: 0.10.0
libtpu: 0.0.40
codegen_flags: <defaults>
</compile_context>

<pallas_src>
import functools

import jax
import jax.numpy as jnp
from jax.experimental import pallas as pl
from jax.experimental.pallas import tpu as pltpu

LANES = 128


def _round_up(x, m):
    return (x + m - 1) // m * m


# ---------------------------------------------------------------------------
# Kernel 1: fused [previous-BN affine] -> 3x3 conv (one K=9*Cin bf16 MXU matmul,
# f32 accumulate) -> per-image BatchNorm partial statistics.
# ---------------------------------------------------------------------------
def _conv_stats_kernel(src_ref, w_ref, sc_ref, sh_ref, conv_ref, stats_ref, patch_ref, *,
                       s, Wq, Wo, Ho, cin):
    # src_ref : (1, s*s, Sq, cin) f32  flattened (polyphase-split) padded activation
    # w_ref   : (9*cin, cpad)     bf16 packed weights (cout zero-padded to 128 lanes)
    # sc_ref, sh_ref: (1, cin) f32     previous layer's BN affine (identity for layer 0)
    # conv_ref: (1, Mx, cpad) f32      raw conv output (Mx = Ho*Wq; columns >= Wo are junk)
    # stats_ref: (1, 2, cpad) f32      [sum, sum_of_squares] over the Ho*Wo valid rows
    # patch_ref: (Mx, 9*cin) f32       VMEM scratch for the assembled patch matrix
    Mx = Ho * Wq
    sc = sc_ref[...]
    sh = sh_ref[...]
    for kh in range(3):
        for kw in range(3):
            p = (kh % s) * s + (kw % s)          # which polyphase plane
            off = (kh // s) * Wq + (kw // s)     # contiguous row offset inside that plane
            t = kh * 3 + kw
            tap = src_ref[0, p, off:off + Mx, :]                 # (Mx, cin), contiguous
            patch_ref[:, t * cin:(t + 1) * cin] = tap * sc + sh  # fused BN-apply of prev layer
    patch = patch_ref[...].astype(jnp.bfloat16)                  # (Mx, 9*cin) bf16
    conv = jnp.dot(patch, w_ref[...], preferred_element_type=jnp.float32)  # (Mx, cpad) f32
    conv_ref[0] = conv                                           # lane-dense (cpad = 128k) store
    # One-pass partial BatchNorm statistics over the valid (non-junk) rows.
    col = jax.lax.broadcasted_iota(jnp.int32, (Mx, 1), 0) % Wq
    valid = (col < Wo).astype(jnp.float32)                       # (Mx, 1)
    cm = conv * valid
    stats_ref[0, 0:1, :] = jnp.sum(cm, axis=0, keepdims=True)
    stats_ref[0, 1:2, :] = jnp.sum(cm * conv, axis=0, keepdims=True)


# ---------------------------------------------------------------------------
# Kernel 2: final BatchNorm apply + ReLU (elementwise, lane-dense).
# ---------------------------------------------------------------------------
def _bn_relu_kernel(conv_ref, sc_ref, sh_ref, o_ref):
    o_ref[0] = jnp.maximum(conv_ref[0] * sc_ref[...] + sh_ref[...], 0.0)


# ---------------------------------------------------------------------------
# Wrappers (pure data movement / tiny scalar math around the kernels).
# ---------------------------------------------------------------------------
def _make_source(act_nhwc, pad_val, stride):
    """Pad `act_nhwc` spatially with the per-channel value `pad_val` (chosen so the
    downstream in-kernel affine maps it to zero), split into stride*stride polyphase
    planes and flatten each plane, so every 3x3 tap is one contiguous slice in-kernel.
    Total size ~= 1x the activation (no 9x im2col)."""
    N, H, W, C = act_nhwc.shape
    Hp, Wp = H + 2, W + 2
    padded = jnp.broadcast_to(pad_val.reshape(1, 1, 1, C), (N, Hp, Wp, C))
    padded = padded.at[:, 1:H + 1, 1:W + 1, :].set(act_nhwc)
    if stride == 1:
        Hq, Wq = Hp, Wp
        q = padded.reshape(N, 1, Hp * Wp, C)
    else:
        assert stride == 2 and Hp % 2 == 0 and Wp % 2 == 0
        Hq, Wq = Hp // 2, Wp // 2
        planes = [padded[:, pr::2, pc::2, :] for pr in range(2) for pc in range(2)]
        q = jnp.stack(planes, axis=1).reshape(N, stride * stride, Hq * Wq, C)
    # Tail padding: the last taps read a couple of (junk) rows past Hq*Wq.
    sq_pad = _round_up(Hq * Wq + 8, 8)
    q = jnp.pad(q, ((0, 0), (0, 0), (0, sq_pad - Hq * Wq), (0, 0)))
    return q, Hq, Wq


def _pack_weights(w_hwio, cpad):
    kh, kw, cin, cout = w_hwio.shape
    w = jnp.zeros((kh, kw, cin, cpad), jnp.float32).at[:, :, :, :cout].set(w_hwio)
    return w.reshape(kh * kw * cin, cpad).astype(jnp.bfloat16)


def _conv_bn_stats(src, w_packed, in_scale, in_shift, *, s, Ho, Wo, Wq, cpad):
    N, nplanes, sq, cin = src.shape
    Mx = Ho * Wq
    kern = functools.partial(_conv_stats_kernel, s=s, Wq=Wq, Wo=Wo, Ho=Ho, cin=cin)
    return pl.pallas_call(
        kern,
        out_shape=(jax.ShapeDtypeStruct((N, Mx, cpad), jnp.float32),
                   jax.ShapeDtypeStruct((N, 2, cpad), jnp.float32)),
        grid=(N,),
        in_specs=[
            pl.BlockSpec((1, nplanes, sq, cin), lambda n: (n, 0, 0, 0)),
            pl.BlockSpec((w_packed.shape[0], cpad), lambda n: (0, 0)),
            pl.BlockSpec((1, cin), lambda n: (0, 0)),
            pl.BlockSpec((1, cin), lambda n: (0, 0)),
        ],
        out_specs=(pl.BlockSpec((1, Mx, cpad), lambda n: (n, 0, 0)),
                   pl.BlockSpec((1, 2, cpad), lambda n: (n, 0, 0))),
        scratch_shapes=[pltpu.VMEM((Mx, 9 * cin), jnp.float32)],
        compiler_params=pltpu.CompilerParams(
            dimension_semantics=("parallel",),        # batch axis shards across TCs (v7x)
            vmem_limit_bytes=32 * 1024 * 1024),
    )(src, w_packed, in_scale.reshape(1, cin), in_shift.reshape(1, cin))


def _bn_relu_apply(conv_out, scale, shift):
    N, Mx, cpad = conv_out.shape
    return pl.pallas_call(
        _bn_relu_kernel,
        out_shape=jax.ShapeDtypeStruct((N, Mx, cpad), jnp.float32),
        grid=(N,),
        in_specs=[pl.BlockSpec((1, Mx, cpad), lambda n: (n, 0, 0)),
                  pl.BlockSpec((1, cpad), lambda n: (0, 0)),
                  pl.BlockSpec((1, cpad), lambda n: (0, 0))],
        out_specs=pl.BlockSpec((1, Mx, cpad), lambda n: (n, 0, 0)),
        compiler_params=pltpu.CompilerParams(dimension_semantics=("parallel",)),
    )(conv_out, scale.reshape(1, cpad), shift.reshape(1, cpad))


def init_myblock_params(key, in_planes, planes, num_block):
    """Deterministic parameter init: conv weights ~ scaled normal, BN gamma=1 beta=0."""
    params = []
    cin = in_planes
    for _ in range(num_block):
        key, wk = jax.random.split(key)
        w_oihw = jax.random.normal(wk, (planes, cin, 3, 3), jnp.float32)
        w_oihw = w_oihw * jnp.sqrt(2.0 / (cin * 9))
        w_hwio = jnp.transpose(w_oihw, (2, 3, 1, 0))  # (3,3,Cin,Cout)
        params.append((w_hwio, jnp.ones((planes,), jnp.float32),
                       jnp.zeros((planes,), jnp.float32)))
        cin = planes
    return params


def myblock_forward(x_nchw, params, *, stride, num_block, eps=1e-5):
    strides = [stride] + [1] * (num_block - 1)
    x = jnp.transpose(x_nchw, (0, 2, 3, 1)).astype(jnp.float32)  # NCHW -> NHWC
    N, H, W, _ = x.shape
    cpad = _round_up(max(p[0].shape[-1] for p in params), LANES)

    act = x                                             # pre-affine activation (true channels)
    in_scale = jnp.ones((x.shape[-1],), jnp.float32)    # identity affine for the raw input
    in_shift = jnp.zeros((x.shape[-1],), jnp.float32)
    Hc, Wc = H, W
    conv_out = scale = shift = None
    Ho = Wo = Wq = cout_i = None

    # NOTE: for much larger spatial sizes one would additionally tile output rows (with a
    # halo'd manual DMA) inside each pallas_call; per-image blocks are plenty here.
    for i in range(num_block):
        s = strides[i]
        w_hwio, gamma, beta = params[i]
        cout_i = w_hwio.shape[-1]
        # Pad in PRE-affine space with the value the in-kernel affine maps to zero.
        pad_val = -in_shift / in_scale
        src, Hq, Wq = _make_source(act, pad_val, s)
        Ho = (Hc - 1) // s + 1
        Wo = (Wc - 1) // s + 1
        w_packed = _pack_weights(w_hwio, cpad)
        conv_out, stats = _conv_bn_stats(src, w_packed, in_scale, in_shift,
                                         s=s, Ho=Ho, Wo=Wo, Wq=Wq, cpad=cpad)
        # Finalize exact cross-image BatchNorm batch statistics (tiny).
        count = N * Ho * Wo
        tot = jnp.sum(stats, axis=0)                    # (2, cpad)
        mean = tot[0] / count
        var = jnp.maximum(tot[1] / count - mean * mean, 0.0)
        gamma_p = jnp.ones((cpad,), jnp.float32).at[:gamma.shape[0]].set(gamma)
        beta_p = jnp.zeros((cpad,), jnp.float32).at[:beta.shape[0]].set(beta)
        scale = gamma_p * jax.lax.rsqrt(var + eps)
        shift = beta_p - mean * scale
        if i < num_block - 1:
            # Next layer consumes the raw conv output; its kernel applies (scale, shift).
            act = conv_out.reshape(N, Ho, Wq, cpad)[:, :, :Wo, :cout_i]
            in_scale, in_shift = scale[:cout_i], shift[:cout_i]
            Hc, Wc = Ho, Wo

    # Last layer: BN apply + ReLU, then drop the lane/column padding.
    y = _bn_relu_apply(conv_out, scale, shift)
    y = y.reshape(N, Ho, Wq, cpad)[:, :, :Wo, :cout_i]
    return jnp.transpose(y, (0, 3, 1, 2))               # NHWC -> NCHW


def _reference_forward(x_nchw, params, *, stride, num_block):
    """Plain-JAX reference (f32, HIGHEST precision) for correctness checking."""
    strides = [stride] + [1] * (num_block - 1)
    x = jnp.transpose(x_nchw, (0, 2, 3, 1)).astype(jnp.float32)

    def conv_bn(x, w, g, b, s, relu):
        y = jax.lax.conv_general_dilated(
            x, w, window_strides=(s, s), padding=((1, 1), (1, 1)),
            dimension_numbers=("NHWC", "HWIO", "NHWC"),
            precision=jax.lax.Precision.HIGHEST)
        mean = jnp.mean(y, axis=(0, 1, 2), keepdims=True)
        var = jnp.mean((y - mean) ** 2, axis=(0, 1, 2), keepdims=True)
        y = (y - mean) * jax.lax.rsqrt(var + 1e-5) * g + b
        return jnp.maximum(y, 0.0) if relu else y

    for i in range(num_block - 1):
        w, g, b = params[i]
        x = conv_bn(x, w, g, b, strides[i], False)
    w, g, b = params[-1]
    x = conv_bn(x, w, g, b, 1, True)
    return jnp.transpose(x, (0, 3, 1, 2))


if __name__ == "__main__":
    key = jax.random.PRNGKey(0)
    N, in_planes, planes, H = 2, 4, 8, 16
    num_block, stride = 3, 2
    fb_features_size = (planes, H // stride, H // stride)  # backward-only; unused in forward

    kx, kp = jax.random.split(key)
    x = jax.random.normal(kx, (N, in_planes, H, H), jnp.float32)
    params = init_myblock_params(kp, in_planes, planes, num_block)

    fwd = jax.jit(functools.partial(myblock_forward, stride=stride, num_block=num_block))
    y = jax.block_until_ready(fwd(x, params))

    assert y.shape == (N, planes, H // stride, H // stride), y.shape
    ref = _reference_forward(x, params, stride=stride, num_block=num_block)
    assert bool(jnp.all(jnp.isfinite(y)))
    assert bool(jnp.all(y >= 0.0))  # trailing ReLU
    # Tolerance is relaxed vs. the pure-f32 version because the MXU matmul now runs on
    # bf16 operands (f32 accumulation / f32 BN math), as requested by the perf review.
    assert bool(jnp.allclose(y, ref, rtol=5e-2, atol=5e-2)), float(jnp.max(jnp.abs(y - ref)))
    print("KERNEL_OK")
</pallas_src>

<mosaic_0001>
module attributes {stable_mosaic.version = 11 : i64} {
  func.func @_conv_stats_kernel(%arg0: i32, %arg1: memref<1x4x96x4xf32, #tpu.memory_space<vmem>>, %arg2: memref<36x128xbf16, #tpu.memory_space<vmem>>, %arg3: memref<1x4xf32, #tpu.memory_space<vmem>>, %arg4: memref<1x4xf32, #tpu.memory_space<vmem>>, %arg5: memref<1x72x128xf32, #tpu.memory_space<vmem>>, %arg6: memref<1x2x128xf32, #tpu.memory_space<vmem>>, %arg7: memref<72x36xf32, #tpu.memory_space<vmem>>) attributes {dimension_semantics = [#tpu.dimension_semantics<parallel>], iteration_bounds = array<i64: 2>, scalar_prefetch = 0 : i64, scratch_operands = 1 : i64, tpu.core_type = #tpu.core_type<tc>, window_params = [{transform_indices = @transform_0, window_bounds = array<i64: 1, 4, 96, 4>}, {pipeline_mode = #tpu.pipeline_mode<synchronous>, transform_indices = @transform_1, window_bounds = array<i64: 36, 128>}, {pipeline_mode = #tpu.pipeline_mode<synchronous>, transform_indices = @transform_2, window_bounds = array<i64: 1, 4>}, {pipeline_mode = #tpu.pipeline_mode<synchronous>, transform_indices = @transform_3, window_bounds = array<i64: 1, 4>}, {transform_indices = @transform_4, window_bounds = array<i64: 1, 72, 128>}, {transform_indices = @transform_5, window_bounds = array<i64: 1, 2, 128>}]} {
    %c0 = arith.constant 0 : index
    %c0_0 = arith.constant 0 : index
    %0 = vector.load %arg3[%c0, %c0_0] : memref<1x4xf32, #tpu.memory_space<vmem>>, vector<1x4xf32>
    %c0_1 = arith.constant 0 : index
    %c0_2 = arith.constant 0 : index
    %1 = vector.load %arg4[%c0_1, %c0_2] : memref<1x4xf32, #tpu.memory_space<vmem>>, vector<1x4xf32>
    %c0_3 = arith.constant 0 : index
    %c0_4 = arith.constant 0 : index
    %c0_5 = arith.constant 0 : index
    %c0_6 = arith.constant 0 : index
    %2 = vector.load %arg1[%c0_3, %c0_4, %c0_5, %c0_6] : memref<1x4x96x4xf32, #tpu.memory_space<vmem>>, vector<1x1x72x4xf32>
    %3 = vector.shape_cast %2 : vector<1x1x72x4xf32> to vector<72x4xf32>
    %4 = vector.broadcast %0 : vector<1x4xf32> to vector<72x4xf32>
    %5 = arith.mulf %3, %4 : vector<72x4xf32>
    %6 = vector.broadcast %1 : vector<1x4xf32> to vector<72x4xf32>
    %7 = arith.addf %5, %6 : vector<72x4xf32>
    %c0_7 = arith.constant 0 : index
    %c0_8 = arith.constant 0 : index
    %8 = vector.load %arg7[%c0_7, %c0_8] : memref<72x36xf32, #tpu.memory_space<vmem>>, vector<72x4xf32>
    tpu.vector_store %arg7[%c0_7, %c0_8], %7 {strides = array<i32>} : memref<72x36xf32, #tpu.memory_space<vmem>>, vector<72x4xf32>,
    %c0_9 = arith.constant 0 : index
    %c1 = arith.constant 1 : index
    %c0_10 = arith.constant 0 : index
    %c0_11 = arith.constant 0 : index
    %9 = vector.load %arg1[%c0_9, %c1, %c0_10, %c0_11] : memref<1x4x96x4xf32, #tpu.memory_space<vmem>>, vector<1x1x72x4xf32>
    %10 = vector.shape_cast %9 : vector<1x1x72x4xf32> to vector<72x4xf32>
    %11 = vector.broadcast %0 : vector<1x4xf32> to vector<72x4xf32>
    %12 = arith.mulf %10, %11 : vector<72x4xf32>
    %13 = vector.broadcast %1 : vector<1x4xf32> to vector<72x4xf32>
    %14 = arith.addf %12, %13 : vector<72x4xf32>
    %c0_12 = arith.constant 0 : index
    %c4 = arith.constant 4 : index
    %15 = vector.load %arg7[%c0_12, %c4] : memref<72x36xf32, #tpu.memory_space<vmem>>, vector<72x4xf32>
    tpu.vector_store %arg7[%c0_12, %c4], %14 {strides = array<i32>} : memref<72x36xf32, #tpu.memory_space<vmem>>, vector<72x4xf32>,
    %c0_13 = arith.constant 0 : index
    %c0_14 = arith.constant 0 : index
    %c1_15 = arith.constant 1 : index
    %c0_16 = arith.constant 0 : index
    %16 = vector.load %arg1[%c0_13, %c0_14, %c1_15, %c0_16] : memref<1x4x96x4xf32, #tpu.memory_space<vmem>>, vector<1x1x72x4xf32>
    %17 = vector.shape_cast %16 : vector<1x1x72x4xf32> to vector<72x4xf32>
    %18 = vector.broadcast %0 : vector<1x4xf32> to vector<72x4xf32>
    %19 = arith.mulf %17, %18 : vector<72x4xf32>
    %20 = vector.broadcast %1 : vector<1x4xf32> to vector<72x4xf32>
    %21 = arith.addf %19, %20 : vector<72x4xf32>
    %c0_17 = arith.constant 0 : index
    %c8 = arith.constant 8 : index
    %22 = vector.load %arg7[%c0_17, %c8] : memref<72x36xf32, #tpu.memory_space<vmem>>, vector<72x4xf32>
    tpu.vector_store %arg7[%c0_17, %c8], %21 {strides = array<i32>} : memref<72x36xf32, #tpu.memory_space<vmem>>, vector<72x4xf32>,
    %c0_18 = arith.constant 0 : index
    %c2 = arith.constant 2 : index
    %c0_19 = arith.constant 0 : index
    %c0_20 = arith.constant 0 : index
    %23 = vector.load %arg1[%c0_18, %c2, %c0_19, %c0_20] : memref<1x4x96x4xf32, #tpu.memory_space<vmem>>, vector<1x1x72x4xf32>
    %24 = vector.shape_cast %23 : vector<1x1x72x4xf32> to vector<72x4xf32>
    %25 = vector.broadcast %0 : vector<1x4xf32> to vector<72x4xf32>
    %26 = arith.mulf %24, %25 : vector<72x4xf32>
    %27 = vector.broadcast %1 : vector<1x4xf32> to vector<72x4xf32>
    %28 = arith.addf %26, %27 : vector<72x4xf32>
    %c0_21 = arith.constant 0 : index
    %c12 = arith.constant 12 : index
    %29 = vector.load %arg7[%c0_21, %c12] : memref<72x36xf32, #tpu.memory_space<vmem>>, vector<72x4xf32>
    tpu.vector_store %arg7[%c0_21, %c12], %28 {strides = array<i32>} : memref<72x36xf32, #tpu.memory_space<vmem>>, vector<72x4xf32>,
    %c0_22 = arith.constant 0 : index
    %c3 = arith.constant 3 : index
    %c0_23 = arith.constant 0 : index
    %c0_24 = arith.constant 0 : index
    %30 = vector.load %arg1[%c0_22, %c3, %c0_23, %c0_24] : memref<1x4x96x4xf32, #tpu.memory_space<vmem>>, vector<1x1x72x4xf32>
    %31 = vector.shape_cast %30 : vector<1x1x72x4xf32> to vector<72x4xf32>
    %32 = vector.broadcast %0 : vector<1x4xf32> to vector<72x4xf32>
    %33 = arith.mulf %31, %32 : vector<72x4xf32>
    %34 = vector.broadcast %1 : vector<1x4xf32> to vector<72x4xf32>
    %35 = arith.addf %33, %34 : vector<72x4xf32>
    %c0_25 = arith.constant 0 : index
    %c16 = arith.constant 16 : index
    %36 = vector.load %arg7[%c0_25, %c16] : memref<72x36xf32, #tpu.memory_space<vmem>>, vector<72x4xf32>
    tpu.vector_store %arg7[%c0_25, %c16], %35 {strides = array<i32>} : memref<72x36xf32, #tpu.memory_space<vmem>>, vector<72x4xf32>,
    %c0_26 = arith.constant 0 : index
    %c2_27 = arith.constant 2 : index
    %c1_28 = arith.constant 1 : index
    %c0_29 = arith.constant 0 : index
    %37 = vector.load %arg1[%c0_26, %c2_27, %c1_28, %c0_29] : memref<1x4x96x4xf32, #tpu.memory_space<vmem>>, vector<1x1x72x4xf32>
    %38 = vector.shape_cast %37 : vector<1x1x72x4xf32> to vector<72x4xf32>
    %39 = vector.broadcast %0 : vector<1x4xf32> to vector<72x4xf32>
    %40 = arith.mulf %38, %39 : vector<72x4xf32>
    %41 = vector.broadcast %1 : vector<1x4xf32> to vector<72x4xf32>
    %42 = arith.addf %40, %41 : vector<72x4xf32>
    %c0_30 = arith.constant 0 : index
    %c20 = arith.constant 20 : index
    %43 = vector.load %arg7[%c0_30, %c20] : memref<72x36xf32, #tpu.memory_space<vmem>>, vector<72x4xf32>
    tpu.vector_store %arg7[%c0_30, %c20], %42 {strides = array<i32>} : memref<72x36xf32, #tpu.memory_space<vmem>>, vector<72x4xf32>,
    %c0_31 = arith.constant 0 : index
    %c0_32 = arith.constant 0 : index
    %c9 = arith.constant 9 : index
    %c0_33 = arith.constant 0 : index
    %44 = vector.load %arg1[%c0_31, %c0_32, %c9, %c0_33] : memref<1x4x96x4xf32, #tpu.memory_space<vmem>>, vector<1x1x72x4xf32>
    %45 = vector.shape_cast %44 : vector<1x1x72x4xf32> to vector<72x4xf32>
    %46 = vector.broadcast %0 : vector<1x4xf32> to vector<72x4xf32>
    %47 = arith.mulf %45, %46 : vector<72x4xf32>
    %48 = vector.broadcast %1 : vector<1x4xf32> to vector<72x4xf32>
    %49 = arith.addf %47, %48 : vector<72x4xf32>
    %c0_34 = arith.constant 0 : index
    %c24 = arith.constant 24 : index
    %50 = vector.load %arg7[%c0_34, %c24] : memref<72x36xf32, #tpu.memory_space<vmem>>, vector<72x4xf32>
    tpu.vector_store %arg7[%c0_34, %c24], %49 {strides = array<i32>} : memref<72x36xf32, #tpu.memory_space<vmem>>, vector<72x4xf32>,
    %c0_35 = arith.constant 0 : index
    %c1_36 = arith.constant 1 : index
    %c9_37 = arith.constant 9 : index
    %c0_38 = arith.constant 0 : index
    %51 = vector.load %arg1[%c0_35, %c1_36, %c9_37, %c0_38] : memref<1x4x96x4xf32, #tpu.memory_space<vmem>>, vector<1x1x72x4xf32>
    %52 = vector.shape_cast %51 : vector<1x1x72x4xf32> to vector<72x4xf32>
    %53 = vector.broadcast %0 : vector<1x4xf32> to vector<72x4xf32>
    %54 = arith.mulf %52, %53 : vector<72x4xf32>
    %55 = vector.broadcast %1 : vector<1x4xf32> to vector<72x4xf32>
    %56 = arith.addf %54, %55 : vector<72x4xf32>
    %c0_39 = arith.constant 0 : index
    %c28 = arith.constant 28 : index
    %57 = vector.load %arg7[%c0_39, %c28] : memref<72x36xf32, #tpu.memory_space<vmem>>, vector<72x4xf32>
    tpu.vector_store %arg7[%c0_39, %c28], %56 {strides = array<i32>} : memref<72x36xf32, #tpu.memory_space<vmem>>, vector<72x4xf32>,
    %c0_40 = arith.constant 0 : index
    %c0_41 = arith.constant 0 : index
    %c10 = arith.constant 10 : index
    %c0_42 = arith.constant 0 : index
    %58 = vector.load %arg1[%c0_40, %c0_41, %c10, %c0_42] : memref<1x4x96x4xf32, #tpu.memory_space<vmem>>, vector<1x1x72x4xf32>
    %59 = vector.shape_cast %58 : vector<1x1x72x4xf32> to vector<72x4xf32>
    %60 = vector.broadcast %0 : vector<1x4xf32> to vector<72x4xf32>
    %61 = arith.mulf %59, %60 : vector<72x4xf32>
    %62 = vector.broadcast %1 : vector<1x4xf32> to vector<72x4xf32>
    %63 = arith.addf %61, %62 : vector<72x4xf32>
    %c0_43 = arith.constant 0 : index
    %c32 = arith.constant 32 : index
    %64 = vector.load %arg7[%c0_43, %c32] : memref<72x36xf32, #tpu.memory_space<vmem>>, vector<72x4xf32>
    tpu.vector_store %arg7[%c0_43, %c32], %63 {strides = array<i32>} : memref<72x36xf32, #tpu.memory_space<vmem>>, vector<72x4xf32>,
    %c0_44 = arith.constant 0 : index
    %c0_45 = arith.constant 0 : index
    %65 = vector.load %arg7[%c0_44, %c0_45] : memref<72x36xf32, #tpu.memory_space<vmem>>, vector<72x36xf32>
    %66 = arith.truncf %65 : vector<72x36xf32> to vector<72x36xbf16>
    %c0_46 = arith.constant 0 : index
    %c0_47 = arith.constant 0 : index
    %67 = vector.load %arg2[%c0_46, %c0_47] : memref<36x128xbf16, #tpu.memory_space<vmem>>, vector<36x128xbf16>
    %cst = arith.constant dense<0.000000e+00> : vector<72x128xf32>
    %68 = tpu.matmul %66, %67, %cst {dimension_numbers = #tpu.dot_dimension_numbers<[1], [0], [0], [1], [0, 0, 1, 1], [], []>} : vector<72x36xbf16>, vector<36x128xbf16>, vector<72x128xf32> -> vector<72x128xf32>
    %c0_48 = arith.constant 0 : index
    %c0_49 = arith.constant 0 : index
    %c0_50 = arith.constant 0 : index
    %69 = vector.load %arg5[%c0_48, %c0_49, %c0_50] : memref<1x72x128xf32, #tpu.memory_space<vmem>>, vector<1x72x128xf32>
    %70 = vector.shape_cast %69 : vector<1x72x128xf32> to vector<72x128xf32>
    %71 = vector.shape_cast %68 : vector<72x128xf32> to vector<1x72x128xf32>
    tpu.vector_store %arg5[%c0_48, %c0_49, %c0_50], %71 {strides = array<i32>} : memref<1x72x128xf32, #tpu.memory_space<vmem>>, vector<1x72x128xf32>,
    %72 = tpu.iota {dimensions = array<i32: 0>} : vector<72x1xi32>
    %c9_i32 = arith.constant 9 : i32
    %c0_i32 = arith.constant 0 : i32
    %73 = arith.cmpi eq, %c9_i32, %c0_i32 : i32
    %c1_i32 = arith.constant 1 : i32
    %74 = arith.select %73, %c1_i32, %c9_i32 : i32
    %75 = vector.broadcast %74 : i32 to vector<72x1xi32>
    %76 = arith.remsi %72, %75 : vector<72x1xi32>
    %c0_i32_51 = arith.constant 0 : i32
    %77 = vector.broadcast %c0_i32_51 : i32 to vector<72x1xi32>
    %78 = arith.cmpi ne, %76, %77 : vector<72x1xi32>
    %c0_i32_52 = arith.constant 0 : i32
    %79 = vector.broadcast %c0_i32_52 : i32 to vector<72x1xi32>
    %80 = arith.cmpi slt, %76, %79 : vector<72x1xi32>
    %c0_i32_53 = arith.constant 0 : i32
    %81 = arith.cmpi slt, %74, %c0_i32_53 : i32
    %82 = vector.broadcast %81 : i1 to vector<72x1xi1>
    %83 = vector.broadcast %82 : vector<72x1xi1> to vector<72x1xi1>
    %84 = arith.xori %80, %83 : vector<72x1xi1>
    %85 = arith.andi %84, %78 : vector<72x1xi1>
    %86 = vector.broadcast %74 : i32 to vector<72x1xi32>
    %87 = arith.addi %76, %86 : vector<72x1xi32>
    %88 = arith.select %85, %87, %76 : vector<72x1xi1>, vector<72x1xi32>
    %c8_i32 = arith.constant 8 : i32
    %89 = vector.broadcast %c8_i32 : i32 to vector<72x1xi32>
    %90 = arith.cmpi slt, %88, %89 : vector<72x1xi32>
    %91 = arith.extui %90 : vector<72x1xi1> to vector<72x1xi32>
    %92 = arith.sitofp %91 : vector<72x1xi32> to vector<72x1xf32>
    %93 = vector.broadcast %92 : vector<72x1xf32> to vector<72x128xf32>
    %94 = arith.mulf %68, %93 : vector<72x128xf32>
    %cst_54 = arith.constant dense<0.000000e+00> : vector<128xf32>
    %95 = vector.multi_reduction <add>, %94, %cst_54 [0] : vector<72x128xf32> to vector<128xf32>
    %96 = vector.shape_cast %95 : vector<128xf32> to vector<1x128xf32>
    %c0_55 = arith.constant 0 : index
    %c0_56 = arith.constant 0 : index
    %c0_57 = arith.constant 0 : index
    %97 = vector.load %arg6[%c0_55, %c0_56, %c0_57] : memref<1x2x128xf32, #tpu.memory_space<vmem>>, vector<1x1x128xf32>
    %98 = vector.shape_cast %97 : vector<1x1x128xf32> to vector<1x128xf32>
    %99 = vector.shape_cast %96 : vector<1x128xf32> to vector<1x1x128xf32>
    tpu.vector_store %arg6[%c0_55, %c0_56, %c0_57], %99 {strides = array<i32>} : memref<1x2x128xf32, #tpu.memory_space<vmem>>, vector<1x1x128xf32>,
    %100 = arith.mulf %94, %68 : vector<72x128xf32>
    %cst_58 = arith.constant dense<0.000000e+00> : vector<128xf32>
    %101 = vector.multi_reduction <add>, %100, %cst_58 [0] : vector<72x128xf32> to vector<128xf32>
    %102 = vector.shape_cast %101 : vector<128xf32> to vector<1x128xf32>
    %c0_59 = arith.constant 0 : index
    %c1_60 = arith.constant 1 : index
    %c0_61 = arith.constant 0 : index
    %103 = vector.load %arg6[%c0_59, %c1_60, %c0_61] : memref<1x2x128xf32, #tpu.memory_space<vmem>>, vector<1x1x128xf32>
    %104 = vector.shape_cast %103 : vector<1x1x128xf32> to vector<1x128xf32>
    %105 = vector.shape_cast %102 : vector<1x128xf32> to vector<1x1x128xf32>
    tpu.vector_store %arg6[%c0_59, %c1_60, %c0_61], %105 {strides = array<i32>} : memref<1x2x128xf32, #tpu.memory_space<vmem>>, vector<1x1x128xf32>,
    return
  }
  func.func @transform_0(%arg0: i32) -> (i32, i32, i32, i32) {
    %c0_i32 = arith.constant 0 : i32
    %c0_i32_0 = arith.constant 0 : i32
    %c0_i32_1 = arith.constant 0 : i32
    %c0_i32_2 = arith.constant 0 : i32
    return %arg0, %c0_i32, %c0_i32_0, %c0_i32_1 : i32, i32, i32, i32
  }
  func.func @transform_1(%arg0: i32) -> (i32, i32) {
    %c0_i32 = arith.constant 0 : i32
    %c0_i32_0 = arith.constant 0 : i32
    %c0_i32_1 = arith.constant 0 : i32
    return %c0_i32, %c0_i32_0 : i32, i32
  }
  func.func @transform_2(%arg0: i32) -> (i32, i32) {
    %c0_i32 = arith.constant 0 : i32
    %c0_i32_0 = arith.constant 0 : i32
    %c0_i32_1 = arith.constant 0 : i32
    return %c0_i32, %c0_i32_0 : i32, i32
  }
  func.func @transform_3(%arg0: i32) -> (i32, i32) {
    %c0_i32 = arith.constant 0 : i32
    %c0_i32_0 = arith.constant 0 : i32
    %c0_i32_1 = arith.constant 0 : i32
    return %c0_i32, %c0_i32_0 : i32, i32
  }
  func.func @transform_4(%arg0: i32) -> (i32, i32, i32) {
    %c0_i32 = arith.constant 0 : i32
    %c0_i32_0 = arith.constant 0 : i32
    %c0_i32_1 = arith.constant 0 : i32
    return %arg0, %c0_i32, %c0_i32_0 : i32, i32, i32
  }
  func.func @transform_5(%arg0: i32) -> (i32, i32, i32) {
    %c0_i32 = arith.constant 0 : i32
    %c0_i32_0 = arith.constant 0 : i32
    %c0_i32_1 = arith.constant 0 : i32
    return %arg0, %c0_i32, %c0_i32_0 : i32, i32, i32
  }
}

module attributes {stable_mosaic.version = 11 : i64} {
  func.func @_conv_stats_kernel(%arg0: i32, %arg1: memref<1x1x112x8xf32, #tpu.memory_space<vmem>>, %arg2: memref<72x128xbf16, #tpu.memory_space<vmem>>, %arg3: memref<1x8xf32, #tpu.memory_space<vmem>>, %arg4: memref<1x8xf32, #tpu.memory_space<vmem>>, %arg5: memref<1x80x128xf32, #tpu.memory_space<vmem>>, %arg6: memref<1x2x128xf32, #tpu.memory_space<vmem>>, %arg7: memref<80x72xf32, #tpu.memory_space<vmem>>) attributes {dimension_semantics = [#tpu.dimension_semantics<parallel>], iteration_bounds = array<i64: 2>, scalar_prefetch = 0 : i64, scratch_operands = 1 : i64, tpu.core_type = #tpu.core_type<tc>, window_params = [{transform_indices = @transform_0, window_bounds = array<i64: 1, 1, 112, 8>}, {pipeline_mode = #tpu.pipeline_mode<synchronous>, transform_indices = @transform_1, window_bounds = array<i64: 72, 128>}, {pipeline_mode = #tpu.pipeline_mode<synchronous>, transform_indices = @transform_2, window_bounds = array<i64: 1, 8>}, {pipeline_mode = #tpu.pipeline_mode<synchronous>, transform_indices = @transform_3, window_bounds = array<i64: 1, 8>}, {transform_indices = @transform_4, window_bounds = array<i64: 1, 80, 128>}, {transform_indices = @transform_5, window_bounds = array<i64: 1, 2, 128>}]} {
    %c0 = arith.constant 0 : index
    %c0_0 = arith.constant 0 : index
    %0 = vector.load %arg3[%c0, %c0_0] : memref<1x8xf32, #tpu.memory_space<vmem>>, vector<1x8xf32>
    %c0_1 = arith.constant 0 : index
    %c0_2 = arith.constant 0 : index
    %1 = vector.load %arg4[%c0_1, %c0_2] : memref<1x8xf32, #tpu.memory_space<vmem>>, vector<1x8xf32>
    %c0_3 = arith.constant 0 : index
    %c0_4 = arith.constant 0 : index
    %c0_5 = arith.constant 0 : index
    %c0_6 = arith.constant 0 : index
    %2 = vector.load %arg1[%c0_3, %c0_4, %c0_5, %c0_6] : memref<1x1x112x8xf32, #tpu.memory_space<vmem>>, vector<1x1x80x8xf32>
    %3 = vector.shape_cast %2 : vector<1x1x80x8xf32> to vector<80x8xf32>
    %4 = vector.broadcast %0 : vector<1x8xf32> to vector<80x8xf32>
    %5 = arith.mulf %3, %4 : vector<80x8xf32>
    %6 = vector.broadcast %1 : vector<1x8xf32> to vector<80x8xf32>
    %7 = arith.addf %5, %6 : vector<80x8xf32>
    %c0_7 = arith.constant 0 : index
    %c0_8 = arith.constant 0 : index
    %8 = vector.load %arg7[%c0_7, %c0_8] : memref<80x72xf32, #tpu.memory_space<vmem>>, vector<80x8xf32>
    tpu.vector_store %arg7[%c0_7, %c0_8], %7 {strides = array<i32>} : memref<80x72xf32, #tpu.memory_space<vmem>>, vector<80x8xf32>,
    %c0_9 = arith.constant 0 : index
    %c0_10 = arith.constant 0 : index
    %c1 = arith.constant 1 : index
    %c0_11 = arith.constant 0 : index
    %9 = vector.load %arg1[%c0_9, %c0_10, %c1, %c0_11] : memref<1x1x112x8xf32, #tpu.memory_space<vmem>>, vector<1x1x80x8xf32>
    %10 = vector.shape_cast %9 : vector<1x1x80x8xf32> to vector<80x8xf32>
    %11 = vector.broadcast %0 : vector<1x8xf32> to vector<80x8xf32>
    %12 = arith.mulf %10, %11 : vector<80x8xf32>
    %13 = vector.broadcast %1 : vector<1x8xf32> to vector<80x8xf32>
    %14 = arith.addf %12, %13 : vector<80x8xf32>
    %c0_12 = arith.constant 0 : index
    %c8 = arith.constant 8 : index
    %15 = vector.load %arg7[%c0_12, %c8] : memref<80x72xf32, #tpu.memory_space<vmem>>, vector<80x8xf32>
    tpu.vector_store %arg7[%c0_12, %c8], %14 {strides = array<i32>} : memref<80x72xf32, #tpu.memory_space<vmem>>, vector<80x8xf32>,
    %c0_13 = arith.constant 0 : index
    %c0_14 = arith.constant 0 : index
    %c2 = arith.constant 2 : index
    %c0_15 = arith.constant 0 : index
    %16 = vector.load %arg1[%c0_13, %c0_14, %c2, %c0_15] : memref<1x1x112x8xf32, #tpu.memory_space<vmem>>, vector<1x1x80x8xf32>
    %17 = vector.shape_cast %16 : vector<1x1x80x8xf32> to vector<80x8xf32>
    %18 = vector.broadcast %0 : vector<1x8xf32> to vector<80x8xf32>
    %19 = arith.mulf %17, %18 : vector<80x8xf32>
    %20 = vector.broadcast %1 : vector<1x8xf32> to vector<80x8xf32>
    %21 = arith.addf %19, %20 : vector<80x8xf32>
    %c0_16 = arith.constant 0 : index
    %c16 = arith.constant 16 : index
    %22 = vector.load %arg7[%c0_16, %c16] : memref<80x72xf32, #tpu.memory_space<vmem>>, vector<80x8xf32>
    tpu.vector_store %arg7[%c0_16, %c16], %21 {strides = array<i32>} : memref<80x72xf32, #tpu.memory_space<vmem>>, vector<80x8xf32>,
    %c0_17 = arith.constant 0 : index
    %c0_18 = arith.constant 0 : index
    %c10 = arith.constant 10 : index
    %c0_19 = arith.constant 0 : index
    %23 = vector.load %arg1[%c0_17, %c0_18, %c10, %c0_19] : memref<1x1x112x8xf32, #tpu.memory_space<vmem>>, vector<1x1x80x8xf32>
    %24 = vector.shape_cast %23 : vector<1x1x80x8xf32> to vector<80x8xf32>
    %25 = vector.broadcast %0 : vector<1x8xf32> to vector<80x8xf32>
    %26 = arith.mulf %24, %25 : vector<80x8xf32>
    %27 = vector.broadcast %1 : vector<1x8xf32> to vector<80x8xf32>
    %28 = arith.addf %26, %27 : vector<80x8xf32>
    %c0_20 = arith.constant 0 : index
    %c24 = arith.constant 24 : index
    %29 = vector.load %arg7[%c0_20, %c24] : memref<80x72xf32, #tpu.memory_space<vmem>>, vector<80x8xf32>
    tpu.vector_store %arg7[%c0_20, %c24], %28 {strides = array<i32>} : memref<80x72xf32, #tpu.memory_space<vmem>>, vector<80x8xf32>,
    %c0_21 = arith.constant 0 : index
    %c0_22 = arith.constant 0 : index
    %c11 = arith.constant 11 : index
    %c0_23 = arith.constant 0 : index
    %30 = vector.load %arg1[%c0_21, %c0_22, %c11, %c0_23] : memref<1x1x112x8xf32, #tpu.memory_space<vmem>>, vector<1x1x80x8xf32>
    %31 = vector.shape_cast %30 : vector<1x1x80x8xf32> to vector<80x8xf32>
    %32 = vector.broadcast %0 : vector<1x8xf32> to vector<80x8xf32>
    %33 = arith.mulf %31, %32 : vector<80x8xf32>
    %34 = vector.broadcast %1 : vector<1x8xf32> to vector<80x8xf32>
    %35 = arith.addf %33, %34 : vector<80x8xf32>
    %c0_24 = arith.constant 0 : index
    %c32 = arith.constant 32 : index
    %36 = vector.load %arg7[%c0_24, %c32] : memref<80x72xf32, #tpu.memory_space<vmem>>, vector<80x8xf32>
    tpu.vector_store %arg7[%c0_24, %c32], %35 {strides = array<i32>} : memref<80x72xf32, #tpu.memory_space<vmem>>, vector<80x8xf32>,
    %c0_25 = arith.constant 0 : index
    %c0_26 = arith.constant 0 : index
    %c12 = arith.constant 12 : index
    %c0_27 = arith.constant 0 : index
    %37 = vector.load %arg1[%c0_25, %c0_26, %c12, %c0_27] : memref<1x1x112x8xf32, #tpu.memory_space<vmem>>, vector<1x1x80x8xf32>
    %38 = vector.shape_cast %37 : vector<1x1x80x8xf32> to vector<80x8xf32>
    %39 = vector.broadcast %0 : vector<1x8xf32> to vector<80x8xf32>
    %40 = arith.mulf %38, %39 : vector<80x8xf32>
    %41 = vector.broadcast %1 : vector<1x8xf32> to vector<80x8xf32>
    %42 = arith.addf %40, %41 : vector<80x8xf32>
    %c0_28 = arith.constant 0 : index
    %c40 = arith.constant 40 : index
    %43 = vector.load %arg7[%c0_28, %c40] : memref<80x72xf32, #tpu.memory_space<vmem>>, vector<80x8xf32>
    tpu.vector_store %arg7[%c0_28, %c40], %42 {strides = array<i32>} : memref<80x72xf32, #tpu.memory_space<vmem>>, vector<80x8xf32>,
    %c0_29 = arith.constant 0 : index
    %c0_30 = arith.constant 0 : index
    %c20 = arith.constant 20 : index
    %c0_31 = arith.constant 0 : index
    %44 = vector.load %arg1[%c0_29, %c0_30, %c20, %c0_31] : memref<1x1x112x8xf32, #tpu.memory_space<vmem>>, vector<1x1x80x8xf32>
    %45 = vector.shape_cast %44 : vector<1x1x80x8xf32> to vector<80x8xf32>
    %46 = vector.broadcast %0 : vector<1x8xf32> to vector<80x8xf32>
    %47 = arith.mulf %45, %46 : vector<80x8xf32>
    %48 = vector.broadcast %1 : vector<1x8xf32> to vector<80x8xf32>
    %49 = arith.addf %47, %48 : vector<80x8xf32>
    %c0_32 = arith.constant 0 : index
    %c48 = arith.constant 48 : index
    %50 = vector.load %arg7[%c0_32, %c48] : memref<80x72xf32, #tpu.memory_space<vmem>>, vector<80x8xf32>
    tpu.vector_store %arg7[%c0_32, %c48], %49 {strides = array<i32>} : memref<80x72xf32, #tpu.memory_space<vmem>>, vector<80x8xf32>,
    %c0_33 = arith.constant 0 : index
    %c0_34 = arith.constant 0 : index
    %c21 = arith.constant 21 : index
    %c0_35 = arith.constant 0 : index
    %51 = vector.load %arg1[%c0_33, %c0_34, %c21, %c0_35] : memref<1x1x112x8xf32, #tpu.memory_space<vmem>>, vector<1x1x80x8xf32>
    %52 = vector.shape_cast %51 : vector<1x1x80x8xf32> to vector<80x8xf32>
    %53 = vector.broadcast %0 : vector<1x8xf32> to vector<80x8xf32>
    %54 = arith.mulf %52, %53 : vector<80x8xf32>
    %55 = vector.broadcast %1 : vector<1x8xf32> to vector<80x8xf32>
    %56 = arith.addf %54, %55 : vector<80x8xf32>
    %c0_36 = arith.constant 0 : index
    %c56 = arith.constant 56 : index
    %57 = vector.load %arg7[%c0_36, %c56] : memref<80x72xf32, #tpu.memory_space<vmem>>, vector<80x8xf32>
    tpu.vector_store %arg7[%c0_36, %c56], %56 {strides = array<i32>} : memref<80x72xf32, #tpu.memory_space<vmem>>, vector<80x8xf32>,
    %c0_37 = arith.constant 0 : index
    %c0_38 = arith.constant 0 : index
    %c22 = arith.constant 22 : index
    %c0_39 = arith.constant 0 : index
    %58 = vector.load %arg1[%c0_37, %c0_38, %c22, %c0_39] : memref<1x1x112x8xf32, #tpu.memory_space<vmem>>, vector<1x1x80x8xf32>
    %59 = vector.shape_cast %58 : vector<1x1x80x8xf32> to vector<80x8xf32>
    %60 = vector.broadcast %0 : vector<1x8xf32> to vector<80x8xf32>
    %61 = arith.mulf %59, %60 : vector<80x8xf32>
    %62 = vector.broadcast %1 : vector<1x8xf32> to vector<80x8xf32>
    %63 = arith.addf %61, %62 : vector<80x8xf32>
    %c0_40 = arith.constant 0 : index
    %c64 = arith.constant 64 : index
    %64 = vector.load %arg7[%c0_40, %c64] : memref<80x72xf32, #tpu.memory_space<vmem>>, vector<80x8xf32>
    tpu.vector_store %arg7[%c0_40, %c64], %63 {strides = array<i32>} : memref<80x72xf32, #tpu.memory_space<vmem>>, vector<80x8xf32>,
    %c0_41 = arith.constant 0 : index
    %c0_42 = arith.constant 0 : index
    %65 = vector.load %arg7[%c0_41, %c0_42] : memref<80x72xf32, #tpu.memory_space<vmem>>, vector<80x72xf32>
    %66 = arith.truncf %65 : vector<80x72xf32> to vector<80x72xbf16>
    %c0_43 = arith.constant 0 : index
    %c0_44 = arith.constant 0 : index
    %67 = vector.load %arg2[%c0_43, %c0_44] : memref<72x128xbf16, #tpu.memory_space<vmem>>, vector<72x128xbf16>
    %cst = arith.constant dense<0.000000e+00> : vector<80x128xf32>
    %68 = tpu.matmul %66, %67, %cst {dimension_numbers = #tpu.dot_dimension_numbers<[1], [0], [0], [1], [0, 0, 1, 1], [], []>} : vector<80x72xbf16>, vector<72x128xbf16>, vector<80x128xf32> -> vector<80x128xf32>
    %c0_45 = arith.constant 0 : index
    %c0_46 = arith.constant 0 : index
    %c0_47 = arith.constant 0 : index
    %69 = vector.load %arg5[%c0_45, %c0_46, %c0_47] : memref<1x80x128xf32, #tpu.memory_space<vmem>>, vector<1x80x128xf32>
    %70 = vector.shape_cast %69 : vector<1x80x128xf32> to vector<80x128xf32>
    %71 = vector.shape_cast %68 : vector<80x128xf32> to vector<1x80x128xf32>
    tpu.vector_store %arg5[%c0_45, %c0_46, %c0_47], %71 {strides = array<i32>} : memref<1x80x128xf32, #tpu.memory_space<vmem>>, vector<1x80x128xf32>,
    %72 = tpu.iota {dimensions = array<i32: 0>} : vector<80x1xi32>
    %c10_i32 = arith.constant 10 : i32
    %c0_i32 = arith.constant 0 : i32
    %73 = arith.cmpi eq, %c10_i32, %c0_i32 : i32
    %c1_i32 = arith.constant 1 : i32
    %74 = arith.select %73, %c1_i32, %c10_i32 : i32
    %75 = vector.broadcast %74 : i32 to vector<80x1xi32>
    %76 = arith.remsi %72, %75 : vector<80x1xi32>
    %c0_i32_48 = arith.constant 0 : i32
    %77 = vector.broadcast %c0_i32_48 : i32 to vector<80x1xi32>
    %78 = arith.cmpi ne, %76, %77 : vector<80x1xi32>
    %c0_i32_49 = arith.constant 0 : i32
    %79 = vector.broadcast %c0_i32_49 : i32 to vector<80x1xi32>
    %80 = arith.cmpi slt, %76, %79 : vector<80x1xi32>
    %c0_i32_50 = arith.constant 0 : i32
    %81 = arith.cmpi slt, %74, %c0_i32_50 : i32
    %82 = vector.broadcast %81 : i1 to vector<80x1xi1>
    %83 = vector.broadcast %82 : vector<80x1xi1> to vector<80x1xi1>
    %84 = arith.xori %80, %83 : vector<80x1xi1>
    %85 = arith.andi %84, %78 : vector<80x1xi1>
    %86 = vector.broadcast %74 : i32 to vector<80x1xi32>
    %87 = arith.addi %76, %86 : vector<80x1xi32>
    %88 = arith.select %85, %87, %76 : vector<80x1xi1>, vector<80x1xi32>
    %c8_i32 = arith.constant 8 : i32
    %89 = vector.broadcast %c8_i32 : i32 to vector<80x1xi32>
    %90 = arith.cmpi slt, %88, %89 : vector<80x1xi32>
    %91 = arith.extui %90 : vector<80x1xi1> to vector<80x1xi32>
    %92 = arith.sitofp %91 : vector<80x1xi32> to vector<80x1xf32>
    %93 = vector.broadcast %92 : vector<80x1xf32> to vector<80x128xf32>
    %94 = arith.mulf %68, %93 : vector<80x128xf32>
    %cst_51 = arith.constant dense<0.000000e+00> : vector<128xf32>
    %95 = vector.multi_reduction <add>, %94, %cst_51 [0] : vector<80x128xf32> to vector<128xf32>
    %96 = vector.shape_cast %95 : vector<128xf32> to vector<1x128xf32>
    %c0_52 = arith.constant 0 : index
    %c0_53 = arith.constant 0 : index
    %c0_54 = arith.constant 0 : index
    %97 = vector.load %arg6[%c0_52, %c0_53, %c0_54] : memref<1x2x128xf32, #tpu.memory_space<vmem>>, vector<1x1x128xf32>
    %98 = vector.shape_cast %97 : vector<1x1x128xf32> to vector<1x128xf32>
    %99 = vector.shape_cast %96 : vector<1x128xf32> to vector<1x1x128xf32>
    tpu.vector_store %arg6[%c0_52, %c0_53, %c0_54], %99 {strides = array<i32>} : memref<1x2x128xf32, #tpu.memory_space<vmem>>, vector<1x1x128xf32>,
    %100 = arith.mulf %94, %68 : vector<80x128xf32>
    %cst_55 = arith.constant dense<0.000000e+00> : vector<128xf32>
    %101 = vector.multi_reduction <add>, %100, %cst_55 [0] : vector<80x128xf32> to vector<128xf32>
    %102 = vector.shape_cast %101 : vector<128xf32> to vector<1x128xf32>
    %c0_56 = arith.constant 0 : index
    %c1_57 = arith.constant 1 : index
    %c0_58 = arith.constant 0 : index
    %103 = vector.load %arg6[%c0_56, %c1_57, %c0_58] : memref<1x2x128xf32, #tpu.memory_space<vmem>>, vector<1x1x128xf32>
    %104 = vector.shape_cast %103 : vector<1x1x128xf32> to vector<1x128xf32>
    %105 = vector.shape_cast %102 : vector<1x128xf32> to vector<1x1x128xf32>
    tpu.vector_store %arg6[%c0_56, %c1_57, %c0_58], %105 {strides = array<i32>} : memref<1x2x128xf32, #tpu.memory_space<vmem>>, vector<1x1x128xf32>,
    return
  }
  func.func @transform_0(%arg0: i32) -> (i32, i32, i32, i32) {
    %c0_i32 = arith.constant 0 : i32
    %c0_i32_0 = arith.constant 0 : i32
    %c0_i32_1 = arith.constant 0 : i32
    %c0_i32_2 = arith.constant 0 : i32
    return %arg0, %c0_i32, %c0_i32_0, %c0_i32_1 : i32, i32, i32, i32
  }
  func.func @transform_1(%arg0: i32) -> (i32, i32) {
    %c0_i32 = arith.constant 0 : i32
    %c0_i32_0 = arith.constant 0 : i32
    %c0_i32_1 = arith.constant 0 : i32
    return %c0_i32, %c0_i32_0 : i32, i32
  }
  func.func @transform_2(%arg0: i32) -> (i32, i32) {
    %c0_i32 = arith.constant 0 : i32
    %c0_i32_0 = arith.constant 0 : i32
    %c0_i32_1 = arith.constant 0 : i32
    return %c0_i32, %c0_i32_0 : i32, i32
  }
  func.func @transform_3(%arg0: i32) -> (i32, i32) {
    %c0_i32 = arith.constant 0 : i32
    %c0_i32_0 = arith.constant 0 : i32
    %c0_i32_1 = arith.constant 0 : i32
    return %c0_i32, %c0_i32_0 : i32, i32
  }
  func.func @transform_4(%arg0: i32) -> (i32, i32, i32) {
    %c0_i32 = arith.constant 0 : i32
    %c0_i32_0 = arith.constant 0 : i32
    %c0_i32_1 = arith.constant 0 : i32
    return %arg0, %c0_i32, %c0_i32_0 : i32, i32, i32
  }
  func.func @transform_5(%arg0: i32) -> (i32, i32, i32) {
    %c0_i32 = arith.constant 0 : i32
    %c0_i32_0 = arith.constant 0 : i32
    %c0_i32_1 = arith.constant 0 : i32
    return %arg0, %c0_i32, %c0_i32_0 : i32, i32, i32
  }
}

module attributes {stable_mosaic.version = 11 : i64} {
  func.func @_bn_relu_kernel(%arg0: i32, %arg1: memref<1x80x128xf32, #tpu.memory_space<vmem>>, %arg2: memref<1x128xf32, #tpu.memory_space<vmem>>, %arg3: memref<1x128xf32, #tpu.memory_space<vmem>>, %arg4: memref<1x80x128xf32, #tpu.memory_space<vmem>>) attributes {dimension_semantics = [#tpu.dimension_semantics<parallel>], iteration_bounds = array<i64: 2>, scalar_prefetch = 0 : i64, scratch_operands = 0 : i64, tpu.core_type = #tpu.core_type<tc>, window_params = [{transform_indices = @transform_0, window_bounds = array<i64: 1, 80, 128>}, {pipeline_mode = #tpu.pipeline_mode<synchronous>, transform_indices = @transform_1, window_bounds = array<i64: 1, 128>}, {pipeline_mode = #tpu.pipeline_mode<synchronous>, transform_indices = @transform_2, window_bounds = array<i64: 1, 128>}, {transform_indices = @transform_3, window_bounds = array<i64: 1, 80, 128>}]} {
    %c0 = arith.constant 0 : index
    %c0_0 = arith.constant 0 : index
    %c0_1 = arith.constant 0 : index
    %0 = vector.load %arg1[%c0, %c0_0, %c0_1] : memref<1x80x128xf32, #tpu.memory_space<vmem>>, vector<1x80x128xf32>
    %1 = vector.shape_cast %0 : vector<1x80x128xf32> to vector<80x128xf32>
    %c0_2 = arith.constant 0 : index
    %c0_3 = arith.constant 0 : index
    %2 = vector.load %arg2[%c0_2, %c0_3] : memref<1x128xf32, #tpu.memory_space<vmem>>, vector<1x128xf32>
    %3 = vector.broadcast %2 : vector<1x128xf32> to vector<80x128xf32>
    %4 = arith.mulf %1, %3 : vector<80x128xf32>
    %c0_4 = arith.constant 0 : index
    %c0_5 = arith.constant 0 : index
    %5 = vector.load %arg3[%c0_4, %c0_5] : memref<1x128xf32, #tpu.memory_space<vmem>>, vector<1x128xf32>
    %6 = vector.broadcast %5 : vector<1x128xf32> to vector<80x128xf32>
    %7 = arith.addf %4, %6 : vector<80x128xf32>
    %cst = arith.constant 0.000000e+00 : f32
    %8 = vector.broadcast %cst : f32 to vector<80x128xf32>
    %9 = arith.maximumf %7, %8 : vector<80x128xf32>
    %c0_6 = arith.constant 0 : index
    %c0_7 = arith.constant 0 : index
    %c0_8 = arith.constant 0 : index
    %10 = vector.load %arg4[%c0_6, %c0_7, %c0_8] : memref<1x80x128xf32, #tpu.memory_space<vmem>>, vector<1x80x128xf32>
    %11 = vector.shape_cast %10 : vector<1x80x128xf32> to vector<80x128xf32>
    %12 = vector.shape_cast %9 : vector<80x128xf32> to vector<1x80x128xf32>
    tpu.vector_store %arg4[%c0_6, %c0_7, %c0_8], %12 {strides = array<i32>} : memref<1x80x128xf32, #tpu.memory_space<vmem>>, vector<1x80x128xf32>,
    return
  }
  func.func @transform_0(%arg0: i32) -> (i32, i32, i32) {
    %c0_i32 = arith.constant 0 : i32
    %c0_i32_0 = arith.constant 0 : i32
    %c0_i32_1 = arith.constant 0 : i32
    return %arg0, %c0_i32, %c0_i32_0 : i32, i32, i32
  }
  func.func @transform_1(%arg0: i32) -> (i32, i32) {
    %c0_i32 = arith.constant 0 : i32
    %c0_i32_0 = arith.constant 0 : i32
    %c0_i32_1 = arith.constant 0 : i32
    return %c0_i32, %c0_i32_0 : i32, i32
  }
  func.func @transform_2(%arg0: i32) -> (i32, i32) {
    %c0_i32 = arith.constant 0 : i32
    %c0_i32_0 = arith.constant 0 : i32
    %c0_i32_1 = arith.constant 0 : i32
    return %c0_i32, %c0_i32_0 : i32, i32
  }
  func.func @transform_3(%arg0: i32) -> (i32, i32, i32) {
    %c0_i32 = arith.constant 0 : i32
    %c0_i32_0 = arith.constant 0 : i32
    %c0_i32_1 = arith.constant 0 : i32
    return %arg0, %c0_i32, %c0_i32_0 : i32, i32, i32
  }
}

</mosaic_0001>

<bundles_post_ra>
// kernel: myblock_forward.7
= control target key start
LH: loop header
LB: loop body
LE: loop exit
PB: predicated region body
PF: predicated region fallthrough
CT: control target
= control target key end

     0   :  { %s338_s12 = smov 0   ;;  %s373_s0 = inlined_call_operand.vmem [shape: f32[2,80,128], index: 0, kind: input, shape index: {}]   ;;  %s374_s1 = inlined_call_operand.vmem [shape: f32[1,128], index: 1, kind: input, shape index: {}]   ;;  %s375_s2 = inlined_call_operand.vmem [shape: f32[1,128], index: 2, kind: input, shape index: {}]   ;;  %s376_s3 = inlined_call_operand.vmem [shape: f32[2,80,128], index: 3, kind: output, shape index: {}]  }
   0x1 LB: > { %s290_s13 = sadd.s32 4294967295, %s316_s12   ;;  %p294_p0 = scmp.ge.s32.totalorder %s316_s12, 1  ;;  %s316_s12 = sphi %s338_s12, %s13_s12  }
   0x2   : > { %p137_p1 = scmp.lt.s32.totalorder %s316_s12, 3 }
   0x4   : > { %p138_p2 = pnand %p294_p0, %p137_p1 }
   0x5   : > { %p161_p3 = scmp.lt.s32.totalorder (!%p138_p2), %s290_s13, 1  ;;  %v297_v0 = vld [vmem:[%s374_s1] ss:$0 sm:$0xff] (!%p138_p2) }
   0x6   : > { %141 = sbr.rel (%p138_p2) target bundleno = 31 (0x1f), region = 32  ;;  %v298_v1 = vld [vmem:[%s375_s2] ss:$0 sm:$0xff] (!%p138_p2) }
   0xd   : > { %s378_s13 = smov (!%p161_p3, %s290_s13), 1 }
   0xe   : > { %s301_s14 = smul.u32 80, %s378_s13 }
  0x10   : > { %s165_s19 = scalar_lea.vmem %s373_s0, %s301_s14  ;;  %s358_s24 = scalar_lea.vmem %s376_s3, %s301_s14 }
  0x11   : > { %v171_v2 = vld [vmem:[%s165_s19] sm:$0xff]  ;;  %v172_v3 = vld [vmem:[%s165_s19 + $0x8] sm:$0xff]  ;;  %v173_v4 = vld [vmem:[%s165_s19 + $0x10] sm:$0xff] }
  0x12   : > { %v188_v5 = vmul.f32 %v297_v0, %v171_v2  ;;  %v189_v6 = vmul.f32 %v297_v0, %v172_v3  ;;  %v190_v7 = vmul.f32 %v297_v0, %v173_v4  ;;  %v174_v8 = vld [vmem:[%s165_s19 + $0x18] sm:$0xff]  ;;  %v175_v9 = vld [vmem:[%s165_s19 + $0x20] sm:$0xff]  ;;  %v176_v10 = vld [vmem:[%s165_s19 + $0x28] sm:$0xff] }
  0x13   : > { %v191_v11 = vmul.f32 %v297_v0, %v174_v8  ;;  %v192_v12 = vmul.f32 %v297_v0, %v175_v9  ;;  %v193_v13 = vmul.f32 %v297_v0, %v176_v10  ;;  %v177_v14 = vld [vmem:[%s165_s19 + $0x30] sm:$0xff]  ;;  %v178_v15 = vld [vmem:[%s165_s19 + $0x38] sm:$0xff]  ;;  %v179_v24 = vld [vmem:[%s165_s19 + $0x40] sm:$0xff] }
  0x14   : > { %v205_v16 = vadd.f32 %v298_v1, %v188_v5  ;;  %v206_v17 = vadd.f32 %v298_v1, %v189_v6  ;;  %v207_v18 = vadd.f32 %v298_v1, %v190_v7  ;;  %v194_v19 = vmul.f32 %v297_v0, %v177_v14  ;;  %v180_v25 = vld [vmem:[%s165_s19 + $0x48] sm:$0xff] }
  0x15   : > { %v208_v20 = vadd.f32 %v298_v1, %v191_v11  ;;  %v209_v21 = vadd.f32 %v298_v1, %v192_v12  ;;  %v210_v22 = vadd.f32 %v298_v1, %v193_v13  ;;  %v195_v23 = vmul.f32 %v297_v0, %v178_v15 }
  0x16   : > { %v215_v26 = vmax.f32 %v205_v16, 0.0  ;;  %v216_v27 = vmax.f32 %v206_v17, 0.0  ;;  %v217_v28 = vmax.f32 %v207_v18, 0.0  ;;  %v211_v29 = vadd.f32 %v298_v1, %v194_v19 }
  0x17   : > { %v218_v30 = vmax.f32 %v208_v20, 0.0  ;;  %v219_v31 = vmax.f32 %v209_v21, 0.0  ;;  %v220_v32 = vmax.f32 %v210_v22, 0.0  ;;  %v212_v33 = vadd.f32 %v298_v1, %v195_v23 }
  0x18   : > { %225 = vst [vmem:[%s358_s24] sm:$0xff] %v215_v26  ;;  %226 = vst [vmem:[%s358_s24 + $0x8] sm:$0xff] %v216_v27  ;;  %v221_v34 = vmax.f32 %v211_v29, 0.0  ;;  %v196_v35 = vmul.f32 %v297_v0, %v179_v24  ;;  %v197_v36 = vmul.f32 %v297_v0, %v180_v25 }
  0x19   : > { %227 = vst [vmem:[%s358_s24 + $0x10] sm:$0xff] %v217_v28  ;;  %228 = vst [vmem:[%s358_s24 + $0x18] sm:$0xff] %v218_v30  ;;  %v222_v37 = vmax.f32 %v212_v33, 0.0 }
  0x1a   : > { %229 = vst [vmem:[%s358_s24 + $0x20] sm:$0xff] %v219_v31  ;;  %230 = vst [vmem:[%s358_s24 + $0x28] sm:$0xff] %v220_v32  ;;  %v213_v38 = vadd.f32 %v298_v1, %v196_v35  ;;  %v214_v39 = vadd.f32 %v298_v1, %v197_v36 }
  0x1b   : > { %231 = vst [vmem:[%s358_s24 + $0x30] sm:$0xff] %v221_v34  ;;  %232 = vst [vmem:[%s358_s24 + $0x38] sm:$0xff] %v222_v37 }
  0x1c   : > { %v223_v40 = vmax.f32 %v213_v38, 0.0  ;;  %v224_v41 = vmax.f32 %v214_v39, 0.0 }
  0x1e   : > { %233 = vst [vmem:[%s358_s24 + $0x40] sm:$0xff] %v223_v40  ;;  %234 = vst [vmem:[%s358_s24 + $0x48] sm:$0xff] %v224_v41 }
  0x1f PF: > { %s13_s12 = sadd.s32 1, %s316_s12  }
  0x20   : > { %p10_p4 = scmp.ge.s32.totalorder %s13_s12, 4  }
  0x22   :  { %12 = sbr.rel (!%p10_p4) target bundleno = 1 (0x1), region = 62 }

// kernel: myblock_forward.4
= control target key start
LH: loop header
LB: loop body
LE: loop exit
PB: predicated region body
PF: predicated region fallthrough
CT: control target
= control target key end

     0   :  { %s1528_s18 = smov 0   ;;  %s2049_s0 = inlined_call_operand.vmem [shape: f32[2,4,96,4], index: 0, kind: input, shape index: {}]   ;;  %s2050_s1 = inlined_call_operand.vmem [shape: bf16[36,128], index: 1, kind: input, shape index: {}]   ;;  %s2051_s2 = inlined_call_operand.vmem [shape: f32[1,4], index: 2, kind: input, shape index: {}]   ;;  %s2052_s3 = inlined_call_operand.vmem [shape: f32[1,4], index: 3, kind: input, shape index: {}]   ;;  %s2053_s4 = inlined_call_operand.vmem [shape: f32[2,72,128], index: 4, kind: output, shape index: {0}]   ;;  %s2054_s5 = inlined_call_operand.vmem [shape: f32[2,2,128], index: 5, kind: output, shape index: {1}]  }
   0x1 LB: > { %s1325_s19 = sadd.s32 4294967295, %s1486_s18   ;;  %p1329_p0 = scmp.ge.s32.totalorder %s1486_s18, 1  ;;  %s1486_s18 = sphi %s1528_s18, %s16_s18  }
   0x2   : > { %p190_p1 = scmp.lt.s32.totalorder %s1486_s18, 3 }
   0x4   : > { %p191_p2 = pnand %p1329_p0, %p190_p1 }
   0x5   : > { %p222_p3 = scmp.lt.s32.totalorder (!%p191_p2), %s1325_s19, 1  ;;  %v1542_v0 = vld [vmem:[%s2051_s2] ss:$0 sm:$0xff] (!%p191_p2)  ;;  %s1488_s28 = smov (!%p191_p2), 8   ;;  %v1492_v36 = vmov (!%p191_p2), 0.0   ;;  %v1478_v51 = vld [vmem:[%s2050_s1 + $0x8] sm:$0xff] (!%p191_p2)  }
   0x6   : > { %194 = sbr.rel (%p191_p2) target bundleno = 520 (0x208), region = 36  ;;  %v1552_v1 = vld [vmem:[%s2052_s3] ss:$0 sm:$0xff] (!%p191_p2)  ;;  %s1489_s29 = smov (!%p191_p2), 4   ;;  %1407 = vmatprep.subr.bf16.mxu0 (!%p191_p2), %v1492_v36  ;;  %1433 = vmatprep.subr.bf16.mxu1 (!%p191_p2), %v1492_v36  ;;  %vm925_vm0 = vcmask (!%p191_p2), 1041408   ;;  %vm278_vm1 = vcmask (!%p191_p2), 31744  }
   0x7   : > { %s1490_s30 = smov (!%p191_p2), 12   ;;  %s1491_s6 = smov (!%p191_p2), 16   ;;  %v1477_v42 = vld [vmem:[%s2050_s1] sm:$0xff] (!%p191_p2)   ;;  %v1479_v53 = vld [vmem:[%s2050_s1 + $0x10] ss:$0 sps:$4 sm:$0x33] (!%p191_p2)  }
   0x8   : > { %s1493_s7 = smov (!%p191_p2), 20   ;;  %s1494_s10 = smov (!%p191_p2), 24   ;;  %1408 = vmatpush3.bf16.msra.mxu0 (!%p191_p2), %v1477_v42  ;;  %1436 = vmatpush3.bf16.msra.mxu1 (!%p191_p2), %v1477_v42  ;;  %v927_v62 = vsel (!%p191_p2), %vm925_vm0, %v1479_v53, 0  ;;  %vm1497_vm2 = vmmov (!%p191_p2), 0   ;;  %vm352_vm3 = vcmask (!%p191_p2), 64544   ;;  %vm425_vm4 = vcmask (!%p191_p2), 97344  }
   0x9   : > { %1409 = vmatprep.subr.bf16.mxu0 (!%p191_p2), %v1492_v36  ;;  %s1495_s15 = smov (!%p191_p2), 28   ;;  %1434 = vmatprep.subr.bf16.mxu1 (!%p191_p2), %v1492_v36  ;;  %s1496_s16 = smov (!%p191_p2), 32   ;;  %vm499_vm5 = vcmask (!%p191_p2), 130144   ;;  %vm573_vm6 = vcmask (!%p191_p2), 162944   ;;  %vm646_vm7 = vcmask (!%p191_p2), 195744   ;;  %vm719_vm8 = vcmask (!%p191_p2), 228544  }
   0xa   : > { %1413 = vmatprep.mubr.msk.bf16.mxu0 (!%p191_p2), %vm1497_vm2, %v1492_v36  ;;  %1425 = vmatprep.mubr.msk.bf16.mxu1 (!%p191_p2), %vm1497_vm2, %v1492_v36  ;;  %vm792_vm9 = vcmask (!%p191_p2), 261344   ;;  %vm865_vm10 = vcmask (!%p191_p2), 294144   ;;  %vm909_vm11 = vcmask (!%p191_p2), 293888  }
   0xc   : > { %1410 = vmatpush3.bf16.msra.mxu0 (!%p191_p2), %v1478_v51  ;;  %1437 = vmatpush3.bf16.msra.mxu1 (!%p191_p2), %v1478_v51 }
   0xd   : > { %s2056_s19 = smov (!%p222_p3, %s1325_s19), 1  ;;  %1411 = vmatprep.subr.bf16.mxu0 %v1492_v36  ;;  %1435 = vmatprep.subr.bf16.mxu1 %v1492_v36 }
   0xe   : > { %s1439_s20 = smul.u32 384, %s2056_s19  ;;  %s1332_s23 = sshll.u32 %s2056_s19, 1 }
   0xf   : > { %s1440_s17 = smul.u32 72, %s2056_s19  ;;  %s235_s26 = scalar_lea.vmem %s2054_s5, %s1332_s23 }
  0x10   : > { %s1547_s25 = scalar_lea.vmem %s2049_s0, %s1439_s20  ;;  %1412 = vmatpush3.bf16.msra.mxu0 %v927_v62  ;;  %1438 = vmatpush3.bf16.msra.mxu1 %v927_v62 }
  0x11   : > { %v362_v2 = vld [vmem:[%s1547_s25 + $0x1] sm:$0xff]  ;;  %v363_v4 = vld [vmem:[%s1547_s25 + $0x9] sm:$0xff]  ;;  %v657_v30 = vld [vmem:[%s1547_s25 + $0x11] sm:$0xff]  ;;  %s1983_s22 = scalar_lea.vmem %s2053_s4, %s1440_s17 }
  0x12   : > { %v1335_v3 = vld [vmem:[%s1547_s25 + $0x60] sm:$0xff]  ;;  %v371_v5 = vmul.f32 %v1542_v0, %v362_v2  ;;  %v372_v7 = vmul.f32 %v1542_v0, %v363_v4  ;;  %v1336_v8 = vld [vmem:[%s1547_s25 + $0x68] sm:$0xff]  ;;  %v666_v33 = vmul.f32 %v1542_v0, %v657_v30  ;;  %v1372_v34 = vld [vmem:[%s1547_s25 + $0x71] sm:$0xff] }
  0x13   : > { %v298_v6 = vmul.f32 %v1335_v3, %v1542_v0  ;;  %v1345_v9 = vld [vmem:[%s1547_s25 + $0xc8] sm:$0xff]  ;;  %v299_v10 = vmul.f32 %v1336_v8, %v1542_v0  ;;  %v1344_v11 = vld [vmem:[%s1547_s25 + $0xc0] sm:$0xff]  ;;  %v739_v38 = vmul.f32 %v1372_v34, %v1542_v0  ;;  %v803_v40 = vld [vmem:[%s1547_s25 + $0x12] sm:$0xff] }
  0x14   : > { %v380_v12 = vadd.f32 %v1552_v1, %v371_v5  ;;  %v446_v14 = vmul.f32 %v1345_v9, %v1542_v0  ;;  %v381_v15 = vadd.f32 %v1552_v1, %v372_v7  ;;  %v445_v17 = vmul.f32 %v1344_v11, %v1542_v0  ;;  %v1354_v18 = vld [vmem:[%s1547_s25 + $0x128] sm:$0xff]  ;;  %v1353_v19 = vld [vmem:[%s1547_s25 + $0x120] sm:$0xff]  ;;  %v1338_v48 = vld [vmem:[%s1547_s25 + $0x78] sm:$0xff] }
  0x15   : > { %v307_v13 = vadd.f32 %v1552_v1, %v298_v6  ;;  %v308_v16 = vadd.f32 %v1552_v1, %v299_v10  ;;  %v520_v20 = vmul.f32 %v1354_v18, %v1542_v0  ;;  %v519_v23 = vmul.f32 %v1353_v19, %v1542_v0  ;;  %v1363_v24 = vld [vmem:[%s1547_s25 + $0xc9] sm:$0xff]  ;;  %v1362_v25 = vld [vmem:[%s1547_s25 + $0xc1] sm:$0xff]  ;;  %v365_v59 = vld [vmem:[%s1547_s25 + $0x19] sm:$0xff] }
  0x16   : > { %398 = vrot.lane.b32.xlu1 %v380_v12, %s1488_s28  ;;  %v455_v21 = vadd.f32 %v1552_v1, %v446_v14  ;;  %v454_v22 = vadd.f32 %v1552_v1, %v445_v17  ;;  %v593_v28 = vmul.f32 %v1363_v24, %v1542_v0  ;;  %v592_v29 = vmul.f32 %v1362_v25, %v1542_v0  ;;  %v1371_v35 = vld [vmem:[%s1547_s25 + $0x69] sm:$0xff]  ;;  %v239_v44 = vld [vmem:[%s1547_s25] sm:$0xff]  ;;  %v242_v63 = vld [vmem:[%s1547_s25 + $0x18] sm:$0xff] }
  0x17   : > { %325 = vrot.lane.b32.xlu0 %v307_v13, %s1489_s29  ;;  %v529_v26 = vadd.f32 %v1552_v1, %v520_v20  ;;  %v528_v27 = vadd.f32 %v1552_v1, %v519_v23  ;;  %v1601_v37 = vadd.f32 %v1552_v1, %v666_v33  ;;  %v738_v39 = vmul.f32 %v1371_v35, %v1542_v0  ;;  %v802_v41 = vld [vmem:[%s1547_s25 + $0xa] sm:$0xff]  ;;  %v1347_v6 = vld [vmem:[%s1547_s25 + $0xd8] sm:$0xff]  ;;  %v243_v33 = vld [vmem:[%s1547_s25 + $0x20] sm:$0xff] }
  0x18   : > { %v602_v31 = vadd.f32 %v1552_v1, %v593_v28  ;;  %v601_v32 = vadd.f32 %v1552_v1, %v592_v29  ;;  %v812_v43 = vmul.f32 %v1542_v0, %v803_v40  ;;  %v748_v45 = vadd.f32 %v1552_v1, %v739_v38  ;;  %v240_v49 = vld [vmem:[%s1547_s25 + $0x8] sm:$0xff]  ;;  %v1337_v50 = vld [vmem:[%s1547_s25 + $0x70] sm:$0xff]  ;;  %v1356_v13 = vld [vmem:[%s1547_s25 + $0x138] sm:$0xff] }
  0x19   : > { %v747_v46 = vadd.f32 %v1552_v1, %v738_v39  ;;  %v811_v47 = vmul.f32 %v1542_v0, %v802_v41  ;;  %v254_v52 = vmul.f32 %v1542_v0, %v239_v44  ;;  %v301_v54 = vmul.f32 %v1338_v48, %v1542_v0  ;;  %v241_v5 = vld [vmem:[%s1547_s25 + $0x10] sm:$0xff]  ;;  %v244_v34 = vld [vmem:[%s1547_s25 + $0x28] sm:$0xff]  ;;  %v804_v42 = vld [vmem:[%s1547_s25 + $0x1a] sm:$0xff] }
  0x1a   : > { %400 = vrot.lane.b32.xlu1 %v381_v15, %s1488_s28  ;;  %v255_v55 = vmul.f32 %v1542_v0, %v240_v49  ;;  %v821_v56 = vadd.f32 %v1552_v1, %v812_v43  ;;  %v300_v58 = vmul.f32 %v1337_v50, %v1542_v0  ;;  %v374_v4 = vmul.f32 %v1542_v0, %v365_v59  ;;  %v1346_v7 = vld [vmem:[%s1547_s25 + $0xd0] sm:$0xff]  ;;  %v805_v41 = vld [vmem:[%s1547_s25 + $0x22] sm:$0xff] }
  0x1b   : > { %327 = vrot.lane.b32.xlu0 %v308_v16, %s1489_s29  ;;  %v820_v57 = vadd.f32 %v1552_v1, %v811_v47  ;;  %v269_v60 = vadd.f32 %v1552_v1, %v254_v52  ;;  %v310_v2 = vadd.f32 %v1552_v1, %v301_v54  ;;  %v257_v8 = vmul.f32 %v1542_v0, %v242_v63  ;;  %v1355_v14 = vld [vmem:[%s1547_s25 + $0x130] sm:$0xff]  ;;  %v1340_v53 = vld [vmem:[%s1547_s25 + $0x88] sm:$0xff] }
  0x1c   : > { %v270_v61 = vadd.f32 %v1552_v1, %v255_v55  ;;  %v309_v3 = vadd.f32 %v1552_v1, %v300_v58  ;;  %v256_v9 = vmul.f32 %v1542_v0, %v241_v5  ;;  %v383_v10 = vadd.f32 %v1552_v1, %v374_v4  ;;  %v1339_v55 = vld [vmem:[%s1547_s25 + $0x80] sm:$0xff]  ;;  %v1341_v62 = vld [vmem:[%s1547_s25 + $0x90] sm:$0xff] }
  0x1d   : > { %279 = vst.msk [vmem:[#allocation2] sm:$0xff] %vm278_vm1, %v269_v60  ;;  %v448_v11 = vmul.f32 %v1347_v6, %v1542_v0  ;;  %v447_v12 = vmul.f32 %v1346_v7, %v1542_v0  ;;  %v522_v17 = vmul.f32 %v1356_v13, %v1542_v0  ;;  %v521_v20 = vmul.f32 %v1355_v14, %v1542_v0  ;;  %v367_v5 = vld [vmem:[%s1547_s25 + $0x29] sm:$0xff] }
  0x1e   : > { %474 = vrot.lane.b32.xlu1 %v455_v21, %s1490_s30  ;;  %280 = vst.msk [vmem:[#allocation2 + $0x8] sm:$0xff] %vm278_vm1, %v270_v61  ;;  %v271_v16 = vadd.f32 %v1552_v1, %v256_v9  ;;  %v1365_v21 = vld [vmem:[%s1547_s25 + $0xd9] sm:$0xff]  ;;  %v258_v35 = vmul.f32 %v1542_v0, %v243_v33  ;;  %v259_v38 = vmul.f32 %v1542_v0, %v244_v34  ;;  %v1349_v14 = vld [vmem:[%s1547_s25 + $0xe8] sm:$0xff]  ;;  %v1359_v33 = vld [vmem:[%s1547_s25 + $0x150] sm:$0xff] }
  0x1f   : > { %472 = vrot.lane.b32.xlu0 %v454_v22, %s1490_s30  ;;  %v457_v18 = vadd.f32 %v1552_v1, %v448_v11  ;;  %v456_v19 = vadd.f32 %v1552_v1, %v447_v12  ;;  %v1364_v22 = vld [vmem:[%s1547_s25 + $0xd1] sm:$0xff]  ;;  %v595_v23 = vmul.f32 %v1365_v21, %v1542_v0  ;;  %v531_v24 = vadd.f32 %v1552_v1, %v522_v17  ;;  %v369_v9 = vld [vmem:[%s1547_s25 + $0x39] sm:$0xff] }
  0x20   : > { %281 = vst.msk [vmem:[#allocation2 + $0x10] sm:$0xff] %vm278_vm1, %v271_v16  ;;  %v530_v25 = vadd.f32 %v1552_v1, %v521_v20  ;;  %v273_v43 = vadd.f32 %v1552_v1, %v258_v35  ;;  %v274_v44 = vadd.f32 %v1552_v1, %v259_v38  ;;  %v814_v48 = vmul.f32 %v1542_v0, %v805_v41  ;;  %v1342_v61 = vld [vmem:[%s1547_s25 + $0x98] sm:$0xff]  ;;  %v1350_v21 = vld [vmem:[%s1547_s25 + $0xf0] sm:$0xff] }
  0x21   : > { %v604_v28 = vadd.f32 %v1552_v1, %v595_v23  ;;  %v813_v49 = vmul.f32 %v1542_v0, %v804_v42  ;;  %v302_v60 = vmul.f32 %v1339_v55, %v1542_v0  ;;  %v305_v63 = vmul.f32 %v1342_v61, %v1542_v0  ;;  %v1351_v20 = vld [vmem:[%s1547_s25 + $0xf8] sm:$0xff] }
  0x22   : > { %548 = vrot.lane.b32.xlu1 %v529_v26, %s1491_s6  ;;  %v594_v26 = vmul.f32 %v1364_v22, %v1542_v0  ;;  %283 = vst.msk [vmem:[#allocation2 + $0x20] sm:$0xff] %vm278_vm1, %v273_v43  ;;  %284 = vst.msk [vmem:[#allocation2 + $0x28] sm:$0xff] %vm278_vm1, %v274_v44  ;;  %v823_v58 = vadd.f32 %v1552_v1, %v814_v48  ;;  %v304_v4 = vmul.f32 %v1341_v62, %v1542_v0  ;;  %v1376_v55 = vld [vmem:[%s1547_s25 + $0x91] sm:$0xff]  ;;  %v1377_v61 = vld [vmem:[%s1547_s25 + $0x99] sm:$0xff] }
  0x23   : > { %546 = vrot.lane.b32.xlu0 %v528_v27, %s1491_s6  ;;  %v659_v27 = vld [vmem:[%s1547_s25 + $0x21] sm:$0xff]  ;;  %v822_v59 = vadd.f32 %v1552_v1, %v813_v49  ;;  %v314_v6 = vadd.f32 %v1552_v1, %v305_v63  ;;  %v378_v12 = vmul.f32 %v1542_v0, %v369_v9  ;;  %v450_v16 = vmul.f32 %v1349_v14, %v1542_v0 }
  0x24   : > { %v603_v29 = vadd.f32 %v1552_v1, %v594_v26  ;;  %v668_v30 = vmul.f32 %v1542_v0, %v659_v27  ;;  %v313_v7 = vadd.f32 %v1552_v1, %v304_v4  ;;  %v452_v22 = vmul.f32 %v1351_v20, %v1542_v0  ;;  %v1358_v26 = vld [vmem:[%s1547_s25 + $0x148] sm:$0xff]  ;;  %v1357_v27 = vld [vmem:[%s1547_s25 + $0x140] sm:$0xff]  ;;  %v807_v4 = vld [vmem:[%s1547_s25 + $0x32] sm:$0xff] }
  0x25   : > { %v387_v17 = vadd.f32 %v1552_v1, %v378_v12  ;;  %v459_v23 = vadd.f32 %v1552_v1, %v450_v16  ;;  %v525_v38 = vmul.f32 %v1359_v33, %v1542_v0  ;;  %v816_v9 = vmul.f32 %v1542_v0, %v807_v4  ;;  %v808_v14 = vld [vmem:[%s1547_s25 + $0x3a] sm:$0xff] }
  0x26   : > { %621 = vrot.lane.b32.xlu1 %v602_v31, %s1493_s7  ;;  %v1374_v31 = vld [vmem:[%s1547_s25 + $0x81] sm:$0xff]  ;;  %v677_v39 = vadd.f32 %v1552_v1, %v668_v30  ;;  %v524_v30 = vmul.f32 %v1358_v26, %v1542_v0  ;;  %v817_v20 = vmul.f32 %v1542_v0, %v808_v14 }
  0x27   : > { %619 = vrot.lane.b32.xlu0 %v601_v32, %s1493_s7  ;;  %v1373_v32 = vld [vmem:[%s1547_s25 + $0x79] sm:$0xff]  ;;  %v534_v43 = vadd.f32 %v1552_v1, %v525_v38 }
  0x28   : > { %v740_v40 = vmul.f32 %v1373_v32, %v1542_v0  ;;  %v1360_v32 = vld [vmem:[%s1547_s25 + $0x158] sm:$0xff]  ;;  %v533_v35 = vadd.f32 %v1552_v1, %v524_v30 }
  0x29   : > { %v526_v34 = vmul.f32 %v1360_v32, %v1542_v0 }
  0x2a   : > { %694 = vrot.lane.b32.xlu1 %v1601_v37, %s1494_s10  ;;  %v749_v52 = vadd.f32 %v1552_v1, %v740_v40  ;;  %v1366_v40 = vld [vmem:[%s1547_s25 + $0xe1] sm:$0xff] }
  0x2b   : > { %692 = vrot.lane.b32.xlu0 %v381_v15, %s1494_s10  ;;  %v272_v15 = vadd.f32 %v1552_v1, %v257_v8  ;;  %v376_v8 = vmul.f32 %v1542_v0, %v367_v5  ;;  %v535_v42 = vadd.f32 %v1552_v1, %v526_v34  ;;  %v596_v44 = vmul.f32 %v1366_v40, %v1542_v0  ;;  %v806_v5 = vld [vmem:[%s1547_s25 + $0x2a] sm:$0xff]  ;;  %v1370_v34 = vld [vmem:[%s1547_s25 + $0x101] sm:$0xff] }
  0x2d   : > { %282 = vst.msk [vmem:[#allocation2 + $0x18] sm:$0xff] %vm278_vm1, %v272_v15  ;;  %v385_v11 = vadd.f32 %v1552_v1, %v376_v8  ;;  %v1348_v15 = vld [vmem:[%s1547_s25 + $0xe0] sm:$0xff]  ;;  %v605_v49 = vadd.f32 %v1552_v1, %v596_v44  ;;  %v810_v44 = vld [vmem:[%s1547_s25 + $0x4a] sm:$0xff] }
  0x2e   : > { %767 = vrot.lane.b32.xlu1 %v748_v45, %s1495_s15  ;;  %v245_v45 = vld [vmem:[%s1547_s25 + $0x30] sm:$0xff] }
  0x2f   : > { %765 = vrot.lane.b32.xlu0 %v747_v46, %s1495_s15  ;;  %v246_v46 = vld [vmem:[%s1547_s25 + $0x38] sm:$0xff]  ;;  %v260_v47 = vmul.f32 %v1542_v0, %v245_v45 }
  0x30   : > { %v261_v50 = vmul.f32 %v1542_v0, %v246_v46  ;;  %v1369_v45 = vld [vmem:[%s1547_s25 + $0xf9] sm:$0xff]  ;;  %v1368_v46 = vld [vmem:[%s1547_s25 + $0xf1] sm:$0xff] }
  0x31   : > { %v275_v54 = vadd.f32 %v1552_v1, %v260_v47  ;;  %v599_v47 = vmul.f32 %v1369_v45, %v1542_v0 }
  0x32   : > { %840 = vrot.lane.b32.xlu1 %v821_v56, %s1496_s16  ;;  %v276_v56 = vadd.f32 %v1552_v1, %v261_v50  ;;  %v598_v50 = vmul.f32 %v1368_v46, %v1542_v0 }
  0x33   : > { %838 = vrot.lane.b32.xlu0 %v820_v57, %s1496_s16  ;;  %285 = vst.msk [vmem:[#allocation2 + $0x30] sm:$0xff] %vm278_vm1, %v275_v54  ;;  %v303_v57 = vmul.f32 %v1340_v53, %v1542_v0  ;;  %v663_v53 = vld [vmem:[%s1547_s25 + $0x41] sm:$0xff] }
  0x34   : > { %286 = vst.msk [vmem:[#allocation2 + $0x38] sm:$0xff] %vm278_vm1, %v276_v56  ;;  %v672_v54 = vmul.f32 %v1542_v0, %v663_v53  ;;  %v1375_v56 = vld [vmem:[%s1547_s25 + $0x89] sm:$0xff] }
  0x36   : > { %331 = vrot.lane.b32.xlu1 %v310_v2, %s1489_s29  ;;  %v312_v2 = vadd.f32 %v1552_v1, %v303_v57  ;;  %v1812_v57 = vadd.f32 %v1552_v1, %v672_v54 }
  0x37   : > { %329 = vrot.lane.b32.xlu0 %v309_v3, %s1489_s29  ;;  %v311_v3 = vadd.f32 %v1552_v1, %v302_v60  ;;  %v1378_v60 = vld [vmem:[%s1547_s25 + $0xa1] sm:$0xff] }
  0x38   : > { %v745_v62 = vmul.f32 %v1378_v60, %v1542_v0 }
  0x3a   : > { %404 = vrot.lane.b32.xlu1 %v383_v10, %s1488_s28  ;;  %v754_v8 = vadd.f32 %v1552_v1, %v745_v62 }
  0x3b   : > { %402 = vrot.lane.b32.xlu0 %v1601_v37, %s1488_s28  ;;  %v741_v37 = vmul.f32 %v1374_v31, %v1542_v0  ;;  %v523_v31 = vmul.f32 %v1357_v27, %v1542_v0  ;;  %v1352_v27 = vld [vmem:[%s1547_s25 + $0x100] sm:$0xff] }
  0x3c   : > { %v453_v32 = vmul.f32 %v1352_v27, %v1542_v0 }
  0x3d   : > { %v750_v51 = vadd.f32 %v1552_v1, %v741_v37  ;;  %v532_v37 = vadd.f32 %v1552_v1, %v523_v31 }
  0x3e   : > { %478 = vrot.lane.b32.xlu1 %v457_v18, %s1490_s30  ;;  %v462_v40 = vadd.f32 %v1552_v1, %v453_v32 }
  0x3f   : > { %476 = vrot.lane.b32.xlu0 %v456_v19, %s1490_s30  ;;  %v449_v19 = vmul.f32 %v1348_v15, %v1542_v0 }
  0x42   : > { %552 = vrot.lane.b32.xlu1 %v531_v24, %s1491_s6  ;;  %v458_v24 = vadd.f32 %v1552_v1, %v449_v19 }
  0x43   : > { %550 = vrot.lane.b32.xlu0 %v530_v25, %s1491_s6  ;;  %v451_v25 = vmul.f32 %v1350_v21, %v1542_v0  ;;  %v1343_v21 = vld [vmem:[%s1547_s25 + $0xa0] sm:$0xff] }
  0x44   : > { %v306_v26 = vmul.f32 %v1343_v21, %v1542_v0 }
  0x46   : > { %625 = vrot.lane.b32.xlu1 %v604_v28, %s1493_s7  ;;  %v461_v28 = vadd.f32 %v1552_v1, %v452_v22  ;;  %v315_v31 = vadd.f32 %v1552_v1, %v306_v26 }
  0x47   : > { %623 = vrot.lane.b32.xlu0 %v603_v29, %s1493_s7  ;;  %v460_v29 = vadd.f32 %v1552_v1, %v451_v25  ;;  %v826_v25 = vadd.f32 %v1552_v1, %v817_v20 }
  0x4a   : > { %698 = vrot.lane.b32.xlu1 %v677_v39, %s1494_s10 }
  0x4b   : > { %696 = vrot.lane.b32.xlu0 %v383_v10, %s1494_s10  ;;  %v368_v10 = vld [vmem:[%s1547_s25 + $0x31] sm:$0xff] }
  0x4c   : > { %v377_v13 = vmul.f32 %v1542_v0, %v368_v10 }
  0x4e   : > { %771 = vrot.lane.b32.xlu1 %v750_v51, %s1495_s15  ;;  %v386_v18 = vadd.f32 %v1552_v1, %v377_v13  ;;  %v608_v51 = vadd.f32 %v1552_v1, %v599_v47  ;;  %v809_v13 = vld [vmem:[%s1547_s25 + $0x42] sm:$0xff] }
  0x4f   : > { %769 = vrot.lane.b32.xlu0 %v749_v52, %s1495_s15  ;;  %v607_v52 = vadd.f32 %v1552_v1, %v598_v50  ;;  %v818_v19 = vmul.f32 %v1542_v0, %v809_v13  ;;  %v819_v50 = vmul.f32 %v1542_v0, %v810_v44 }
  0x51   : > { %v828_v54 = vadd.f32 %v1552_v1, %v819_v50 }
  0x52   : > { %844 = vrot.lane.b32.xlu1 %v823_v58, %s1496_s16  ;;  %v743_v58 = vmul.f32 %v1376_v55, %v1542_v0 }
  0x53   : > { %842 = vrot.lane.b32.xlu0 %v822_v59, %s1496_s16  ;;  %v742_v59 = vmul.f32 %v1375_v56, %v1542_v0 }
  0x54   : > { %v752_v63 = vadd.f32 %v1552_v1, %v743_v58 }
  0x56   : > { %335 = vrot.lane.b32.xlu1 %v312_v2, %s1489_s29  ;;  %v751_v2 = vadd.f32 %v1552_v1, %v742_v59 }
  0x57   : > { %333 = vrot.lane.b32.xlu0 %v311_v3, %s1489_s29  ;;  %v744_v3 = vmul.f32 %v1377_v61, %v1542_v0 }
  0x59   : > { %v753_v10 = vadd.f32 %v1552_v1, %v744_v3 }
  0x5a   : > { %339 = vrot.lane.b32.xlu1 %v314_v6, %s1489_s29  ;;  %v247_v6 = vld [vmem:[%s1547_s25 + $0x40] sm:$0xff] }
  0x5b   : > { %337 = vrot.lane.b32.xlu0 %v313_v7, %s1489_s29  ;;  %v262_v7 = vmul.f32 %v1542_v0, %v247_v6 }
  0x5d   : > { %v277_v12 = vadd.f32 %v1552_v1, %v262_v7 }
  0x5e   : > { %408 = vrot.lane.b32.xlu1 %v385_v11, %s1488_s28 }
  0x5f   : > { %406 = vrot.lane.b32.xlu0 %v677_v39, %s1488_s28  ;;  %v1367_v39 = vld [vmem:[%s1547_s25 + $0xe9] sm:$0xff]  ;;  %287 = vst.msk [vmem:[#allocation2 + $0x40] sm:$0xff] %vm278_vm1, %v277_v12 }
  0x60   : > { %v597_v41 = vmul.f32 %v1367_v39, %v1542_v0  ;;  %v600_v39 = vmul.f32 %v1370_v34, %v1542_v0 }
  0x62   : > { %412 = vrot.lane.b32.xlu1 %v387_v17, %s1488_s28  ;;  %v606_v48 = vadd.f32 %v1552_v1, %v597_v41  ;;  %v609_v47 = vadd.f32 %v1552_v1, %v600_v39 }
  0x63   : > { %410 = vrot.lane.b32.xlu0 %v386_v18, %s1488_s28 }
  0x66   : > { %482 = vrot.lane.b32.xlu1 %v459_v23, %s1490_s30 }
  0x67   : > { %480 = vrot.lane.b32.xlu0 %v458_v24, %s1490_s30  ;;  %v827_v24 = vadd.f32 %v1552_v1, %v818_v19 }
  0x6a   : > { %486 = vrot.lane.b32.xlu1 %v461_v28, %s1490_s30  ;;  %v1361_v28 = vld [vmem:[%s1547_s25 + $0x160] sm:$0xff] }
  0x6b   : > { %484 = vrot.lane.b32.xlu0 %v460_v29, %s1490_s30  ;;  %v527_v33 = vmul.f32 %v1361_v28, %v1542_v0 }
  0x6d   : > { %v536_v41 = vadd.f32 %v1552_v1, %v527_v33 }
  0x6e   : > { %556 = vrot.lane.b32.xlu1 %v533_v35, %s1491_s6  ;;  %v664_v35 = vld [vmem:[%s1547_s25 + $0x49] sm:$0xff] }
  0x6f   : > { %554 = vrot.lane.b32.xlu0 %v532_v37, %s1491_s6 }
  0x72   : > { %560 = vrot.lane.b32.xlu1 %v535_v42, %s1491_s6  ;;  %v673_v42 = vmul.f32 %v1542_v0, %v664_v35 }
  0x73   : > { %558 = vrot.lane.b32.xlu0 %v534_v43, %s1491_s6  ;;  %v1379_v43 = vld [vmem:[%s1547_s25 + $0xa9] sm:$0xff] }
  0x76   : > { %629 = vrot.lane.b32.xlu1 %v606_v48, %s1493_s7  ;;  %v682_v48 = vadd.f32 %v1552_v1, %v673_v42 }
  0x77   : > { %627 = vrot.lane.b32.xlu0 %v605_v49, %s1493_s7  ;;  %v746_v49 = vmul.f32 %v1379_v43, %v1542_v0 }
  0x79   : > { %v755_v53 = vadd.f32 %v1552_v1, %v746_v49 }
  0x7a   : > { %633 = vrot.lane.b32.xlu1 %v608_v51, %s1493_s7 }
  0x7b   : > { %631 = vrot.lane.b32.xlu0 %v607_v52, %s1493_s7 }
  0x7e   : > { %702 = vrot.lane.b32.xlu1 %v386_v18, %s1494_s10 }
  0x7f   : > { %700 = vrot.lane.b32.xlu0 %v385_v11, %s1494_s10  ;;  %v815_v11 = vmul.f32 %v1542_v0, %v806_v5 }
  0x81   : > { %v824_v18 = vadd.f32 %v1552_v1, %v815_v11 }
  0x82   : > { %706 = vrot.lane.b32.xlu1 %v1812_v57, %s1494_s10 }
  0x83   : > { %704 = vrot.lane.b32.xlu0 %v387_v17, %s1494_s10  ;;  %v825_v17 = vadd.f32 %v1552_v1, %v816_v9 }
  0x86   : > { %775 = vrot.lane.b32.xlu1 %v752_v63, %s1495_s15 }
  0x87   : > { %773 = vrot.lane.b32.xlu0 %v751_v2, %s1495_s15 }
  0x88   : > { %v399_v15 = vpop.permute.xlu1 %398 }
  0x89   : > { %v326_v16 = vpop.permute.xlu0 %325 }
  0x8a   : > { %353 = vst.msk [vmem:[#allocation2] sm:$0xff] %vm352_vm3, %v326_v16  ;;  %779 = vrot.lane.b32.xlu1 %v754_v8, %s1495_s15 }
  0x8b   : > { %777 = vrot.lane.b32.xlu0 %v753_v10, %s1495_s15  ;;  %426 = vst.msk [vmem:[#allocation2] sm:$0xff] %vm425_vm4, %v399_v15 }
  0x8c   : > { %v401_v22 = vpop.permute.xlu1 %400 }
  0x8d   : > { %v328_v23 = vpop.permute.xlu0 %327 }
  0x8e   : > { %354 = vst.msk [vmem:[#allocation2 + $0x8] sm:$0xff] %vm352_vm3, %v328_v23  ;;  %848 = vrot.lane.b32.xlu1 %v825_v17, %s1496_s16 }
  0x8f   : > { %846 = vrot.lane.b32.xlu0 %v824_v18, %s1496_s16  ;;  %427 = vst.msk [vmem:[#allocation2 + $0x8] sm:$0xff] %vm425_vm4, %v401_v22 }
  0x90   : > { %v475_v29 = vpop.permute.xlu1 %474 }
  0x91   : > { %v473_v30 = vpop.permute.xlu0 %472  ;;  %501 = vst.msk [vmem:[#allocation2 + $0x8] sm:$0xff] %vm499_vm5, %v475_v29 }
  0x92   : > { %500 = vst.msk [vmem:[#allocation2] sm:$0xff] %vm499_vm5, %v473_v30  ;;  %852 = vrot.lane.b32.xlu1 %v827_v24, %s1496_s16 }
  0x93   : > { %850 = vrot.lane.b32.xlu0 %v826_v25, %s1496_s16 }
  0x94   : > { %v549_v37 = vpop.permute.xlu1 %548 }
  0x95   : > { %v547_v38 = vpop.permute.xlu0 %546  ;;  %575 = vst.msk [vmem:[#allocation2 + $0x8] sm:$0xff] %vm573_vm6, %v549_v37 }
  0x96   : > { %574 = vst.msk [vmem:[#allocation2] sm:$0xff] %vm573_vm6, %v547_v38  ;;  %414 = vrot.lane.b32.xlu1 %v1812_v57, %s1488_s28 }
  0x97   : > { %341 = vrot.lane.b32.xlu0 %v315_v31, %s1489_s29 }
  0x98   : > { %v622_v45 = vpop.permute.xlu1 %621 }
  0x99   : > { %v620_v46 = vpop.permute.xlu0 %619  ;;  %648 = vst.msk [vmem:[#allocation2 + $0x8] sm:$0xff] %vm646_vm7, %v622_v45 }
  0x9a   : > { %647 = vst.msk [vmem:[#allocation2] sm:$0xff] %vm646_vm7, %v620_v46  ;;  %562 = vrot.lane.b32.xlu1 %v536_v41, %s1491_s6 }
  0x9b   : > { %488 = vrot.lane.b32.xlu0 %v462_v40, %s1490_s30 }
  0x9c   : > { %v695_v51 = vpop.permute.xlu1 %694 }
  0x9d   : > { %v693_v52 = vpop.permute.xlu0 %692  ;;  %721 = vst.msk [vmem:[#allocation2 + $0x8] sm:$0xff] %vm719_vm8, %v695_v51 }
  0x9e   : > { %720 = vst.msk [vmem:[#allocation2] sm:$0xff] %vm719_vm8, %v693_v52  ;;  %708 = vrot.lane.b32.xlu1 %v682_v48, %s1494_s10 }
  0x9f   : > { %635 = vrot.lane.b32.xlu0 %v609_v47, %s1493_s7 }
  0xa0   : > { %v768_v55 = vpop.permute.xlu1 %767 }
  0xa1   : > { %v766_v56 = vpop.permute.xlu0 %765  ;;  %794 = vst.msk [vmem:[#allocation2 + $0x8] sm:$0xff] %vm792_vm9, %v768_v55 }
  0xa2   : > { %793 = vst.msk [vmem:[#allocation2] sm:$0xff] %vm792_vm9, %v766_v56  ;;  %854 = vrot.lane.b32.xlu1 %v828_v54, %s1496_s16 }
  0xa3   : > { %781 = vrot.lane.b32.xlu0 %v755_v53, %s1495_s15 }
  0xa4   : > { %v841_v0 = vpop.permute.xlu1 %840 }
  0xa5   : > { %v839_v57 = vpop.permute.xlu0 %838  ;;  %867 = vst.msk [vmem:[#allocation2 + $0x8] sm:$0xff] %vm865_vm10, %v841_v0 }
  0xa6   : > { %866 = vst.msk [vmem:[#allocation2] sm:$0xff] %vm865_vm10, %v839_v57 }
  0xa8   : > { %v332_v58 = vpop.permute.xlu1 %331 }
  0xa9   : > { %v330_v59 = vpop.permute.xlu0 %329  ;;  %356 = vst.msk [vmem:[#allocation2 + $0x18] sm:$0xff] %vm352_vm3, %v332_v58 }
  0xaa   : > { %355 = vst.msk [vmem:[#allocation2 + $0x10] sm:$0xff] %vm352_vm3, %v330_v59 }
  0xac   : > { %v405_v1 = vpop.permute.xlu1 %404  ;;  %v876_v62 = vld [vmem:[#allocation2 + $0x8] sm:$0xff] }
  0xad   : > { %v403_v60 = vpop.permute.xlu0 %402  ;;  %v875_v61 = vld [vmem:[#allocation2] sm:$0xff]  ;;  %429 = vst.msk [vmem:[#allocation2 + $0x18] sm:$0xff] %vm425_vm4, %v405_v1 }
  0xae   : > { %428 = vst.msk [vmem:[#allocation2 + $0x10] sm:$0xff] %vm425_vm4, %v403_v60  ;;  %v884_v63 = vpack.c.bf16 %v876_v62, %v875_v61 }
  0xb0   : > { %1414 = vmatmul.mubr.msk.bf16.vlgmr.msra.gmra.mrb[0].mxu0 %vm909_vm11, %v884_v63  ;;  %v479_v2 = vpop.permute.xlu1 %478 }
  0xb1   : > { %v477_v3 = vpop.permute.xlu0 %476  ;;  %1417 = vmatprep.mubr.msk.bf16.mxu0 %vm1497_vm2, %v1492_v36  ;;  %503 = vst.msk [vmem:[#allocation2 + $0x18] sm:$0xff] %vm499_vm5, %v479_v2  ;;  %v1010_v2 = vlaneseq }
  0xb2   : > { %502 = vst.msk [vmem:[#allocation2 + $0x10] sm:$0xff] %vm499_vm5, %v477_v3 }
  0xb3   : > { %v1964_v3 = vshrl.u32 %v1010_v2, 7 }
  0xb4   : > { %v553_v4 = vpop.permute.xlu1 %552 }
  0xb5   : > { %v551_v5 = vpop.permute.xlu0 %550  ;;  %577 = vst.msk [vmem:[#allocation2 + $0x18] sm:$0xff] %vm573_vm6, %v553_v4  ;;  %v1012_v4 = vadd.s32 8, %v1964_v3  ;;  %v1017_v2 = vadd.s32 48, %v1964_v3 }
  0xb6   : > { %576 = vst.msk [vmem:[#allocation2 + $0x10] sm:$0xff] %vm573_vm6, %v551_v5 }
  0xb8   : > { %v626_v6 = vpop.permute.xlu1 %625 }
  0xb9   : > { %v624_v7 = vpop.permute.xlu0 %623  ;;  %650 = vst.msk [vmem:[#allocation2 + $0x18] sm:$0xff] %vm646_vm7, %v626_v6  ;;  %v1968_v5 = vmul.u32.u64.low 3817748708, %v1964_v3  ;;  %v1969_v6 = vmul.u32.u64.high 3817748708, %v1964_v3, %v1968_v5 }
  0xba   : > { %649 = vst.msk [vmem:[#allocation2 + $0x10] sm:$0xff] %vm646_vm7, %v624_v7 }
  0xbc   : > { %v699_v8 = vpop.permute.xlu1 %698 }
  0xbd   : > { %v697_v9 = vpop.permute.xlu0 %696  ;;  %723 = vst.msk [vmem:[#allocation2 + $0x18] sm:$0xff] %vm719_vm8, %v699_v8  ;;  %v1971_v7 = vmul.u32.u64.low 3817748708, %v1012_v4  ;;  %v1972_v8 = vmul.u32.u64.high 3817748708, %v1012_v4, %v1971_v7 }
  0xbe   : > { %722 = vst.msk [vmem:[#allocation2 + $0x10] sm:$0xff] %vm719_vm8, %v697_v9  ;;  %v1026_v9 = vshrl.u32 %v1969_v6, 3  ;;  %v1018_v6 = vadd.s32 56, %v1964_v3 }
  0xc0   : > { %v772_v10 = vpop.permute.xlu1 %771 }
  0xc1   : > { %v770_v11 = vpop.permute.xlu0 %769  ;;  %796 = vst.msk [vmem:[#allocation2 + $0x18] sm:$0xff] %vm792_vm9, %v772_v10  ;;  %v1037_v10 = vshrl.u32 %v1972_v8, 3  ;;  %v2015_v7 = vmul.u32.u64.low 3817748708, %v1017_v2  ;;  %v2016_v8 = vmul.u32.u64.high 3817748708, %v1017_v2, %v2015_v7 }
  0xc2   : > { %795 = vst.msk [vmem:[#allocation2 + $0x10] sm:$0xff] %vm792_vm9, %v770_v11  ;;  %v1027_v11 = vmul.u32 9, %v1026_v9 }
  0xc4   : > { %v845_v12 = vpop.permute.xlu1 %844 }
  0xc5   : > { %v843_v13 = vpop.permute.xlu0 %842  ;;  %869 = vst.msk [vmem:[#allocation2 + $0x18] sm:$0xff] %vm865_vm10, %v845_v12  ;;  %v1038_v12 = vmul.u32 9, %v1037_v10  ;;  %v2018_v9 = vmul.u32.u64.low 3817748708, %v1018_v6  ;;  %v2019_v10 = vmul.u32.u64.high 3817748708, %v1018_v6, %v2018_v9 }
  0xc6   : > { %868 = vst.msk [vmem:[#allocation2 + $0x10] sm:$0xff] %vm865_vm10, %v843_v13  ;;  %v1028_v13 = vsub.s32 %v1964_v3, %v1027_v11 }
  0xc8   : > { %v336_v14 = vpop.permute.xlu1 %335  ;;  %vm1119_vm12 = vcmp.ne.s32.totalorder %v1028_v13, 0  ;;  %vm1128_vm13 = vcmp.lt.s32.totalorder %v1028_v13, 0 }
  0xc9   : > { %v334_v15 = vpop.permute.xlu0 %333  ;;  %358 = vst.msk [vmem:[#allocation2 + $0x28] sm:$0xff] %vm352_vm3, %v336_v14  ;;  %v1039_v14 = vsub.s32 %v1012_v4, %v1038_v12  ;;  %vm1137_vm0 = vmand %vm1128_vm13, %vm1119_vm12 }
  0xca   : > { %357 = vst.msk [vmem:[#allocation2 + $0x20] sm:$0xff] %vm352_vm3, %v334_v15  ;;  %v1146_v15 = vadd.s32 9, %v1028_v13 }
  0xcb   : > { %vm1120_vm14 = vcmp.ne.s32.totalorder %v1039_v14, 0  ;;  %vm1129_vm15 = vcmp.lt.s32.totalorder %v1039_v14, 0 }
  0xcc   : > { %v340_v16 = vpop.permute.xlu1 %339  ;;  %v878_v19 = vld [vmem:[#allocation2 + $0x18] sm:$0xff]  ;;  %vm1138_vm1 = vmand %vm1129_vm15, %vm1120_vm14 }
  0xcd   : > { %v338_v17 = vpop.permute.xlu0 %337  ;;  %v877_v18 = vld [vmem:[#allocation2 + $0x10] sm:$0xff]  ;;  %360 = vst.msk [vmem:[#allocation2 + $0x38] sm:$0xff] %vm352_vm3, %v340_v16  ;;  %v1147_v16 = vadd.s32 9, %v1039_v14 }
  0xce   : > { %359 = vst.msk [vmem:[#allocation2 + $0x30] sm:$0xff] %vm352_vm3, %v338_v17  ;;  %v885_v20 = vpack.c.bf16 %v878_v19, %v877_v18  ;;  %v1155_v17 = vsel %vm1137_vm0, %v1146_v15, %v1028_v13  ;;  %v1013_v19 = vadd.s32 16, %v1964_v3 }
  0xcf   : > { %v1156_v18 = vsel %vm1138_vm1, %v1147_v16, %v1039_v14  ;;  %v1092_v14 = vshrl.u32 %v2016_v8, 3  ;;  %v1103_v16 = vshrl.u32 %v2019_v10, 3 }
  0xd0   : > { %1418 = vmatmul.mubr.msk.bf16.gmra.mrb[4].mxu0 %vm909_vm11, %v885_v20  ;;  %v409_v21 = vpop.permute.xlu1 %408  ;;  %v1014_v20 = vadd.s32 24, %v1964_v3 }
  0xd1   : > { %v407_v22 = vpop.permute.xlu0 %406  ;;  %1421 = vmatprep.mubr.msk.bf16.mxu0 %vm1497_vm2, %v1492_v36  ;;  %431 = vst.msk [vmem:[#allocation2 + $0x28] sm:$0xff] %vm425_vm4, %v409_v21 }
  0xd2   : > { %430 = vst.msk [vmem:[#allocation2 + $0x20] sm:$0xff] %vm425_vm4, %v407_v22 }
  0xd4   : > { %v413_v23 = vpop.permute.xlu1 %412 }
  0xd5   : > { %v411_v24 = vpop.permute.xlu0 %410  ;;  %433 = vst.msk [vmem:[#allocation2 + $0x38] sm:$0xff] %vm425_vm4, %v413_v23  ;;  %v1986_v22 = vmul.u32.u64.low 3817748708, %v1013_v19  ;;  %v1987_v23 = vmul.u32.u64.high 3817748708, %v1013_v19, %v1986_v22 }
  0xd6   : > { %432 = vst.msk [vmem:[#allocation2 + $0x30] sm:$0xff] %vm425_vm4, %v411_v24 }
  0xd8   : > { %v483_v25 = vpop.permute.xlu1 %482 }
  0xd9   : > { %v481_v26 = vpop.permute.xlu0 %480  ;;  %505 = vst.msk [vmem:[#allocation2 + $0x28] sm:$0xff] %vm499_vm5, %v483_v25 }
  0xda   : > { %504 = vst.msk [vmem:[#allocation2 + $0x20] sm:$0xff] %vm499_vm5, %v481_v26 }
  0xdc   : > { %v487_v27 = vpop.permute.xlu1 %486 }
  0xdd   : > { %v485_v28 = vpop.permute.xlu0 %484  ;;  %507 = vst.msk [vmem:[#allocation2 + $0x38] sm:$0xff] %vm499_vm5, %v487_v27  ;;  %v1990_v26 = vmul.u32.u64.low 3817748708, %v1014_v20  ;;  %v1991_v27 = vmul.u32.u64.high 3817748708, %v1014_v20, %v1990_v26 }
  0xde   : > { %506 = vst.msk [vmem:[#allocation2 + $0x30] sm:$0xff] %vm499_vm5, %v485_v28 }
  0xe0   : > { %v557_v29 = vpop.permute.xlu1 %556 }
  0xe1   : > { %v555_v30 = vpop.permute.xlu0 %554  ;;  %579 = vst.msk [vmem:[#allocation2 + $0x28] sm:$0xff] %vm573_vm6, %v557_v29 }
  0xe2   : > { %578 = vst.msk [vmem:[#allocation2 + $0x20] sm:$0xff] %vm573_vm6, %v555_v30 }
  0xe4   : > { %v561_v31 = vpop.permute.xlu1 %560 }
  0xe5   : > { %v559_v32 = vpop.permute.xlu0 %558  ;;  %581 = vst.msk [vmem:[#allocation2 + $0x38] sm:$0xff] %vm573_vm6, %v561_v31 }
  0xe6   : > { %580 = vst.msk [vmem:[#allocation2 + $0x30] sm:$0xff] %vm573_vm6, %v559_v32 }
  0xe8   : > { %v630_v33 = vpop.permute.xlu1 %629 }
  0xe9   : > { %v628_v34 = vpop.permute.xlu0 %627  ;;  %652 = vst.msk [vmem:[#allocation2 + $0x28] sm:$0xff] %vm646_vm7, %v630_v33 }
  0xea   : > { %651 = vst.msk [vmem:[#allocation2 + $0x20] sm:$0xff] %vm646_vm7, %v628_v34 }
  0xec   : > { %v634_v35 = vpop.permute.xlu1 %633 }
  0xed   : > { %v632_v37 = vpop.permute.xlu0 %631  ;;  %654 = vst.msk [vmem:[#allocation2 + $0x38] sm:$0xff] %vm646_vm7, %v634_v35 }
  0xee   : > { %653 = vst.msk [vmem:[#allocation2 + $0x30] sm:$0xff] %vm646_vm7, %v632_v37  ;;  %v1048_v37 = vshrl.u32 %v1987_v23, 3 }
  0xf0   : > { %v703_v38 = vpop.permute.xlu1 %702 }
  0xf1   : > { %v701_v39 = vpop.permute.xlu0 %700  ;;  %725 = vst.msk [vmem:[#allocation2 + $0x28] sm:$0xff] %vm719_vm8, %v703_v38 }
  0xf2   : > { %724 = vst.msk [vmem:[#allocation2 + $0x20] sm:$0xff] %vm719_vm8, %v701_v39  ;;  %v1059_v39 = vshrl.u32 %v1991_v27, 3 }
  0xf4   : > { %v707_v40 = vpop.permute.xlu1 %706 }
  0xf5   : > { %v705_v41 = vpop.permute.xlu0 %704  ;;  %727 = vst.msk [vmem:[#allocation2 + $0x38] sm:$0xff] %vm719_vm8, %v707_v40  ;;  %v1049_v40 = vmul.u32 9, %v1048_v37 }
  0xf6   : > { %726 = vst.msk [vmem:[#allocation2 + $0x30] sm:$0xff] %vm719_vm8, %v705_v41  ;;  %v1060_v41 = vmul.u32 9, %v1059_v39 }
  0xf8   : > { %v776_v42 = vpop.permute.xlu1 %775 }
  0xf9   : > { %v774_v43 = vpop.permute.xlu0 %773  ;;  %798 = vst.msk [vmem:[#allocation2 + $0x28] sm:$0xff] %vm792_vm9, %v776_v42  ;;  %v1050_v42 = vsub.s32 %v1013_v19, %v1049_v40  ;;  %v1019_v19 = vadd.s32 64, %v1964_v3 }
  0xfa   : > { %797 = vst.msk [vmem:[#allocation2 + $0x20] sm:$0xff] %vm792_vm9, %v774_v43  ;;  %v1061_v43 = vsub.s32 %v1014_v20, %v1060_v41 }
  0xfc   : > { %v780_v44 = vpop.permute.xlu1 %779 }
  0xfd   : > { %v778_v45 = vpop.permute.xlu0 %777  ;;  %800 = vst.msk [vmem:[#allocation2 + $0x38] sm:$0xff] %vm792_vm9, %v780_v44  ;;  %v1148_v44 = vadd.s32 9, %v1050_v42 }
  0xfe   : > { %799 = vst.msk [vmem:[#allocation2 + $0x30] sm:$0xff] %vm792_vm9, %v778_v45  ;;  %v1149_v45 = vadd.s32 9, %v1061_v43 }
 0x100   : > { %v849_v46 = vpop.permute.xlu1 %848 }
 0x101   : > { %v847_v47 = vpop.permute.xlu0 %846  ;;  %871 = vst.msk [vmem:[#allocation2 + $0x28] sm:$0xff] %vm865_vm10, %v849_v46 }
 0x102   : > { %870 = vst.msk [vmem:[#allocation2 + $0x20] sm:$0xff] %vm865_vm10, %v847_v47 }
 0x104   : > { %v853_v48 = vpop.permute.xlu1 %852 }
 0x105   : > { %v851_v49 = vpop.permute.xlu0 %850  ;;  %873 = vst.msk [vmem:[#allocation2 + $0x38] sm:$0xff] %vm865_vm10, %v853_v48 }
 0x106   : > { %872 = vst.msk [vmem:[#allocation2 + $0x30] sm:$0xff] %vm865_vm10, %v851_v49 }
 0x108   : > { %v415_v51 = vpop.permute.xlu1 %414  ;;  %v880_v53 = vld [vmem:[#allocation2 + $0x28] sm:$0xff] }
 0x109   : > { %v342_v50 = vpop.permute.xlu0 %341  ;;  %v879_v52 = vld [vmem:[#allocation2 + $0x20] sm:$0xff] }
 0x10a   : > { %361 = vst.msk [vmem:[#allocation2 + $0x40] sm:$0xff] %vm352_vm3, %v342_v50  ;;  %v886_v54 = vpack.c.bf16 %v880_v53, %v879_v52  ;;  %vm1165_vm3 = vcmp.lt.s32.totalorder %v1156_v18, 8  ;;  %v1093_v18 = vmul.u32 9, %v1092_v14 }
 0x10b   : > { %434 = vst.msk [vmem:[#allocation2 + $0x40] sm:$0xff] %vm425_vm4, %v415_v51  ;;  %v1389_v25 = vsel %vm1165_vm3, 1.0, %v1492_v36  ;;  %vm1121_vm4 = vcmp.ne.s32.totalorder %v1050_v42, 0 }
 0x10c   : > { %1422 = vmatmul.mubr.msk.bf16.gmra.mrb[8].mxu0 %vm909_vm11, %v886_v54  ;;  %v563_v56 = vpop.permute.xlu1 %562  ;;  %v882_v57 = vld [vmem:[#allocation2 + $0x38] sm:$0xff]  ;;  %v1094_v22 = vsub.s32 %v1017_v2, %v1093_v18 }
 0x10d   : > { %v489_v55 = vpop.permute.xlu0 %488  ;;  %v881_v0 = vld [vmem:[#allocation2 + $0x30] sm:$0xff] }
 0x10e   : > { %508 = vst.msk [vmem:[#allocation2 + $0x40] sm:$0xff] %vm499_vm5, %v489_v55  ;;  %v887_v58 = vpack.c.bf16 %v882_v57, %v881_v0  ;;  %vm1130_vm5 = vcmp.lt.s32.totalorder %v1050_v42, 0  ;;  %vm1125_vm1 = vcmp.ne.s32.totalorder %v1094_v22, 0 }
 0x10f   : > { %582 = vst.msk [vmem:[#allocation2 + $0x40] sm:$0xff] %vm573_vm6, %v563_v56  ;;  %vm1122_vm6 = vcmp.ne.s32.totalorder %v1061_v43, 0 }
 0x110   : > { %1426 = vmatmul.mubr.msk.bf16.vlgmr.msra.gmra.mrb[0].mxu1 %vm909_vm11, %v887_v58  ;;  %v709_v1 = vpop.permute.xlu1 %708 }
 0x111   : > { %v636_v59 = vpop.permute.xlu0 %635  ;;  %1429 = vmatprep.mubr.msk.bf16.mxu1 %vm1497_vm2, %v1492_v36  ;;  %vm1164_vm2 = vcmp.lt.s32.totalorder %v1155_v17, 8 }
 0x112   : > { %655 = vst.msk [vmem:[#allocation2 + $0x40] sm:$0xff] %vm646_vm7, %v636_v59  ;;  %v1388_v21 = vsel %vm1164_vm2, 1.0, %v1492_v36  ;;  %vm1131_vm7 = vcmp.lt.s32.totalorder %v1061_v43, 0  ;;  %vm1134_vm2 = vcmp.lt.s32.totalorder %v1094_v22, 0 }
 0x113   : > { %728 = vst.msk [vmem:[#allocation2 + $0x40] sm:$0xff] %vm719_vm8, %v709_v1  ;;  %vm1139_vm8 = vmand %vm1130_vm5, %vm1121_vm4 }
 0x114   : > { %v855_v61 = vpop.permute.xlu1 %854  ;;  %v1157_v46 = vsel %vm1139_vm8, %v1148_v44, %v1050_v42 }
 0x115   : > { %v782_v60 = vpop.permute.xlu0 %781 }
 0x116   : > { %801 = vst.msk [vmem:[#allocation2 + $0x40] sm:$0xff] %vm792_vm9, %v782_v60  ;;  %vm1140_vm9 = vmand %vm1131_vm7, %vm1122_vm6  ;;  %v1015_v60 = vadd.s32 32, %v1964_v3 }
 0x117   : > { %874 = vst.msk [vmem:[#allocation2 + $0x40] sm:$0xff] %vm865_vm10, %v855_v61  ;;  %v1158_v47 = vsel %vm1140_vm9, %v1149_v45, %v1061_v43  ;;  %vm1166_vm10 = vcmp.lt.s32.totalorder %v1157_v46, 8  ;;  %v1016_v61 = vadd.s32 40, %v1964_v3  ;;  %vm1143_vm6 = vmand %vm1134_vm2, %vm1125_vm1 }
 0x118   : > { %v1390_v48 = vsel %vm1166_vm10, 1.0, %v1492_v36 }
 0x119   : > { %v2011_v4 = vmul.u32.u64.low 3817748708, %v1016_v61  ;;  %v2012_v5 = vmul.u32.u64.high 3817748708, %v1016_v61, %v2011_v4 }
 0x11b   : > { %v1081_v12 = vshrl.u32 %v2012_v5, 3 }
 0x11d   : > { %v1082_v15 = vmul.u32 9, %v1081_v12 }
 0x11e   : > { %v883_v62 = vld [vmem:[#allocation2 + $0x40] sm:$0xff] }
 0x11f   : > { %v888_v63 = vpack.c.bf16 %v883_v62, %v883_v62  ;;  %v1083_v20 = vsub.s32 %v1016_v61, %v1082_v15 }
 0x121   : > { %1430 = vmatmul.mubr.msk.bf16.gmra.mrb[4].mxu1 %vm909_vm11, %v888_v63  ;;  %vm1167_vm11 = vcmp.lt.s32.totalorder %v1158_v47, 8  ;;  %v2007_v62 = vmul.u32.u64.low 3817748708, %v1015_v60  ;;  %v2008_v63 = vmul.u32.u64.high 3817748708, %v1015_v60, %v2007_v62  ;;  %vm1124_vm14 = vcmp.ne.s32.totalorder %v1083_v20, 0 }
 0x122   : > { %v1391_v50 = vsel %vm1167_vm11, 1.0, %v1492_v36  ;;  %vm1133_vm15 = vcmp.lt.s32.totalorder %v1083_v20, 0  ;;  %v1151_v27 = vadd.s32 9, %v1083_v20 }
 0x123   : > { %v1070_v11 = vshrl.u32 %v2008_v63, 3  ;;  %vm1142_vm3 = vmand %vm1133_vm15, %vm1124_vm14 }
 0x124   : > { %v1160_v3 = vsel %vm1142_vm3, %v1151_v27, %v1083_v20 }
 0x125   : > { %v1071_v13 = vmul.u32 9, %v1070_v11  ;;  %vm1169_vm9 = vcmp.lt.s32.totalorder %v1160_v3, 8 }
 0x127   : > { %v1072_v17 = vsub.s32 %v1015_v60, %v1071_v13 }
 0x129   : > { %vm1123_vm12 = vcmp.ne.s32.totalorder %v1072_v17, 0  ;;  %vm1132_vm13 = vcmp.lt.s32.totalorder %v1072_v17, 0 }
 0x12a   : > { %vm1141_vm0 = vmand %vm1132_vm13, %vm1123_vm12 }
 0x183   : > { %v963_v24 = vpop.f32.mrb[0].mxu0 }
 0x184   : > { %1001 = vst [vmem:[%s1983_s22] sm:$0xff] %v963_v24  ;;  %v1191_v28 = vmul.f32 %v1388_v21, %v963_v24  ;;  %v1415_v29 = vpop.f32.mrb[1].mxu0  ;;  %v1104_v21 = vmul.u32 9, %v1103_v16 }
 0x185   : > { %v966_v30 = vpop.f32.mrb[2].mxu0  ;;  %v1152_v29 = vadd.s32 9, %v1094_v22 }
 0x186   : > { %1002 = vst [vmem:[%s1983_s22 + $0x8] sm:$0xff] %v966_v30  ;;  %v1192_v31 = vmul.f32 %v1389_v25, %v966_v30  ;;  %v1416_v32 = vpop.f32.mrb[3].mxu0  ;;  %v1215_v33 = vmul.f32 %v1191_v28, %v963_v24  ;;  %v2026_v23 = vmul.u32.u64.low 3817748708, %v1019_v19  ;;  %v2027_v24 = vmul.u32.u64.high 3817748708, %v1019_v19, %v2026_v23 }
 0x187   : > { %v1150_v25 = vadd.s32 9, %v1072_v17  ;;  %v1105_v26 = vsub.s32 %v1018_v6, %v1104_v21  ;;  %v1161_v32 = vsel %vm1143_vm6, %v1152_v29, %v1094_v22 }
 0x188   : > { %v1200_v34 = vadd.f32 %v1192_v31, %v1191_v28  ;;  %v1216_v35 = vmul.f32 %v1192_v31, %v966_v30  ;;  %v1114_v31 = vshrl.u32 %v2027_v24, 3  ;;  %vm1170_vm10 = vcmp.lt.s32.totalorder %v1161_v32, 8 }
 0x189   : > { %v1159_v28 = vsel %vm1141_vm0, %v1150_v25, %v1072_v17  ;;  %vm1126_vm4 = vcmp.ne.s32.totalorder %v1105_v26, 0  ;;  %vm1135_vm5 = vcmp.lt.s32.totalorder %v1105_v26, 0  ;;  %v1153_v30 = vadd.s32 9, %v1105_v26 }
 0x18a   : > { %v1224_v38 = vadd.f32 %v1216_v35, %v1215_v33  ;;  %vm1168_vm7 = vcmp.lt.s32.totalorder %v1159_v28, 8  ;;  %vm1144_vm8 = vmand %vm1135_vm5, %vm1126_vm4  ;;  %v1115_v35 = vmul.u32 9, %v1114_v31  ;;  %v1394_v42 = vsel %vm1170_vm10, 1.0, %v1492_v36 }
 0x18b   : > { %v1392_v33 = vsel %vm1168_vm7, 1.0, %v1492_v36 }
 0x18c   : > { %v1116_v43 = vsub.s32 %v1019_v19, %v1115_v35 }
 0x18e   : > { %vm1127_vm12 = vcmp.ne.s32.totalorder %v1116_v43, 0  ;;  %vm1136_vm13 = vcmp.lt.s32.totalorder %v1116_v43, 0  ;;  %v1154_v63 = vadd.s32 9, %v1116_v43 }
 0x18f   : > { %vm1145_vm14 = vmand %vm1136_vm13, %vm1127_vm12 }
 0x190   : > { %v1163_v2 = vsel %vm1145_vm14, %v1154_v63, %v1116_v43 }
 0x191   : > { %vm1172_vm15 = vcmp.lt.s32.totalorder %v1163_v2, 8 }
 0x192   : > { %v1396_v4 = vsel %vm1172_vm15, 1.0, %v1492_v36 }
 0x1a3   : > { %v971_v49 = vpop.f32.mrb[4].mxu0 }
 0x1a4   : > { %1003 = vst [vmem:[%s1983_s22 + $0x10] sm:$0xff] %v971_v49  ;;  %v1193_v51 = vmul.f32 %v1390_v48, %v971_v49  ;;  %v1419_v52 = vpop.f32.mrb[5].mxu0 }
 0x1a5   : > { %v974_v53 = vpop.f32.mrb[6].mxu0 }
 0x1a6   : > { %v1201_v54 = vadd.f32 %v1200_v34, %v1193_v51  ;;  %v1217_v55 = vmul.f32 %v1193_v51, %v971_v49  ;;  %1004 = vst [vmem:[%s1983_s22 + $0x18] sm:$0xff] %v974_v53  ;;  %v1194_v56 = vmul.f32 %v1391_v50, %v974_v53  ;;  %v1420_v0 = vpop.f32.mrb[7].mxu0  ;;  %v1162_v34 = vsel %vm1144_vm8, %v1153_v30, %v1105_v26 }
 0x1a7   : > { %vm1171_vm11 = vcmp.lt.s32.totalorder %v1162_v34, 8 }
 0x1a8   : > { %v1225_v57 = vadd.f32 %v1224_v38, %v1217_v55  ;;  %v2001_v58 = vadd.f32 %v1201_v54, %v1194_v56  ;;  %v1218_v59 = vmul.f32 %v1194_v56, %v974_v53  ;;  %v1393_v38 = vsel %vm1169_vm9, 1.0, %v1492_v36 }
 0x1a9   : > { %v1395_v49 = vsel %vm1171_vm11, 1.0, %v1492_v36 }
 0x1aa   : > { %v2003_v1 = vadd.f32 %v1225_v57, %v1218_v59 }
 0x1df   : > { %v979_v37 = vpop.f32.mrb[8].mxu0 }
 0x1e0   : > { %1005 = vst [vmem:[%s1983_s22 + $0x20] sm:$0xff] %v979_v37  ;;  %v1195_v39 = vmul.f32 %v1392_v33, %v979_v37  ;;  %v1423_v40 = vpop.f32.mrb[9].mxu0 }
 0x1e1   : > { %v982_v41 = vpop.f32.mrb[10].mxu0 }
 0x1e2   : > { %v1203_v44 = vadd.f32 %v2001_v58, %v1195_v39  ;;  %v1219_v45 = vmul.f32 %v1195_v39, %v979_v37  ;;  %1006 = vst [vmem:[%s1983_s22 + $0x28] sm:$0xff] %v982_v41  ;;  %v1196_v46 = vmul.f32 %v1393_v38, %v982_v41  ;;  %v1424_v47 = vpop.f32.mrb[11].mxu0 }
 0x1e3   : > { %v987_v48 = vpop.f32.mrb[0].mxu1 }
 0x1e4   : > { %v1227_v50 = vadd.f32 %v2003_v1, %v1219_v45  ;;  %v1204_v51 = vadd.f32 %v1203_v44, %v1196_v46  ;;  %v1220_v52 = vmul.f32 %v1196_v46, %v982_v41  ;;  %1007 = vst [vmem:[%s1983_s22 + $0x30] sm:$0xff] %v987_v48  ;;  %v1197_v53 = vmul.f32 %v1394_v42, %v987_v48  ;;  %v1427_v54 = vpop.f32.mrb[1].mxu1 }
 0x1e5   : > { %v990_v55 = vpop.f32.mrb[2].mxu1 }
 0x1e6   : > { %v1228_v56 = vadd.f32 %v1227_v50, %v1220_v52  ;;  %v1205_v0 = vadd.f32 %v1204_v51, %v1197_v53  ;;  %v1221_v57 = vmul.f32 %v1197_v53, %v987_v48  ;;  %1008 = vst [vmem:[%s1983_s22 + $0x38] sm:$0xff] %v990_v55  ;;  %v1198_v58 = vmul.f32 %v1395_v49, %v990_v55  ;;  %v1428_v59 = vpop.f32.mrb[3].mxu1 }
 0x1e8   : > { %v1229_v60 = vadd.f32 %v1228_v56, %v1221_v57  ;;  %v1206_v61 = vadd.f32 %v1205_v0, %v1198_v58  ;;  %v1222_v62 = vmul.f32 %v1198_v58, %v990_v55 }
 0x1ea   : > { %v1230_v1 = vadd.f32 %v1229_v60, %v1222_v62 }
 0x1f4   : > { %v995_v5 = vpop.f32.mrb[4].mxu1 }
 0x1f5   : > { %1009 = vst [vmem:[%s1983_s22 + $0x40] sm:$0xff] %v995_v5  ;;  %v1199_v6 = vmul.f32 %v1396_v4, %v995_v5  ;;  %v1431_v7 = vpop.f32.mrb[5].mxu1 }
 0x1f6   : > { %v998_v8 = vpop.f32.mrb[6].mxu1 }
 0x1f7   : > { %v1207_v9 = vadd.f32 %v1206_v61, %v1199_v6  ;;  %v1223_v10 = vmul.f32 %v1199_v6, %v995_v5  ;;  %v1432_v11 = vpop.f32.mrb[7].mxu1 }
 0x1f9   : > { %v1208_v12 = vrot.slane %v1207_v9, 4  ;;  %v1231_v13 = vadd.f32 %v1230_v1, %v1223_v10 }
 0x1fb   : > { %v1209_v14 = vadd.f32 %v1208_v12, %v1207_v9  ;;  %v1232_v15 = vrot.slane %v1231_v13, 4 }
 0x1fd   : > { %v1210_v16 = vrot.slane %v1209_v14, 2  ;;  %v1233_v17 = vadd.f32 %v1232_v15, %v1231_v13 }
 0x1ff   : > { %v1211_v18 = vadd.f32 %v1210_v16, %v1209_v14  ;;  %v1234_v19 = vrot.slane %v1233_v17, 2 }
 0x201   : > { %v1212_v20 = vrot.slane %v1211_v18, 1  ;;  %v1235_v21 = vadd.f32 %v1234_v19, %v1233_v17 }
 0x203   : > { %v1213_v36 = vadd.f32 %v1212_v20, %v1211_v18  ;;  %v1236_v22 = vrot.slane %v1235_v21, 1 }
 0x205   : > { %1214 = vst [vmem:[%s235_s26] sm:$0x1] %v1213_v36  ;;  %v1237_v23 = vadd.f32 %v1236_v22, %v1235_v21 }
 0x207   : > { %1238 = vst [vmem:[%s235_s26 + $0x1] sm:$0x1] %v1237_v23 }
 0x208 PF: > { %s16_s18 = sadd.s32 1, %s1486_s18  }
 0x209   : > { %p13_p4 = scmp.ge.s32.totalorder %s16_s18, 4  }
 0x20b   :  { %15 = sbr.rel (!%p13_p4) target bundleno = 1 (0x1), region = 81 }

// kernel: myblock_forward.5
= control target key start
LH: loop header
LB: loop body
LE: loop exit
PB: predicated region body
PF: predicated region fallthrough
CT: control target
= control target key end

     0   :  { %s1608_s18 = smov 0   ;;  %s2173_s0 = inlined_call_operand.vmem [shape: f32[2,1,112,8], index: 0, kind: input, shape index: {}]   ;;  %s2174_s1 = inlined_call_operand.vmem [shape: bf16[72,128], index: 1, kind: input, shape index: {}]   ;;  %s2175_s2 = inlined_call_operand.vmem [shape: f32[1,8], index: 2, kind: input, shape index: {}]   ;;  %s2176_s3 = inlined_call_operand.vmem [shape: f32[1,8], index: 3, kind: input, shape index: {}]   ;;  %s2177_s4 = inlined_call_operand.vmem [shape: f32[2,80,128], index: 4, kind: output, shape index: {0}]   ;;  %s2178_s5 = inlined_call_operand.vmem [shape: f32[2,2,128], index: 5, kind: output, shape index: {1}]  }
   0x1 LB: > { %s1433_s19 = sadd.s32 4294967295, %s1566_s18   ;;  %p1437_p0 = scmp.ge.s32.totalorder %s1566_s18, 1  ;;  %s1566_s18 = sphi %s1608_s18, %s16_s18  }
   0x2   : > { %p190_p1 = scmp.lt.s32.totalorder %s1566_s18, 3 }
   0x4   : > { %p191_p2 = pnand %p1437_p0, %p190_p1 }
   0x5   : > { %p222_p3 = scmp.lt.s32.totalorder (!%p191_p2), %s1433_s19, 1  ;;  %v1622_v0 = vld [vmem:[%s2175_s2] ss:$0 sm:$0xff] (!%p191_p2)  ;;  %s1568_s28 = smov (!%p191_p2), 16   ;;  %v1570_v23 = vmov (!%p191_p2), 0.0   ;;  %v1556_v42 = vld [vmem:[%s2174_s1 + $0x8] sm:$0xff] (!%p191_p2)  }
   0x6   : > { %194 = sbr.rel (%p191_p2) target bundleno = 537 (0x219), region = 36  ;;  %v1632_v1 = vld [vmem:[%s2176_s3] ss:$0 sm:$0xff] (!%p191_p2)  ;;  %s1569_s29 = smov (!%p191_p2), 8   ;;  %1475 = vmatprep.subr.bf16.mxu0 (!%p191_p2), %v1570_v23  ;;  %1505 = vmatprep.subr.bf16.mxu1 (!%p191_p2), %v1570_v23  ;;  %vm281_vm0 = vcmask (!%p191_p2), 64512   ;;  %v1557_v53 = vld [vmem:[%s2174_s1 + $0x10] sm:$0xff] (!%p191_p2)  }
   0x7   : > { %s1571_s30 = smov (!%p191_p2), 24   ;;  %s1572_s6 = smov (!%p191_p2), 32   ;;  %v1555_v34 = vld [vmem:[%s2174_s1] sm:$0xff] (!%p191_p2)   ;;  %v1558_v61 = vld [vmem:[%s2174_s1 + $0x18] sm:$0xff] (!%p191_p2)   ;;  %vm1007_vm1 = vcmask (!%p191_p2), 1043456   ;;  %vm1577_vm2 = vmmov (!%p191_p2), 0  }
   0x8   : > { %s1573_s9 = smov (!%p191_p2), 40   ;;  %1476 = vmatpush3.bf16.msra.mxu0 (!%p191_p2), %v1555_v34  ;;  %1510 = vmatpush3.bf16.msra.mxu1 (!%p191_p2), %v1555_v34  ;;  %s1574_s12 = smov (!%p191_p2), 48   ;;  %v1559_v62 = vld [vmem:[%s2174_s1 + $0x20] ss:$0 sps:$4 sm:$0xff] (!%p191_p2)   ;;  %vm362_vm3 = vcmask (!%p191_p2), 130112   ;;  %vm443_vm4 = vcmask (!%p191_p2), 195712  }
   0x9   : > { %1477 = vmatprep.subr.bf16.mxu0 (!%p191_p2), %v1570_v23  ;;  %1506 = vmatprep.subr.bf16.mxu1 (!%p191_p2), %v1570_v23  ;;  %s1575_s15 = smov (!%p191_p2), 56   ;;  %s1576_s22 = smov (!%p191_p2), 64   ;;  %vm524_vm5 = vcmask (!%p191_p2), 261312   ;;  %vm605_vm6 = vcmask (!%p191_p2), 326912   ;;  %vm686_vm7 = vcmask (!%p191_p2), 392512   ;;  %vm767_vm8 = vcmask (!%p191_p2), 458112  }
   0xa   : > { %1485 = vmatprep.mubr.msk.bf16.mxu0 (!%p191_p2), %vm1577_vm2, %v1570_v23  ;;  %1497 = vmatprep.mubr.msk.bf16.mxu1 (!%p191_p2), %vm1577_vm2, %v1570_v23  ;;  %vm848_vm9 = vcmask (!%p191_p2), 523712   ;;  %vm929_vm10 = vcmask (!%p191_p2), 589312   ;;  %vm991_vm11 = vcmask (!%p191_p2), 588800  }
   0xc   : > { %1478 = vmatpush3.bf16.msra.mxu0 (!%p191_p2), %v1556_v42  ;;  %1511 = vmatpush3.bf16.msra.mxu1 (!%p191_p2), %v1556_v42 }
   0xd   : > { %s2180_s19 = smov (!%p222_p3, %s1433_s19), 1  ;;  %1479 = vmatprep.subr.bf16.mxu0 %v1570_v23  ;;  %1507 = vmatprep.subr.bf16.mxu1 %v1570_v23 }
   0xe   : > { %s1515_s20 = smul.u32 112, %s2180_s19  ;;  %s1440_s27 = sshll.u32 %s2180_s19, 1 }
   0xf   : > { %s1516_s23 = smul.u32 80, %s2180_s19 }
  0x10   : > { %s1627_s25 = scalar_lea.vmem %s2173_s0, %s1515_s20  ;;  %1480 = vmatpush3.bf16.msra.mxu0 %v1557_v53  ;;  %1512 = vmatpush3.bf16.msra.mxu1 %v1557_v53 }
  0x11   : > { %v373_v2 = vld [vmem:[%s1627_s25 + $0x2] sm:$0xff]  ;;  %v374_v4 = vld [vmem:[%s1627_s25 + $0xa] sm:$0xff]  ;;  %v455_v10 = vld [vmem:[%s1627_s25 + $0x12] sm:$0xff]  ;;  %1481 = vmatprep.subr.bf16.mxu0 %v1570_v23  ;;  %1508 = vmatprep.subr.bf16.mxu1 %v1570_v23  ;;  %s2103_s26 = scalar_lea.vmem %s2177_s4, %s1516_s23 }
  0x12   : > { %v292_v3 = vld [vmem:[%s1627_s25 + $0x1] sm:$0xff]  ;;  %v383_v5 = vmul.f32 %v1622_v0, %v373_v2  ;;  %v384_v7 = vmul.f32 %v1622_v0, %v374_v4  ;;  %v293_v8 = vld [vmem:[%s1627_s25 + $0x9] sm:$0xff]  ;;  %v465_v15 = vmul.f32 %v1622_v0, %v455_v10  ;;  %v536_v16 = vld [vmem:[%s1627_s25 + $0x13] sm:$0xff] }
  0x13   : > { %v302_v6 = vmul.f32 %v1622_v0, %v292_v3  ;;  %v303_v9 = vmul.f32 %v1622_v0, %v293_v8  ;;  %v535_v17 = vld [vmem:[%s1627_s25 + $0xb] sm:$0xff]  ;;  %v546_v18 = vmul.f32 %v1622_v0, %v536_v16  ;;  %v617_v21 = vld [vmem:[%s1627_s25 + $0x14] sm:$0xff]  ;;  %v698_v28 = vld [vmem:[%s1627_s25 + $0x1c] sm:$0xff] }
  0x14   : > { %v393_v11 = vadd.f32 %v1632_v1, %v383_v5  ;;  %v394_v13 = vadd.f32 %v1632_v1, %v384_v7  ;;  %v1656_v19 = vadd.f32 %v1632_v1, %v465_v15  ;;  %v545_v20 = vmul.f32 %v1622_v0, %v535_v17  ;;  %v616_v22 = vld [vmem:[%s1627_s25 + $0xc] sm:$0xff]  ;;  %v779_v32 = vld [vmem:[%s1627_s25 + $0x1d] sm:$0xff]  ;;  %v778_v33 = vld [vmem:[%s1627_s25 + $0x15] sm:$0xff]  ;;  %1482 = vmatpush3.bf16.msra.mxu0 %v1558_v61 }
  0x15   : > { %v312_v12 = vadd.f32 %v1632_v1, %v302_v6  ;;  %v313_v14 = vadd.f32 %v1632_v1, %v303_v9  ;;  %v556_v24 = vadd.f32 %v1632_v1, %v546_v18  ;;  %v627_v26 = vmul.f32 %v1622_v0, %v617_v21  ;;  %v239_v35 = vld [vmem:[%s1627_s25] sm:$0xff]  ;;  %v240_v40 = vld [vmem:[%s1627_s25 + $0x8] sm:$0xff]  ;;  %v859_v41 = vld [vmem:[%s1627_s25 + $0x16] sm:$0xff]  ;;  %1483 = vmatprep.subr.bf16.mxu0 %v1570_v23 }
  0x16   : > { %413 = vrot.lane.b32.xlu1 %v393_v11, %s1568_s28  ;;  %v555_v25 = vadd.f32 %v1632_v1, %v545_v20  ;;  %v626_v27 = vmul.f32 %v1622_v0, %v616_v22  ;;  %v708_v31 = vmul.f32 %v1622_v0, %v698_v28  ;;  %v789_v37 = vmul.f32 %v1622_v0, %v779_v32  ;;  %v860_v39 = vld [vmem:[%s1627_s25 + $0x1e] sm:$0xff]  ;;  %v294_v50 = vld [vmem:[%s1627_s25 + $0x11] sm:$0xff] }
  0x17   : > { %332 = vrot.lane.b32.xlu0 %v312_v12, %s1569_s29  ;;  %v637_v29 = vadd.f32 %v1632_v1, %v627_v26  ;;  %v788_v38 = vmul.f32 %v1622_v0, %v778_v33  ;;  %v255_v43 = vmul.f32 %v1622_v0, %v239_v35  ;;  %v870_v44 = vmul.f32 %v1622_v0, %v860_v39  ;;  %v295_v49 = vld [vmem:[%s1627_s25 + $0x19] sm:$0xff]  ;;  %v241_v59 = vld [vmem:[%s1627_s25 + $0x10] sm:$0xff]  ;;  %v457_v6 = vld [vmem:[%s1627_s25 + $0x22] sm:$0xff] }
  0x18   : > { %v636_v30 = vadd.f32 %v1632_v1, %v626_v27  ;;  %v1685_v36 = vadd.f32 %v1632_v1, %v708_v31  ;;  %v256_v45 = vmul.f32 %v1622_v0, %v240_v40  ;;  %v799_v46 = vadd.f32 %v1632_v1, %v789_v37  ;;  %v242_v58 = vld [vmem:[%s1627_s25 + $0x18] sm:$0xff]  ;;  %v538_v12 = vld [vmem:[%s1627_s25 + $0x23] sm:$0xff]  ;;  %1513 = vmatpush3.bf16.msra.mxu1 %v1558_v61  ;;  %v700_v21 = vld [vmem:[%s1627_s25 + $0x2c] sm:$0xff] }
  0x19   : > { %v798_v47 = vadd.f32 %v1632_v1, %v788_v38  ;;  %v869_v48 = vmul.f32 %v1622_v0, %v859_v41  ;;  %v271_v51 = vadd.f32 %v1632_v1, %v255_v43  ;;  %v305_v54 = vmul.f32 %v1622_v0, %v295_v49  ;;  %v376_v60 = vld [vmem:[%s1627_s25 + $0x1a] sm:$0xff]  ;;  %v619_v17 = vld [vmem:[%s1627_s25 + $0x24] sm:$0xff]  ;;  %1509 = vmatprep.subr.bf16.mxu1 %v1570_v23  ;;  %v862_v34 = vld [vmem:[%s1627_s25 + $0x2e] sm:$0xff] }
  0x1a   : > { %415 = vrot.lane.b32.xlu1 %v394_v13, %s1568_s28  ;;  %v272_v52 = vadd.f32 %v1632_v1, %v256_v45  ;;  %v880_v55 = vadd.f32 %v1632_v1, %v870_v44  ;;  %v304_v57 = vmul.f32 %v1622_v0, %v294_v50  ;;  %v258_v63 = vmul.f32 %v1622_v0, %v242_v58  ;;  %v780_v26 = vld [vmem:[%s1627_s25 + $0x25] sm:$0xff]  ;;  %v246_v39 = vld [vmem:[%s1627_s25 + $0x38] sm:$0xff]  ;;  %v245_v40 = vld [vmem:[%s1627_s25 + $0x30] sm:$0xff] }
  0x1b   : > { %334 = vrot.lane.b32.xlu0 %v313_v14, %s1569_s29  ;;  %282 = vst.msk [vmem:[#allocation2] sm:$0xff] %vm281_vm0, %v271_v51  ;;  %v879_v56 = vadd.f32 %v1632_v1, %v869_v48  ;;  %v257_v2 = vmul.f32 %v1622_v0, %v241_v59  ;;  %v315_v3 = vadd.f32 %v1632_v1, %v305_v54  ;;  %v1009_v9 = vsel %vm1007_vm1, %v1559_v62, 0  ;;  %v244_v27 = vld [vmem:[%s1627_s25 + $0x28] sm:$0xff]  ;;  %v243_v28 = vld [vmem:[%s1627_s25 + $0x20] sm:$0xff] }
  0x1c   : > { %283 = vst.msk [vmem:[#allocation2 + $0x8] sm:$0xff] %vm281_vm0, %v272_v52  ;;  %v314_v4 = vadd.f32 %v1632_v1, %v304_v57  ;;  %v386_v5 = vmul.f32 %v1622_v0, %v376_v60  ;;  %v274_v7 = vadd.f32 %v1632_v1, %v258_v63  ;;  %v467_v11 = vmul.f32 %v1622_v0, %v457_v6  ;;  %v861_v38 = vld [vmem:[%s1627_s25 + $0x26] sm:$0xff]  ;;  %v299_v54 = vld [vmem:[%s1627_s25 + $0x39] sm:$0xff] }
  0x1d   : > { %v273_v8 = vadd.f32 %v1632_v1, %v257_v2  ;;  %1484 = vmatpush3.bf16.msra.mxu0 %v1009_v9  ;;  %v548_v15 = vmul.f32 %v1622_v0, %v538_v12  ;;  %v629_v20 = vmul.f32 %v1622_v0, %v619_v17  ;;  %1514 = vmatpush3.bf16.msra.mxu1 %v1009_v9  ;;  %v296_v49 = vld [vmem:[%s1627_s25 + $0x21] sm:$0xff]  ;;  %v378_v60 = vld [vmem:[%s1627_s25 + $0x2a] sm:$0xff] }
  0x1e   : > { %496 = vrot.lane.b32.xlu1 %v1656_v19, %s1571_s30  ;;  %285 = vst.msk [vmem:[#allocation2 + $0x18] sm:$0xff] %vm281_vm0, %v274_v7  ;;  %v396_v10 = vadd.f32 %v1632_v1, %v386_v5  ;;  %v1761_v14 = vadd.f32 %v1632_v1, %v467_v11  ;;  %v790_v32 = vmul.f32 %v1622_v0, %v780_v26  ;;  %v380_v2 = vld [vmem:[%s1627_s25 + $0x3a] sm:$0xff]  ;;  %v461_v9 = vld [vmem:[%s1627_s25 + $0x42] sm:$0xff]  ;;  %v539_v12 = vld [vmem:[%s1627_s25 + $0x2b] sm:$0xff] }
  0x1f   : > { %494 = vrot.lane.b32.xlu0 %v394_v13, %s1571_s30  ;;  %284 = vst.msk [vmem:[#allocation2 + $0x10] sm:$0xff] %vm281_vm0, %v273_v8  ;;  %v537_v13 = vld [vmem:[%s1627_s25 + $0x1b] sm:$0xff]  ;;  %v558_v18 = vadd.f32 %v1632_v1, %v548_v15  ;;  %v639_v22 = vadd.f32 %v1632_v1, %v629_v20  ;;  %v262_v41 = vmul.f32 %v1622_v0, %v246_v39  ;;  %v540_v11 = vld [vmem:[%s1627_s25 + $0x33] sm:$0xff] }
  0x20   : > { %v547_v16 = vmul.f32 %v1622_v0, %v537_v13  ;;  %v800_v43 = vadd.f32 %v1632_v1, %v790_v32  ;;  %v872_v44 = vmul.f32 %v1622_v0, %v862_v34  ;;  %v871_v45 = vmul.f32 %v1622_v0, %v861_v38  ;;  %v541_v17 = vld [vmem:[%s1627_s25 + $0x3b] sm:$0xff] }
  0x21   : > { %v306_v53 = vmul.f32 %v1622_v0, %v296_v49  ;;  %v388_v63 = vmul.f32 %v1622_v0, %v378_v60  ;;  %v390_v5 = vmul.f32 %v1622_v0, %v380_v2  ;;  %v549_v15 = vmul.f32 %v1622_v0, %v539_v12  ;;  %v783_v38 = vld [vmem:[%s1627_s25 + $0x3d] sm:$0xff]  ;;  %v782_v39 = vld [vmem:[%s1627_s25 + $0x35] sm:$0xff]  ;;  %v248_v49 = vld [vmem:[%s1627_s25 + $0x48] sm:$0xff] }
  0x22   : > { %577 = vrot.lane.b32.xlu1 %v556_v24, %s1572_s6  ;;  %v710_v24 = vmul.f32 %v1622_v0, %v700_v21  ;;  %v882_v51 = vadd.f32 %v1632_v1, %v872_v44  ;;  %v881_v52 = vadd.f32 %v1632_v1, %v871_v45  ;;  %v551_v21 = vmul.f32 %v1622_v0, %v541_v17  ;;  %v865_v60 = vld [vmem:[%s1627_s25 + $0x46] sm:$0xff] }
  0x23   : > { %575 = vrot.lane.b32.xlu0 %v555_v25, %s1572_s6  ;;  %v781_v25 = vld [vmem:[%s1627_s25 + $0x2d] sm:$0xff]  ;;  %v316_v58 = vadd.f32 %v1632_v1, %v306_v53  ;;  %v400_v7 = vadd.f32 %v1632_v1, %v390_v5  ;;  %v559_v20 = vadd.f32 %v1632_v1, %v549_v15 }
  0x24   : > { %v791_v31 = vmul.f32 %v1622_v0, %v781_v25  ;;  %v1790_v33 = vadd.f32 %v1632_v1, %v710_v24  ;;  %v561_v25 = vadd.f32 %v1632_v1, %v551_v21  ;;  %v301_v5 = vld [vmem:[%s1627_s25 + $0x49] sm:$0xff] }
  0x26   : > { %658 = vrot.lane.b32.xlu1 %v637_v29, %s1573_s9  ;;  %v801_v42 = vadd.f32 %v1632_v1, %v791_v31 }
  0x27   : > { %656 = vrot.lane.b32.xlu0 %v636_v30, %s1573_s9  ;;  %v259_v30 = vmul.f32 %v1622_v0, %v243_v28  ;;  %v622_v28 = vld [vmem:[%s1627_s25 + $0x3c] sm:$0xff] }
  0x28   : > { %v632_v31 = vmul.f32 %v1622_v0, %v622_v28 }
  0x29   : > { %v275_v37 = vadd.f32 %v1632_v1, %v259_v30 }
  0x2a   : > { %739 = vrot.lane.b32.xlu1 %v1685_v36, %s1574_s12  ;;  %v642_v34 = vadd.f32 %v1632_v1, %v632_v31 }
  0x2b   : > { %737 = vrot.lane.b32.xlu0 %v637_v29, %s1574_s12  ;;  %v260_v29 = vmul.f32 %v1622_v0, %v244_v27  ;;  %286 = vst.msk [vmem:[#allocation2 + $0x20] sm:$0xff] %vm281_vm0, %v275_v37  ;;  %v623_v27 = vld [vmem:[%s1627_s25 + $0x44] sm:$0xff] }
  0x2c   : > { %v633_v30 = vmul.f32 %v1622_v0, %v623_v27  ;;  %v543_v27 = vld [vmem:[%s1627_s25 + $0x4b] sm:$0xff] }
  0x2d   : > { %v276_v35 = vadd.f32 %v1632_v1, %v260_v29 }
  0x2e   : > { %820 = vrot.lane.b32.xlu1 %v799_v46, %s1575_s15  ;;  %v297_v46 = vld [vmem:[%s1627_s25 + $0x29] sm:$0xff]  ;;  %v643_v32 = vadd.f32 %v1632_v1, %v633_v30 }
  0x2f   : > { %818 = vrot.lane.b32.xlu0 %v798_v47, %s1575_s15  ;;  %287 = vst.msk [vmem:[#allocation2 + $0x28] sm:$0xff] %vm281_vm0, %v276_v35  ;;  %v278_v47 = vadd.f32 %v1632_v1, %v262_v41  ;;  %v307_v50 = vmul.f32 %v1622_v0, %v297_v46  ;;  %v704_v35 = vld [vmem:[%s1627_s25 + $0x4c] sm:$0xff]  ;;  %v792_v41 = vmul.f32 %v1622_v0, %v782_v39 }
  0x30   : > { %v714_v37 = vmul.f32 %v1622_v0, %v704_v35 }
  0x31   : > { %289 = vst.msk [vmem:[#allocation2 + $0x38] sm:$0xff] %vm281_vm0, %v278_v47  ;;  %v317_v57 = vadd.f32 %v1632_v1, %v307_v50  ;;  %v802_v46 = vadd.f32 %v1632_v1, %v792_v41  ;;  %v864_v47 = vld [vmem:[%s1627_s25 + $0x3e] sm:$0xff] }
  0x32   : > { %901 = vrot.lane.b32.xlu1 %v880_v55, %s1576_s22  ;;  %v298_v55 = vld [vmem:[%s1627_s25 + $0x31] sm:$0xff]  ;;  %v247_v50 = vld [vmem:[%s1627_s25 + $0x40] sm:$0xff] }
  0x33   : > { %899 = vrot.lane.b32.xlu0 %v879_v56, %s1576_s22  ;;  %v309_v56 = vmul.f32 %v1622_v0, %v299_v54  ;;  %v308_v59 = vmul.f32 %v1622_v0, %v298_v55  ;;  %v874_v55 = vmul.f32 %v1622_v0, %v864_v47 }
  0x35   : > { %v319_v61 = vadd.f32 %v1632_v1, %v309_v56  ;;  %v318_v62 = vadd.f32 %v1632_v1, %v308_v59  ;;  %v884_v2 = vadd.f32 %v1632_v1, %v874_v55 }
  0x36   : > { %338 = vrot.lane.b32.xlu1 %v315_v3, %s1569_s29  ;;  %v379_v3 = vld [vmem:[%s1627_s25 + $0x32] sm:$0xff] }
  0x37   : > { %336 = vrot.lane.b32.xlu0 %v314_v4, %s1569_s29  ;;  %v398_v4 = vadd.f32 %v1632_v1, %v388_v63  ;;  %v389_v6 = vmul.f32 %v1622_v0, %v379_v3 }
  0x39   : > { %v399_v8 = vadd.f32 %v1632_v1, %v389_v6  ;;  %v300_v6 = vld [vmem:[%s1627_s25 + $0x41] sm:$0xff] }
  0x3a   : > { %419 = vrot.lane.b32.xlu1 %v396_v10, %s1568_s28  ;;  %v310_v12 = vmul.f32 %v1622_v0, %v300_v6 }
  0x3b   : > { %417 = vrot.lane.b32.xlu0 %v1656_v19, %s1568_s28  ;;  %v557_v19 = vadd.f32 %v1632_v1, %v547_v16  ;;  %v542_v16 = vld [vmem:[%s1627_s25 + $0x43] sm:$0xff] }
  0x3e   : > { %500 = vrot.lane.b32.xlu1 %v1761_v14, %s1571_s30 }
  0x3f   : > { %498 = vrot.lane.b32.xlu0 %v396_v10, %s1571_s30  ;;  %v471_v10 = vmul.f32 %v1622_v0, %v461_v9  ;;  %v311_v9 = vmul.f32 %v1622_v0, %v301_v5 }
  0x41   : > { %v1856_v13 = vadd.f32 %v1632_v1, %v471_v10  ;;  %v321_v17 = vadd.f32 %v1632_v1, %v311_v9 }
  0x42   : > { %581 = vrot.lane.b32.xlu1 %v558_v18, %s1572_s6  ;;  %v552_v18 = vmul.f32 %v1622_v0, %v542_v16 }
  0x43   : > { %579 = vrot.lane.b32.xlu0 %v557_v19, %s1572_s6 }
  0x44   : > { %v562_v24 = vadd.f32 %v1632_v1, %v552_v18  ;;  %v320_v18 = vadd.f32 %v1632_v1, %v310_v12 }
  0x46   : > { %662 = vrot.lane.b32.xlu1 %v639_v22, %s1573_s9 }
  0x47   : > { %660 = vrot.lane.b32.xlu0 %v1685_v36, %s1573_s9  ;;  %v261_v36 = vmul.f32 %v1622_v0, %v245_v40  ;;  %v793_v40 = vmul.f32 %v1622_v0, %v783_v38 }
  0x49   : > { %v277_v48 = vadd.f32 %v1632_v1, %v261_v36  ;;  %v785_v36 = vld [vmem:[%s1627_s25 + $0x4d] sm:$0xff]  ;;  %v803_v45 = vadd.f32 %v1632_v1, %v793_v40  ;;  %v706_v40 = vld [vmem:[%s1627_s25 + $0x5c] sm:$0xff] }
  0x4a   : > { %743 = vrot.lane.b32.xlu1 %v1790_v33, %s1574_s12 }
  0x4b   : > { %741 = vrot.lane.b32.xlu0 %v639_v22, %s1574_s12  ;;  %288 = vst.msk [vmem:[#allocation2 + $0x30] sm:$0xff] %vm281_vm0, %v277_v48  ;;  %v621_v22 = vld [vmem:[%s1627_s25 + $0x34] sm:$0xff] }
  0x4c   : > { %v631_v26 = vmul.f32 %v1622_v0, %v621_v22  ;;  %v863_v48 = vld [vmem:[%s1627_s25 + $0x36] sm:$0xff] }
  0x4d   : > { %v873_v56 = vmul.f32 %v1622_v0, %v863_v48 }
  0x4e   : > { %824 = vrot.lane.b32.xlu1 %v801_v42, %s1575_s15  ;;  %v641_v29 = vadd.f32 %v1632_v1, %v631_v26  ;;  %v784_v42 = vld [vmem:[%s1627_s25 + $0x45] sm:$0xff]  ;;  %v544_v26 = vld [vmem:[%s1627_s25 + $0x53] sm:$0xff] }
  0x4f   : > { %822 = vrot.lane.b32.xlu0 %v800_v43, %s1575_s15  ;;  %v795_v43 = vmul.f32 %v1622_v0, %v785_v36  ;;  %v794_v44 = vmul.f32 %v1622_v0, %v784_v42  ;;  %v883_v3 = vadd.f32 %v1632_v1, %v873_v56  ;;  %v554_v31 = vmul.f32 %v1622_v0, %v544_v26 }
  0x51   : > { %v805_v53 = vadd.f32 %v1632_v1, %v795_v43  ;;  %v804_v54 = vadd.f32 %v1632_v1, %v794_v44  ;;  %v716_v43 = vmul.f32 %v1622_v0, %v706_v40  ;;  %v787_v44 = vld [vmem:[%s1627_s25 + $0x5d] sm:$0xff] }
  0x52   : > { %905 = vrot.lane.b32.xlu1 %v882_v51, %s1576_s22  ;;  %v264_v51 = vmul.f32 %v1622_v0, %v248_v49  ;;  %v797_v49 = vmul.f32 %v1622_v0, %v787_v44 }
  0x53   : > { %903 = vrot.lane.b32.xlu0 %v881_v52, %s1576_s22  ;;  %v263_v52 = vmul.f32 %v1622_v0, %v247_v50  ;;  %v726_v48 = vadd.f32 %v1632_v1, %v716_v43 }
  0x55   : > { %v279_v59 = vadd.f32 %v1632_v1, %v263_v52  ;;  %v867_v52 = vld [vmem:[%s1627_s25 + $0x56] sm:$0xff] }
  0x56   : > { %342 = vrot.lane.b32.xlu1 %v317_v57, %s1569_s29  ;;  %v866_v57 = vld [vmem:[%s1627_s25 + $0x4e] sm:$0xff] }
  0x57   : > { %340 = vrot.lane.b32.xlu0 %v316_v58, %s1569_s29  ;;  %v280_v58 = vadd.f32 %v1632_v1, %v264_v51  ;;  %290 = vst.msk [vmem:[#allocation2 + $0x40] sm:$0xff] %vm281_vm0, %v279_v59  ;;  %v876_v63 = vmul.f32 %v1622_v0, %v866_v57  ;;  %v868_v51 = vld [vmem:[%s1627_s25 + $0x5e] sm:$0xff]  ;;  %v877_v57 = vmul.f32 %v1622_v0, %v867_v52 }
  0x58   : > { %v878_v55 = vmul.f32 %v1622_v0, %v868_v51 }
  0x59   : > { %291 = vst.msk [vmem:[#allocation2 + $0x48] sm:$0xff] %vm281_vm0, %v280_v58  ;;  %v886_v10 = vadd.f32 %v1632_v1, %v876_v63 }
  0x5a   : > { %346 = vrot.lane.b32.xlu1 %v319_v61, %s1569_s29  ;;  %v888_v63 = vadd.f32 %v1632_v1, %v878_v55 }
  0x5b   : > { %344 = vrot.lane.b32.xlu0 %v318_v62, %s1569_s29 }
  0x5e   : > { %423 = vrot.lane.b32.xlu1 %v398_v4, %s1568_s28 }
  0x5f   : > { %421 = vrot.lane.b32.xlu0 %v1761_v14, %s1568_s28  ;;  %v550_v14 = vmul.f32 %v1622_v0, %v540_v11 }
  0x61   : > { %v560_v19 = vadd.f32 %v1632_v1, %v550_v14  ;;  %v382_v14 = vld [vmem:[%s1627_s25 + $0x4a] sm:$0xff] }
  0x62   : > { %427 = vrot.lane.b32.xlu1 %v400_v7, %s1568_s28 }
  0x63   : > { %425 = vrot.lane.b32.xlu0 %v399_v8, %s1568_s28 }
  0x66   : > { %504 = vrot.lane.b32.xlu1 %v399_v8, %s1571_s30 }
  0x67   : > { %502 = vrot.lane.b32.xlu0 %v398_v4, %s1571_s30  ;;  %v875_v4 = vmul.f32 %v1622_v0, %v865_v60 }
  0x69   : > { %v885_v11 = vadd.f32 %v1632_v1, %v875_v4 }
  0x6a   : > { %508 = vrot.lane.b32.xlu1 %v1856_v13, %s1571_s30 }
  0x6b   : > { %506 = vrot.lane.b32.xlu0 %v400_v7, %s1571_s30 }
  0x6e   : > { %585 = vrot.lane.b32.xlu1 %v560_v19, %s1572_s6  ;;  %v392_v19 = vmul.f32 %v1622_v0, %v382_v14 }
  0x6f   : > { %583 = vrot.lane.b32.xlu0 %v559_v20, %s1572_s6  ;;  %v463_v20 = vld [vmem:[%s1627_s25 + $0x52] sm:$0xff] }
  0x72   : > { %589 = vrot.lane.b32.xlu1 %v562_v24, %s1572_s6  ;;  %v402_v24 = vadd.f32 %v1632_v1, %v392_v19 }
  0x73   : > { %587 = vrot.lane.b32.xlu0 %v561_v25, %s1572_s6  ;;  %v473_v25 = vmul.f32 %v1622_v0, %v463_v20 }
  0x75   : > { %v483_v30 = vadd.f32 %v1632_v1, %v473_v25 }
  0x76   : > { %666 = vrot.lane.b32.xlu1 %v641_v29, %s1573_s9 }
  0x77   : > { %664 = vrot.lane.b32.xlu0 %v1790_v33, %s1573_s9  ;;  %v1896_v33 = vadd.f32 %v1632_v1, %v714_v37 }
  0x7a   : > { %670 = vrot.lane.b32.xlu1 %v643_v32, %s1573_s9 }
  0x7b   : > { %668 = vrot.lane.b32.xlu0 %v642_v34, %s1573_s9 }
  0x7e   : > { %747 = vrot.lane.b32.xlu1 %v642_v34, %s1574_s12  ;;  %v625_v34 = vld [vmem:[%s1627_s25 + $0x54] sm:$0xff] }
  0x7f   : > { %745 = vrot.lane.b32.xlu0 %v641_v29, %s1574_s12  ;;  %v635_v39 = vmul.f32 %v1622_v0, %v625_v34 }
  0x81   : > { %v645_v42 = vadd.f32 %v1632_v1, %v635_v39 }
  0x82   : > { %751 = vrot.lane.b32.xlu1 %v1896_v33, %s1574_s12 }
  0x83   : > { %749 = vrot.lane.b32.xlu0 %v643_v32, %s1574_s12  ;;  %v553_v32 = vmul.f32 %v1622_v0, %v543_v27 }
  0x85   : > { %v563_v38 = vadd.f32 %v1632_v1, %v553_v32 }
  0x86   : > { %828 = vrot.lane.b32.xlu1 %v803_v45, %s1575_s15  ;;  %v786_v45 = vld [vmem:[%s1627_s25 + $0x55] sm:$0xff] }
  0x87   : > { %826 = vrot.lane.b32.xlu0 %v802_v46, %s1575_s15  ;;  %v796_v50 = vmul.f32 %v1622_v0, %v786_v45 }
  0x88   : > { %v414_v61 = vpop.permute.xlu1 %413 }
  0x89   : > { %v333_v62 = vpop.permute.xlu0 %332  ;;  %v806_v56 = vadd.f32 %v1632_v1, %v796_v50 }
  0x8a   : > { %363 = vst.msk [vmem:[#allocation2] sm:$0xff] %vm362_vm3, %v333_v62  ;;  %832 = vrot.lane.b32.xlu1 %v805_v53, %s1575_s15 }
  0x8b   : > { %830 = vrot.lane.b32.xlu0 %v804_v54, %s1575_s15  ;;  %444 = vst.msk [vmem:[#allocation2] sm:$0xff] %vm443_vm4, %v414_v61 }
  0x8c   : > { %v416_v7 = vpop.permute.xlu1 %415 }
  0x8d   : > { %v335_v8 = vpop.permute.xlu0 %334 }
  0x8e   : > { %364 = vst.msk [vmem:[#allocation2 + $0x8] sm:$0xff] %vm362_vm3, %v335_v8  ;;  %909 = vrot.lane.b32.xlu1 %v884_v2, %s1576_s22  ;;  %v887_v2 = vadd.f32 %v1632_v1, %v877_v57 }
  0x8f   : > { %907 = vrot.lane.b32.xlu0 %v883_v3, %s1576_s22  ;;  %445 = vst.msk [vmem:[#allocation2 + $0x8] sm:$0xff] %vm443_vm4, %v416_v7 }
  0x90   : > { %v497_v15 = vpop.permute.xlu1 %496 }
  0x91   : > { %v495_v16 = vpop.permute.xlu0 %494  ;;  %526 = vst.msk [vmem:[#allocation2 + $0x8] sm:$0xff] %vm524_vm5, %v497_v15 }
  0x92   : > { %525 = vst.msk [vmem:[#allocation2] sm:$0xff] %vm524_vm5, %v495_v16  ;;  %913 = vrot.lane.b32.xlu1 %v886_v10, %s1576_s22 }
  0x93   : > { %911 = vrot.lane.b32.xlu0 %v885_v11, %s1576_s22 }
  0x94   : > { %v578_v21 = vpop.permute.xlu1 %577 }
  0x95   : > { %v576_v22 = vpop.permute.xlu0 %575  ;;  %607 = vst.msk [vmem:[#allocation2 + $0x8] sm:$0xff] %vm605_vm6, %v578_v21 }
  0x96   : > { %606 = vst.msk [vmem:[#allocation2] sm:$0xff] %vm605_vm6, %v576_v22  ;;  %350 = vrot.lane.b32.xlu1 %v321_v17, %s1569_s29 }
  0x97   : > { %348 = vrot.lane.b32.xlu0 %v320_v18, %s1569_s29 }
  0x98   : > { %v659_v28 = vpop.permute.xlu1 %658 }
  0x99   : > { %v657_v29 = vpop.permute.xlu0 %656  ;;  %688 = vst.msk [vmem:[#allocation2 + $0x8] sm:$0xff] %vm686_vm7, %v659_v28 }
  0x9a   : > { %687 = vst.msk [vmem:[#allocation2] sm:$0xff] %vm686_vm7, %v657_v29  ;;  %431 = vrot.lane.b32.xlu1 %v402_v24, %s1568_s28 }
  0x9b   : > { %429 = vrot.lane.b32.xlu0 %v1856_v13, %s1568_s28  ;;  %v564_v13 = vadd.f32 %v1632_v1, %v554_v31 }
  0x9c   : > { %v740_v35 = vpop.permute.xlu1 %739 }
  0x9d   : > { %v738_v37 = vpop.permute.xlu0 %737  ;;  %769 = vst.msk [vmem:[#allocation2 + $0x8] sm:$0xff] %vm767_vm8, %v740_v35 }
  0x9e   : > { %768 = vst.msk [vmem:[#allocation2] sm:$0xff] %vm767_vm8, %v738_v37  ;;  %512 = vrot.lane.b32.xlu1 %v483_v30, %s1571_s30 }
  0x9f   : > { %510 = vrot.lane.b32.xlu0 %v402_v24, %s1571_s30  ;;  %s235_s30 = scalar_lea.vmem %s2178_s5, %s1440_s27 }
  0xa0   : > { %v821_v41 = vpop.permute.xlu1 %820 }
  0xa1   : > { %v819_v36 = vpop.permute.xlu0 %818  ;;  %850 = vst.msk [vmem:[#allocation2 + $0x8] sm:$0xff] %vm848_vm9, %v821_v41 }
  0xa2   : > { %849 = vst.msk [vmem:[#allocation2] sm:$0xff] %vm848_vm9, %v819_v36  ;;  %593 = vrot.lane.b32.xlu1 %v564_v13, %s1572_s6 }
  0xa3   : > { %591 = vrot.lane.b32.xlu0 %v563_v38, %s1572_s6 }
  0xa4   : > { %v902_v46 = vpop.permute.xlu1 %901 }
  0xa5   : > { %v900_v47 = vpop.permute.xlu0 %899  ;;  %931 = vst.msk [vmem:[#allocation2 + $0x8] sm:$0xff] %vm929_vm10, %v902_v46 }
  0xa6   : > { %930 = vst.msk [vmem:[#allocation2] sm:$0xff] %vm929_vm10, %v900_v47  ;;  %674 = vrot.lane.b32.xlu1 %v645_v42, %s1573_s9 }
  0xa7   : > { %672 = vrot.lane.b32.xlu0 %v1896_v33, %s1573_s9  ;;  %v807_v33 = vadd.f32 %v1632_v1, %v797_v49 }
  0xa8   : > { %v339_v53 = vpop.permute.xlu1 %338 }
  0xa9   : > { %v337_v54 = vpop.permute.xlu0 %336  ;;  %366 = vst.msk [vmem:[#allocation2 + $0x18] sm:$0xff] %vm362_vm3, %v339_v53 }
  0xaa   : > { %365 = vst.msk [vmem:[#allocation2 + $0x10] sm:$0xff] %vm362_vm3, %v337_v54  ;;  %755 = vrot.lane.b32.xlu1 %v726_v48, %s1574_s12 }
  0xab   : > { %753 = vrot.lane.b32.xlu0 %v645_v42, %s1574_s12 }
  0xac   : > { %v420_v58 = vpop.permute.xlu1 %419  ;;  %v941_v61 = vld [vmem:[#allocation2 + $0x8] sm:$0xff] }
  0xad   : > { %v418_v59 = vpop.permute.xlu0 %417  ;;  %v940_v60 = vld [vmem:[#allocation2] sm:$0xff]  ;;  %447 = vst.msk [vmem:[#allocation2 + $0x18] sm:$0xff] %vm443_vm4, %v420_v58 }
  0xae   : > { %446 = vst.msk [vmem:[#allocation2 + $0x10] sm:$0xff] %vm443_vm4, %v418_v59  ;;  %v950_v62 = vpack.c.bf16 %v941_v61, %v940_v60  ;;  %836 = vrot.lane.b32.xlu1 %v807_v33, %s1575_s15 }
  0xaf   : > { %834 = vrot.lane.b32.xlu0 %v806_v56, %s1575_s15 }
  0xb0   : > { %1486 = vmatmul.mubr.msk.bf16.vlgmr.msra.gmra.mrb[0].mxu0 %vm991_vm11, %v950_v62  ;;  %v501_v0 = vpop.permute.xlu1 %500 }
  0xb1   : > { %v499_v3 = vpop.permute.xlu0 %498  ;;  %1489 = vmatprep.mubr.msk.bf16.mxu0 %vm1577_vm2, %v1570_v23  ;;  %528 = vst.msk [vmem:[#allocation2 + $0x18] sm:$0xff] %vm524_vm5, %v501_v0 }
  0xb2   : > { %527 = vst.msk [vmem:[#allocation2 + $0x10] sm:$0xff] %vm524_vm5, %v499_v3  ;;  %917 = vrot.lane.b32.xlu1 %v888_v63, %s1576_s22 }
  0xb3   : > { %915 = vrot.lane.b32.xlu0 %v887_v2, %s1576_s22 }
  0xb4   : > { %v582_v4 = vpop.permute.xlu1 %581 }
  0xb5   : > { %v580_v5 = vpop.permute.xlu0 %579  ;;  %609 = vst.msk [vmem:[#allocation2 + $0x18] sm:$0xff] %vm605_vm6, %v582_v4 }
  0xb6   : > { %608 = vst.msk [vmem:[#allocation2 + $0x10] sm:$0xff] %vm605_vm6, %v580_v5 }
  0xb8   : > { %v663_v1 = vpop.permute.xlu1 %662 }
  0xb9   : > { %v661_v6 = vpop.permute.xlu0 %660  ;;  %690 = vst.msk [vmem:[#allocation2 + $0x18] sm:$0xff] %vm686_vm7, %v663_v1 }
  0xba   : > { %689 = vst.msk [vmem:[#allocation2 + $0x10] sm:$0xff] %vm686_vm7, %v661_v6 }
  0xbc   : > { %v744_v7 = vpop.permute.xlu1 %743 }
  0xbd   : > { %v742_v8 = vpop.permute.xlu0 %741  ;;  %771 = vst.msk [vmem:[#allocation2 + $0x18] sm:$0xff] %vm767_vm8, %v744_v7 }
  0xbe   : > { %770 = vst.msk [vmem:[#allocation2 + $0x10] sm:$0xff] %vm767_vm8, %v742_v8 }
  0xc0   : > { %v825_v9 = vpop.permute.xlu1 %824 }
  0xc1   : > { %v823_v10 = vpop.permute.xlu0 %822  ;;  %852 = vst.msk [vmem:[#allocation2 + $0x18] sm:$0xff] %vm848_vm9, %v825_v9 }
  0xc2   : > { %851 = vst.msk [vmem:[#allocation2 + $0x10] sm:$0xff] %vm848_vm9, %v823_v10  ;;  %v1094_v10 = vlaneseq }
  0xc4   : > { %v906_v11 = vpop.permute.xlu1 %905 }
  0xc5   : > { %v904_v12 = vpop.permute.xlu0 %903  ;;  %933 = vst.msk [vmem:[#allocation2 + $0x18] sm:$0xff] %vm929_vm10, %v906_v11  ;;  %v2084_v11 = vshrl.u32 %v1094_v10, 7 }
  0xc6   : > { %932 = vst.msk [vmem:[#allocation2 + $0x10] sm:$0xff] %vm929_vm10, %v904_v12 }
  0xc7   : > { %v1096_v12 = vadd.s32 8, %v2084_v11  ;;  %v1101_v10 = vadd.s32 48, %v2084_v11 }
  0xc8   : > { %v343_v14 = vpop.permute.xlu1 %342 }
  0xc9   : > { %v341_v15 = vpop.permute.xlu0 %340  ;;  %368 = vst.msk [vmem:[#allocation2 + $0x28] sm:$0xff] %vm362_vm3, %v343_v14 }
  0xca   : > { %367 = vst.msk [vmem:[#allocation2 + $0x20] sm:$0xff] %vm362_vm3, %v341_v15  ;;  %v2088_v14 = vmul.u32.u64.low 3435973837, %v2084_v11  ;;  %v2089_v15 = vmul.u32.u64.high 3435973837, %v2084_v11, %v2088_v14 }
  0xcc   : > { %v347_v16 = vpop.permute.xlu1 %346  ;;  %v943_v19 = vld [vmem:[#allocation2 + $0x18] sm:$0xff] }
  0xcd   : > { %v345_v17 = vpop.permute.xlu0 %344  ;;  %v942_v18 = vld [vmem:[#allocation2 + $0x10] sm:$0xff]  ;;  %370 = vst.msk [vmem:[#allocation2 + $0x38] sm:$0xff] %vm362_vm3, %v347_v16 }
  0xce   : > { %369 = vst.msk [vmem:[#allocation2 + $0x30] sm:$0xff] %vm362_vm3, %v345_v17  ;;  %v951_v20 = vpack.c.bf16 %v943_v19, %v942_v18  ;;  %v2091_v16 = vmul.u32.u64.low 3435973837, %v1096_v12  ;;  %v2092_v17 = vmul.u32.u64.high 3435973837, %v1096_v12, %v2091_v16  ;;  %v1111_v18 = vshrl.u32 %v2089_v15, 3 }
  0xcf   : > { %v1102_v15 = vadd.s32 56, %v2084_v11 }
  0xd0   : > { %1490 = vmatmul.mubr.msk.bf16.gmra.mrb[4].mxu0 %vm991_vm11, %v951_v20  ;;  %v424_v21 = vpop.permute.xlu1 %423  ;;  %v1122_v19 = vshrl.u32 %v2092_v17, 3  ;;  %v1112_v20 = vmul.u32 10, %v1111_v18  ;;  %v2133_v16 = vmul.u32.u64.low 3435973837, %v1101_v10  ;;  %v2134_v17 = vmul.u32.u64.high 3435973837, %v1101_v10, %v2133_v16 }
  0xd1   : > { %v422_v22 = vpop.permute.xlu0 %421  ;;  %1493 = vmatprep.mubr.msk.bf16.mxu0 %vm1577_vm2, %v1570_v23  ;;  %449 = vst.msk [vmem:[#allocation2 + $0x28] sm:$0xff] %vm443_vm4, %v424_v21 }
  0xd2   : > { %448 = vst.msk [vmem:[#allocation2 + $0x20] sm:$0xff] %vm443_vm4, %v422_v22  ;;  %v1123_v21 = vmul.u32 10, %v1122_v19  ;;  %v1113_v22 = vsub.s32 %v2084_v11, %v1112_v20  ;;  %v2136_v18 = vmul.u32.u64.low 3435973837, %v1102_v15  ;;  %v2137_v19 = vmul.u32.u64.high 3435973837, %v1102_v15, %v2136_v18 }
  0xd4   : > { %v428_v24 = vpop.permute.xlu1 %427  ;;  %vm1215_vm12 = vcmp.ne.s32.totalorder %v1113_v22, 0  ;;  %vm1225_vm13 = vcmp.lt.s32.totalorder %v1113_v22, 0 }
  0xd5   : > { %v426_v25 = vpop.permute.xlu0 %425  ;;  %451 = vst.msk [vmem:[#allocation2 + $0x38] sm:$0xff] %vm443_vm4, %v428_v24  ;;  %v1124_v24 = vsub.s32 %v1096_v12, %v1123_v21  ;;  %vm1235_vm0 = vmand %vm1225_vm13, %vm1215_vm12 }
  0xd6   : > { %450 = vst.msk [vmem:[#allocation2 + $0x30] sm:$0xff] %vm443_vm4, %v426_v25  ;;  %v1245_v25 = vadd.s32 10, %v1113_v22 }
  0xd7   : > { %vm1216_vm14 = vcmp.ne.s32.totalorder %v1124_v24, 0  ;;  %vm1226_vm15 = vcmp.lt.s32.totalorder %v1124_v24, 0 }
  0xd8   : > { %v505_v26 = vpop.permute.xlu1 %504  ;;  %vm1236_vm1 = vmand %vm1226_vm15, %vm1216_vm14 }
  0xd9   : > { %v503_v27 = vpop.permute.xlu0 %502  ;;  %530 = vst.msk [vmem:[#allocation2 + $0x28] sm:$0xff] %vm524_vm5, %v505_v26  ;;  %v1246_v26 = vadd.s32 10, %v1124_v24 }
  0xda   : > { %529 = vst.msk [vmem:[#allocation2 + $0x20] sm:$0xff] %vm524_vm5, %v503_v27  ;;  %v1255_v27 = vsel %vm1235_vm0, %v1245_v25, %v1113_v22 }
  0xdc   : > { %v509_v28 = vpop.permute.xlu1 %508 }
  0xdd   : > { %v507_v29 = vpop.permute.xlu0 %506  ;;  %532 = vst.msk [vmem:[#allocation2 + $0x38] sm:$0xff] %vm524_vm5, %v509_v28  ;;  %v1256_v28 = vsel %vm1236_vm1, %v1246_v26, %v1124_v24  ;;  %v1177_v24 = vshrl.u32 %v2134_v17, 3  ;;  %v1188_v26 = vshrl.u32 %v2137_v19, 3 }
  0xde   : > { %531 = vst.msk [vmem:[#allocation2 + $0x30] sm:$0xff] %vm524_vm5, %v507_v29  ;;  %v1097_v29 = vadd.s32 16, %v2084_v11 }
  0xe0   : > { %v586_v30 = vpop.permute.xlu1 %585 }
  0xe1   : > { %v584_v31 = vpop.permute.xlu0 %583  ;;  %611 = vst.msk [vmem:[#allocation2 + $0x28] sm:$0xff] %vm605_vm6, %v586_v30  ;;  %v1098_v30 = vadd.s32 24, %v2084_v11 }
  0xe2   : > { %610 = vst.msk [vmem:[#allocation2 + $0x20] sm:$0xff] %vm605_vm6, %v584_v31 }
  0xe4   : > { %v590_v32 = vpop.permute.xlu1 %589 }
  0xe5   : > { %v588_v34 = vpop.permute.xlu0 %587  ;;  %613 = vst.msk [vmem:[#allocation2 + $0x38] sm:$0xff] %vm605_vm6, %v590_v32 }
  0xe6   : > { %612 = vst.msk [vmem:[#allocation2 + $0x30] sm:$0xff] %vm605_vm6, %v588_v34  ;;  %v2106_v32 = vmul.u32.u64.low 3435973837, %v1097_v29  ;;  %v2107_v34 = vmul.u32.u64.high 3435973837, %v1097_v29, %v2106_v32 }
  0xe8   : > { %v667_v35 = vpop.permute.xlu1 %666 }
  0xe9   : > { %v665_v37 = vpop.permute.xlu0 %664  ;;  %692 = vst.msk [vmem:[#allocation2 + $0x28] sm:$0xff] %vm686_vm7, %v667_v35 }
  0xea   : > { %691 = vst.msk [vmem:[#allocation2 + $0x20] sm:$0xff] %vm686_vm7, %v665_v37 }
  0xec   : > { %v671_v13 = vpop.permute.xlu1 %670 }
  0xed   : > { %v669_v38 = vpop.permute.xlu0 %668  ;;  %694 = vst.msk [vmem:[#allocation2 + $0x38] sm:$0xff] %vm686_vm7, %v671_v13 }
  0xee   : > { %693 = vst.msk [vmem:[#allocation2 + $0x30] sm:$0xff] %vm686_vm7, %v669_v38  ;;  %v2110_v13 = vmul.u32.u64.low 3435973837, %v1098_v30  ;;  %v2111_v38 = vmul.u32.u64.high 3435973837, %v1098_v30, %v2110_v13 }
  0xf0   : > { %v748_v39 = vpop.permute.xlu1 %747 }
  0xf1   : > { %v746_v40 = vpop.permute.xlu0 %745  ;;  %773 = vst.msk [vmem:[#allocation2 + $0x28] sm:$0xff] %vm767_vm8, %v748_v39 }
  0xf2   : > { %772 = vst.msk [vmem:[#allocation2 + $0x20] sm:$0xff] %vm767_vm8, %v746_v40 }
  0xf4   : > { %v752_v41 = vpop.permute.xlu1 %751 }
  0xf5   : > { %v750_v36 = vpop.permute.xlu0 %749  ;;  %775 = vst.msk [vmem:[#allocation2 + $0x38] sm:$0xff] %vm767_vm8, %v752_v41 }
  0xf6   : > { %774 = vst.msk [vmem:[#allocation2 + $0x30] sm:$0xff] %vm767_vm8, %v750_v36 }
  0xf8   : > { %v829_v42 = vpop.permute.xlu1 %828 }
  0xf9   : > { %v827_v43 = vpop.permute.xlu0 %826  ;;  %854 = vst.msk [vmem:[#allocation2 + $0x28] sm:$0xff] %vm848_vm9, %v829_v42 }
  0xfa   : > { %853 = vst.msk [vmem:[#allocation2 + $0x20] sm:$0xff] %vm848_vm9, %v827_v43 }
  0xfc   : > { %v833_v44 = vpop.permute.xlu1 %832 }
  0xfd   : > { %v831_v45 = vpop.permute.xlu0 %830  ;;  %856 = vst.msk [vmem:[#allocation2 + $0x38] sm:$0xff] %vm848_vm9, %v833_v44 }
  0xfe   : > { %855 = vst.msk [vmem:[#allocation2 + $0x30] sm:$0xff] %vm848_vm9, %v831_v45 }
 0x100   : > { %v910_v46 = vpop.permute.xlu1 %909 }
 0x101   : > { %v908_v47 = vpop.permute.xlu0 %907  ;;  %935 = vst.msk [vmem:[#allocation2 + $0x28] sm:$0xff] %vm929_vm10, %v910_v46  ;;  %v1133_v46 = vshrl.u32 %v2107_v34, 3 }
 0x102   : > { %934 = vst.msk [vmem:[#allocation2 + $0x20] sm:$0xff] %vm929_vm10, %v908_v47 }
 0x104   : > { %v914_v48 = vpop.permute.xlu1 %913 }
 0x105   : > { %v912_v49 = vpop.permute.xlu0 %911  ;;  %937 = vst.msk [vmem:[#allocation2 + $0x38] sm:$0xff] %vm929_vm10, %v914_v48  ;;  %v1144_v48 = vshrl.u32 %v2111_v38, 3 }
 0x106   : > { %936 = vst.msk [vmem:[#allocation2 + $0x30] sm:$0xff] %vm929_vm10, %v912_v49  ;;  %v1134_v49 = vmul.u32 10, %v1133_v46 }
 0x108   : > { %v351_v50 = vpop.permute.xlu1 %350  ;;  %v945_v53 = vld [vmem:[#allocation2 + $0x28] sm:$0xff] }
 0x109   : > { %v349_v51 = vpop.permute.xlu0 %348  ;;  %v944_v52 = vld [vmem:[#allocation2 + $0x20] sm:$0xff]  ;;  %372 = vst.msk [vmem:[#allocation2 + $0x48] sm:$0xff] %vm362_vm3, %v351_v50  ;;  %v1145_v50 = vmul.u32 10, %v1144_v48 }
 0x10a   : > { %371 = vst.msk [vmem:[#allocation2 + $0x40] sm:$0xff] %vm362_vm3, %v349_v51  ;;  %v952_v54 = vpack.c.bf16 %v945_v53, %v944_v52  ;;  %vm1266_vm3 = vcmp.lt.s32.totalorder %v1256_v28, 8  ;;  %v1135_v51 = vsub.s32 %v1097_v29, %v1134_v49  ;;  %v1178_v28 = vmul.u32 10, %v1177_v24 }
 0x10b   : > { %v1454_v37 = vsel %vm1266_vm3, 1.0, %v1570_v23  ;;  %v1146_v52 = vsub.s32 %v1098_v30, %v1145_v50  ;;  %v1189_v30 = vmul.u32 10, %v1188_v26 }
 0x10c   : > { %1494 = vmatmul.mubr.msk.bf16.gmra.mrb[8].mxu0 %vm991_vm11, %v952_v54  ;;  %v432_v55 = vpop.permute.xlu1 %431  ;;  %v947_v57 = vld [vmem:[#allocation2 + $0x38] sm:$0xff]  ;;  %v1247_v53 = vadd.s32 10, %v1135_v51 }
 0x10d   : > { %v430_v33 = vpop.permute.xlu0 %429  ;;  %v946_v56 = vld [vmem:[#allocation2 + $0x30] sm:$0xff]  ;;  %453 = vst.msk [vmem:[#allocation2 + $0x48] sm:$0xff] %vm443_vm4, %v432_v55  ;;  %v1248_v54 = vadd.s32 10, %v1146_v52  ;;  %v1190_v34 = vsub.s32 %v1102_v15, %v1189_v30 }
 0x10e   : > { %452 = vst.msk [vmem:[#allocation2 + $0x40] sm:$0xff] %vm443_vm4, %v430_v33  ;;  %v953_v58 = vpack.c.bf16 %v947_v57, %v946_v56  ;;  %vm1217_vm4 = vcmp.ne.s32.totalorder %v1135_v51, 0 }
 0x110   : > { %1498 = vmatmul.mubr.msk.bf16.vlgmr.msra.gmra.mrb[0].mxu1 %vm991_vm11, %v953_v58  ;;  %v513_v59 = vpop.permute.xlu1 %512 }
 0x111   : > { %v511_v60 = vpop.permute.xlu0 %510  ;;  %1501 = vmatprep.mubr.msk.bf16.mxu1 %vm1577_vm2, %v1570_v23  ;;  %534 = vst.msk [vmem:[#allocation2 + $0x48] sm:$0xff] %vm524_vm5, %v513_v59  ;;  %vm1265_vm2 = vcmp.lt.s32.totalorder %v1255_v27, 8 }
 0x112   : > { %533 = vst.msk [vmem:[#allocation2 + $0x40] sm:$0xff] %vm524_vm5, %v511_v60  ;;  %v1453_v31 = vsel %vm1265_vm2, 1.0, %v1570_v23  ;;  %vm1227_vm5 = vcmp.lt.s32.totalorder %v1135_v51, 0 }
 0x114   : > { %v594_v61 = vpop.permute.xlu1 %593 }
 0x115   : > { %v592_v62 = vpop.permute.xlu0 %591  ;;  %615 = vst.msk [vmem:[#allocation2 + $0x48] sm:$0xff] %vm605_vm6, %v594_v61 }
 0x116   : > { %614 = vst.msk [vmem:[#allocation2 + $0x40] sm:$0xff] %vm605_vm6, %v592_v62  ;;  %vm1218_vm6 = vcmp.ne.s32.totalorder %v1146_v52, 0 }
 0x118   : > { %v675_v63 = vpop.permute.xlu1 %674 }
 0x119   : > { %v673_v2 = vpop.permute.xlu0 %672  ;;  %696 = vst.msk [vmem:[#allocation2 + $0x48] sm:$0xff] %vm686_vm7, %v675_v63 }
 0x11a   : > { %695 = vst.msk [vmem:[#allocation2 + $0x40] sm:$0xff] %vm686_vm7, %v673_v2  ;;  %vm1228_vm7 = vcmp.lt.s32.totalorder %v1146_v52, 0 }
 0x11c   : > { %v756_v0 = vpop.permute.xlu1 %755 }
 0x11d   : > { %v754_v3 = vpop.permute.xlu0 %753  ;;  %777 = vst.msk [vmem:[#allocation2 + $0x48] sm:$0xff] %vm767_vm8, %v756_v0 }
 0x11e   : > { %776 = vst.msk [vmem:[#allocation2 + $0x40] sm:$0xff] %vm767_vm8, %v754_v3  ;;  %vm1237_vm8 = vmand %vm1227_vm5, %vm1217_vm4  ;;  %vm1222_vm4 = vcmp.ne.s32.totalorder %v1190_v34, 0  ;;  %vm1232_vm5 = vcmp.lt.s32.totalorder %v1190_v34, 0 }
 0x11f   : > { %v1257_v55 = vsel %vm1237_vm8, %v1247_v53, %v1135_v51  ;;  %vm1242_vm8 = vmand %vm1232_vm5, %vm1222_vm4 }
 0x120   : > { %v837_v4 = vpop.permute.xlu1 %836 }
 0x121   : > { %v835_v5 = vpop.permute.xlu0 %834  ;;  %858 = vst.msk [vmem:[#allocation2 + $0x48] sm:$0xff] %vm848_vm9, %v837_v4 }
 0x122   : > { %857 = vst.msk [vmem:[#allocation2 + $0x40] sm:$0xff] %vm848_vm9, %v835_v5  ;;  %vm1238_vm9 = vmand %vm1228_vm7, %vm1218_vm6 }
 0x123   : > { %v1258_v33 = vsel %vm1238_vm9, %v1248_v54, %v1146_v52 }
 0x124   : > { %v918_v1 = vpop.permute.xlu1 %917 }
 0x125   : > { %v916_v6 = vpop.permute.xlu0 %915  ;;  %939 = vst.msk [vmem:[#allocation2 + $0x48] sm:$0xff] %vm929_vm10, %v918_v1 }
 0x126   : > { %938 = vst.msk [vmem:[#allocation2 + $0x40] sm:$0xff] %vm929_vm10, %v916_v6  ;;  %vm1267_vm10 = vcmp.lt.s32.totalorder %v1257_v55, 8  ;;  %v1099_v6 = vadd.s32 32, %v2084_v11 }
 0x127   : > { %v1455_v56 = vsel %vm1267_vm10, 1.0, %v1570_v23 }
 0x12c   : > { %v949_v8 = vld [vmem:[#allocation2 + $0x48] sm:$0xff] }
 0x12d   : > { %v948_v7 = vld [vmem:[#allocation2 + $0x40] sm:$0xff] }
 0x12e   : > { %v954_v9 = vpack.c.bf16 %v949_v8, %v948_v7  ;;  %v1100_v7 = vadd.s32 40, %v2084_v11 }
 0x130   : > { %1502 = vmatmul.mubr.msk.bf16.gmra.mrb[4].mxu1 %vm991_vm11, %v954_v9  ;;  %vm1268_vm11 = vcmp.lt.s32.totalorder %v1258_v33, 8  ;;  %v2125_v8 = vmul.u32.u64.low 3435973837, %v1099_v6  ;;  %v2126_v9 = vmul.u32.u64.high 3435973837, %v1099_v6, %v2125_v8 }
 0x131   : > { %v1456_v58 = vsel %vm1268_vm11, 1.0, %v1570_v23  ;;  %v2129_v12 = vmul.u32.u64.low 3435973837, %v1100_v7  ;;  %v2130_v14 = vmul.u32.u64.high 3435973837, %v1100_v7, %v2129_v12 }
 0x132   : > { %v1155_v20 = vshrl.u32 %v2126_v9, 3 }
 0x133   : > { %v1166_v21 = vshrl.u32 %v2130_v14, 3 }
 0x134   : > { %v1156_v22 = vmul.u32 10, %v1155_v20 }
 0x135   : > { %v1167_v25 = vmul.u32 10, %v1166_v21 }
 0x136   : > { %v1157_v27 = vsub.s32 %v1099_v6, %v1156_v22 }
 0x137   : > { %v1168_v29 = vsub.s32 %v1100_v7, %v1167_v25 }
 0x138   : > { %vm1219_vm12 = vcmp.ne.s32.totalorder %v1157_v27, 0  ;;  %vm1229_vm13 = vcmp.lt.s32.totalorder %v1157_v27, 0  ;;  %v1249_v32 = vadd.s32 10, %v1157_v27 }
 0x139   : > { %vm1220_vm14 = vcmp.ne.s32.totalorder %v1168_v29, 0  ;;  %vm1230_vm15 = vcmp.lt.s32.totalorder %v1168_v29, 0  ;;  %vm1239_vm0 = vmand %vm1229_vm13, %vm1219_vm12 }
 0x13a   : > { %vm1240_vm3 = vmand %vm1230_vm15, %vm1220_vm14 }
 0x183   : > { %v1045_v35 = vpop.f32.mrb[0].mxu0 }
 0x184   : > { %1084 = vst [vmem:[%s2103_s26] sm:$0xff] %v1045_v35  ;;  %v1295_v39 = vmul.f32 %v1453_v31, %v1045_v35  ;;  %v1487_v40 = vpop.f32.mrb[1].mxu0  ;;  %v1179_v31 = vsub.s32 %v1101_v10, %v1178_v28 }
 0x185   : > { %v1048_v41 = vpop.f32.mrb[2].mxu0 }
 0x186   : > { %1085 = vst [vmem:[%s2103_s26 + $0x8] sm:$0xff] %v1048_v41  ;;  %v1296_v36 = vmul.f32 %v1454_v37, %v1048_v41  ;;  %v1488_v42 = vpop.f32.mrb[3].mxu0  ;;  %v1321_v43 = vmul.f32 %v1295_v39, %v1045_v35  ;;  %v1250_v35 = vadd.s32 10, %v1168_v29  ;;  %vm1221_vm1 = vcmp.ne.s32.totalorder %v1179_v31, 0 }
 0x187   : > { %vm1231_vm2 = vcmp.lt.s32.totalorder %v1179_v31, 0  ;;  %v1259_v37 = vsel %vm1239_vm0, %v1249_v32, %v1157_v27  ;;  %v1251_v13 = vadd.s32 10, %v1179_v31  ;;  %v1103_v42 = vadd.s32 64, %v2084_v11 }
 0x188   : > { %v1305_v44 = vadd.f32 %v1296_v36, %v1295_v39  ;;  %v1322_v45 = vmul.f32 %v1296_v36, %v1048_v41  ;;  %vm1241_vm6 = vmand %vm1231_vm2, %vm1221_vm1  ;;  %v1260_v38 = vsel %vm1240_vm3, %v1250_v35, %v1168_v29  ;;  %v1252_v39 = vadd.s32 10, %v1190_v34 }
 0x189   : > { %vm1269_vm7 = vcmp.lt.s32.totalorder %v1259_v37, 8  ;;  %v1261_v40 = vsel %vm1241_vm6, %v1251_v13, %v1179_v31  ;;  %vm1270_vm9 = vcmp.lt.s32.totalorder %v1260_v38, 8 }
 0x18a   : > { %v1331_v47 = vadd.f32 %v1322_v45, %v1321_v43  ;;  %v1457_v41 = vsel %vm1269_vm7, 1.0, %v1570_v23  ;;  %v1262_v36 = vsel %vm1242_vm8, %v1252_v39, %v1190_v34  ;;  %vm1271_vm10 = vcmp.lt.s32.totalorder %v1261_v40, 8 }
 0x18b   : > { %v1104_v45 = vadd.s32 72, %v2084_v11  ;;  %vm1272_vm11 = vcmp.lt.s32.totalorder %v1262_v36, 8  ;;  %v1459_v49 = vsel %vm1271_vm10, 1.0, %v1570_v23 }
 0x18c   : > { %v2149_v50 = vmul.u32.u64.low 3435973837, %v1103_v42  ;;  %v2150_v51 = vmul.u32.u64.high 3435973837, %v1103_v42, %v2149_v50  ;;  %v1460_v11 = vsel %vm1272_vm11, 1.0, %v1570_v23 }
 0x18e   : > { %v1199_v9 = vshrl.u32 %v2150_v51, 3 }
 0x190   : > { %v1200_v12 = vmul.u32 10, %v1199_v9 }
 0x192   : > { %v1201_v15 = vsub.s32 %v1103_v42, %v1200_v12 }
 0x194   : > { %vm1223_vm12 = vcmp.ne.s32.totalorder %v1201_v15, 0  ;;  %vm1233_vm13 = vcmp.lt.s32.totalorder %v1201_v15, 0  ;;  %v1253_v17 = vadd.s32 10, %v1201_v15 }
 0x195   : > { %vm1243_vm0 = vmand %vm1233_vm13, %vm1223_vm12 }
 0x196   : > { %v1263_v19 = vsel %vm1243_vm0, %v1253_v17, %v1201_v15 }
 0x197   : > { %vm1273_vm2 = vcmp.lt.s32.totalorder %v1263_v19, 8 }
 0x198   : > { %v1461_v21 = vsel %vm1273_vm2, 1.0, %v1570_v23 }
 0x1a3   : > { %v1053_v57 = vpop.f32.mrb[4].mxu0 }
 0x1a4   : > { %1086 = vst [vmem:[%s2103_s26 + $0x10] sm:$0xff] %v1053_v57  ;;  %v1297_v59 = vmul.f32 %v1455_v56, %v1053_v57  ;;  %v1491_v60 = vpop.f32.mrb[5].mxu0 }
 0x1a5   : > { %v1056_v61 = vpop.f32.mrb[6].mxu0 }
 0x1a6   : > { %v1306_v62 = vadd.f32 %v1305_v44, %v1297_v59  ;;  %v1323_v63 = vmul.f32 %v1297_v59, %v1053_v57  ;;  %1087 = vst [vmem:[%s2103_s26 + $0x18] sm:$0xff] %v1056_v61  ;;  %v1298_v2 = vmul.f32 %v1456_v58, %v1056_v61  ;;  %v1492_v0 = vpop.f32.mrb[7].mxu0  ;;  %v1458_v44 = vsel %vm1270_vm9, 1.0, %v1570_v23 }
 0x1a7   : > { %v2154_v56 = vmul.u32.u64.low 3435973837, %v1104_v45  ;;  %v2155_v57 = vmul.u32.u64.high 3435973837, %v1104_v45, %v2154_v56 }
 0x1a8   : > { %v1332_v3 = vadd.f32 %v1331_v47, %v1323_v63  ;;  %v1307_v4 = vadd.f32 %v1306_v62, %v1298_v2  ;;  %v1324_v5 = vmul.f32 %v1298_v2, %v1056_v61 }
 0x1aa   : > { %v2121_v1 = vadd.f32 %v1332_v3, %v1324_v5 }
 0x1df   : > { %v1061_v43 = vpop.f32.mrb[8].mxu0 }
 0x1e0   : > { %1088 = vst [vmem:[%s2103_s26 + $0x20] sm:$0xff] %v1061_v43  ;;  %v1299_v46 = vmul.f32 %v1457_v41, %v1061_v43  ;;  %v1495_v47 = vpop.f32.mrb[9].mxu0 }
 0x1e1   : > { %v1064_v48 = vpop.f32.mrb[10].mxu0 }
 0x1e2   : > { %v1308_v52 = vadd.f32 %v1307_v4, %v1299_v46  ;;  %v1325_v53 = vmul.f32 %v1299_v46, %v1061_v43  ;;  %1089 = vst [vmem:[%s2103_s26 + $0x28] sm:$0xff] %v1064_v48  ;;  %v1300_v54 = vmul.f32 %v1458_v44, %v1064_v48  ;;  %v1496_v55 = vpop.f32.mrb[11].mxu0 }
 0x1e3   : > { %v1069_v33 = vpop.f32.mrb[0].mxu1 }
 0x1e4   : > { %v1334_v58 = vadd.f32 %v2121_v1, %v1325_v53  ;;  %v1309_v59 = vadd.f32 %v1308_v52, %v1300_v54  ;;  %v1326_v60 = vmul.f32 %v1300_v54, %v1064_v48  ;;  %1090 = vst [vmem:[%s2103_s26 + $0x30] sm:$0xff] %v1069_v33  ;;  %v1301_v61 = vmul.f32 %v1459_v49, %v1069_v33  ;;  %v1499_v62 = vpop.f32.mrb[1].mxu1 }
 0x1e5   : > { %v1072_v63 = vpop.f32.mrb[2].mxu1  ;;  %v1210_v1 = vshrl.u32 %v2155_v57, 3 }
 0x1e6   : > { %v1335_v2 = vadd.f32 %v1334_v58, %v1326_v60  ;;  %v1310_v0 = vadd.f32 %v1309_v59, %v1301_v61  ;;  %v1327_v3 = vmul.f32 %v1301_v61, %v1069_v33  ;;  %1091 = vst [vmem:[%s2103_s26 + $0x38] sm:$0xff] %v1072_v63  ;;  %v1302_v4 = vmul.f32 %v1460_v11, %v1072_v63  ;;  %v1500_v5 = vpop.f32.mrb[3].mxu1 }
 0x1e7   : > { %v1211_v14 = vmul.u32 10, %v1210_v1 }
 0x1e8   : > { %v1336_v6 = vadd.f32 %v1335_v2, %v1327_v3  ;;  %v1311_v7 = vadd.f32 %v1310_v0, %v1302_v4  ;;  %v1328_v8 = vmul.f32 %v1302_v4, %v1072_v63 }
 0x1e9   : > { %v1212_v16 = vsub.s32 %v1104_v45, %v1211_v14 }
 0x1ea   : > { %v1337_v10 = vadd.f32 %v1336_v6, %v1328_v8 }
 0x1eb   : > { %vm1224_vm14 = vcmp.ne.s32.totalorder %v1212_v16, 0  ;;  %vm1234_vm15 = vcmp.lt.s32.totalorder %v1212_v16, 0  ;;  %v1254_v18 = vadd.s32 10, %v1212_v16 }
 0x1ec   : > { %vm1244_vm1 = vmand %vm1234_vm15, %vm1224_vm14 }
 0x1ed   : > { %v1264_v20 = vsel %vm1244_vm1, %v1254_v18, %v1212_v16 }
 0x1ee   : > { %vm1274_vm3 = vcmp.lt.s32.totalorder %v1264_v20, 8 }
 0x1ef   : > { %v1462_v24 = vsel %vm1274_vm3, 1.0, %v1570_v23 }
 0x203   : > { %v1077_v22 = vpop.f32.mrb[4].mxu1 }
 0x204   : > { %1092 = vst [vmem:[%s2103_s26 + $0x40] sm:$0xff] %v1077_v22  ;;  %v1303_v25 = vmul.f32 %v1461_v21, %v1077_v22  ;;  %v1503_v26 = vpop.f32.mrb[5].mxu1 }
 0x205   : > { %v1080_v27 = vpop.f32.mrb[6].mxu1 }
 0x206   : > { %v1312_v28 = vadd.f32 %v1311_v7, %v1303_v25  ;;  %v1329_v29 = vmul.f32 %v1303_v25, %v1077_v22  ;;  %1093 = vst [vmem:[%s2103_s26 + $0x48] sm:$0xff] %v1080_v27  ;;  %v1304_v30 = vmul.f32 %v1462_v24, %v1080_v27  ;;  %v1504_v31 = vpop.f32.mrb[7].mxu1 }
 0x208   : > { %v1338_v32 = vadd.f32 %v1337_v10, %v1329_v29  ;;  %v1313_v34 = vadd.f32 %v1312_v28, %v1304_v30  ;;  %v1330_v35 = vmul.f32 %v1304_v30, %v1080_v27 }
 0x20a   : > { %v1314_v37 = vrot.slane %v1313_v34, 4  ;;  %v1339_v13 = vadd.f32 %v1338_v32, %v1330_v35 }
 0x20c   : > { %v1315_v38 = vadd.f32 %v1314_v37, %v1313_v34  ;;  %v1340_v39 = vrot.slane %v1339_v13, 4 }
 0x20e   : > { %v1316_v40 = vrot.slane %v1315_v38, 2  ;;  %v1341_v41 = vadd.f32 %v1340_v39, %v1339_v13 }
 0x210   : > { %v1317_v23 = vadd.f32 %v1316_v40, %v1315_v38  ;;  %v1342_v36 = vrot.slane %v1341_v41, 2 }
 0x212   : > { %v1318_v42 = vrot.slane %v1317_v23, 1  ;;  %v1343_v43 = vadd.f32 %v1342_v36, %v1341_v41 }
 0x214   : > { %v1319_v44 = vadd.f32 %v1318_v42, %v1317_v23  ;;  %v1344_v45 = vrot.slane %v1343_v43, 1 }
 0x216   : > { %1320 = vst [vmem:[%s235_s30] sm:$0x1] %v1319_v44  ;;  %v1345_v46 = vadd.f32 %v1344_v45, %v1343_v43 }
 0x218   : > { %1346 = vst [vmem:[%s235_s30 + $0x1] sm:$0x1] %v1345_v46 }
 0x219 PF: > { %s16_s18 = sadd.s32 1, %s1566_s18  }
 0x21a   : > { %p13_p4 = scmp.ge.s32.totalorder %s16_s18, 4  }
 0x21c   :  { %15 = sbr.rel (!%p13_p4) target bundleno = 1 (0x1), region = 78 }

</bundles_post_ra>
